<compile_context>
chip_gen: v7x
topology: tpu7x:2x2x1
jax: 0.10.0
libtpu: 0.0.40
codegen_flags: <defaults>
</compile_context>

<pallas_src>
import functools

import jax
import jax.numpy as jnp
import numpy as np
from jax.experimental import pallas as pl
from jax.experimental.pallas import tpu as pltpu


def _round_up(x, m):
    return (x + m - 1) // m * m


# -----------------------------------------------------------------------------
# Fused forward kernel: encode -> n_layer LSTM -> classifier (one batch tile)
# -----------------------------------------------------------------------------
def _m5_fused_kernel(feat_ref, w_in_ref, b_in_ref, wih_ref, whh_ref, bias_ref,
                     w1_ref, b1_ref, w2_ref, b2_ref, out_ref,
                     xbuf, gbuf, h_sc, c_sc, *, seq_len, tb, hidden):
    T, TB, H = seq_len, tb, hidden
    H4 = 4 * H
    L = wih_ref.shape[0]
    f32 = jnp.float32

    # ---- Encoder: one lane-dense bf16 matmul. Zero-padded w_in columns / b_in make
    #      xbuf lanes >= E exactly zero (keeps the stale-lane invariant finite).
    feat = feat_ref[0]                                               # [T*TB, F_pad] bf16
    xbuf[...] = (jnp.dot(feat, w_in_ref[...], preferred_element_type=f32)
                 + b_in_ref[...]).astype(xbuf.dtype)

    # Single-tanh gate trick: the 0.5 pre-scale of the i/f/o gate columns is folded into
    # wih/whh/bias in the wrapper, so sigmoid(z) = 0.5*tanh(z/2)+0.5 = tanh(g)*0.5 + 0.5
    # while the g gate keeps tanh(g). Hoisted loop invariants (no CSE of broadcasts).
    lane = jax.lax.broadcasted_iota(jnp.int32, (TB, H4), 1)
    is_g = (lane >= 2 * H) & (lane < 3 * H)
    act_scale = jnp.where(is_g, 1.0, 0.5).astype(f32)
    act_off = jnp.where(is_g, 0.0, 0.5).astype(f32)

    for l in range(L):                          # static layer loop
        # Hoisted input projection for ALL timesteps: reads xbuf, writes gbuf
        # (two buffers -> no in-place read/modify/write of a single ref).
        gbuf[...] = (jnp.dot(xbuf[...], wih_ref[l], preferred_element_type=f32)
                     + bias_ref[l]).astype(gbuf.dtype)

        h_sc[...] = jnp.zeros((TB, H), f32)
        c_sc[...] = jnp.zeros((TB, H), f32)

        def step(row):
            # `row` is a multiple of TB (>= 16): tile-aligned slab loads/stores.
            xw = gbuf[pl.ds(row, TB), :].astype(f32)                 # [TB, 4H]
            gates = xw + jnp.dot(h_sc[...].astype(jnp.bfloat16), whh_ref[l],
                                 preferred_element_type=f32)
            act = jnp.tanh(gates) * act_scale + act_off              # one EUP op, all 4 gates
            i_g = act[:, 0 * H:1 * H]
            f_g = act[:, 1 * H:2 * H]
            g_g = act[:, 2 * H:3 * H]
            o_g = act[:, 3 * H:4 * H]
            c_new = f_g * c_sc[...] + i_g * g_g
            h_new = o_g * jnp.tanh(c_new)
            c_sc[...] = c_new
            h_sc[...] = h_new
            # Layer output over the consumed rows; lanes >= H keep stale-but-finite values
            # that the next layer's / classifier's zero weight rows annihilate.
            xbuf[pl.ds(row, TB), pl.ds(0, H)] = h_new.astype(xbuf.dtype)

        if T <= 32:
            for t in range(T):                  # tiny static T: full unroll
                step(t * TB)
        else:
            def body(t, carry):                 # production T: bounded live ranges
                step(pl.multiple_of(t * TB, TB))
                return carry
            jax.lax.fori_loop(0, T, body, 0, unroll=4)

    # ---- Classifier: Linear(H,H) -> ReLU -> Linear(H, O_pad); dropout = identity (eval).
    h1 = jnp.maximum(
        jnp.dot(xbuf[...], w1_ref[...], preferred_element_type=f32) + b1_ref[...], 0.0)
    out_ref[0] = (jnp.dot(h1.astype(jnp.bfloat16), w2_ref[...],
                          preferred_element_type=f32) + b2_ref[...]).astype(out_ref.dtype)


# -----------------------------------------------------------------------------
# Full forward. Embedding gathers / sums and weight prep are XLA glue; all dense
# compute lives in the single fused, batch-tiled kernel above.
# -----------------------------------------------------------------------------
def m5net_forward(params, x1, x2, *, batch_tile=None):
    B, T, _ = x1.shape
    E = params["item_emb"].shape[1]
    H = params["w1"].shape[0]
    O = params["w2"].shape[0]
    H4 = 4 * H
    L = len(params["lstm"])

    DI = _round_up(max(E, H), 128)        # lane width of the layer-input buffer
    F = 3 * E + 6
    F_pad = _round_up(F, 128)
    H1P = _round_up(H, 128)               # classifier hidden lanes
    O_pad = _round_up(O, 128)             # lane-dense output, sliced to O outside

    # Batch tile: multiple of 16 (bf16 sublane tiles); cap 64 keeps the per-tile VMEM
    # footprint (gbuf + xbuf + double-buffered feat/out + weights) under ~48 MiB at the
    # production shapes (E=128, H=256, L=4, T=100) for v7x's 64 MiB VMEM.
    if batch_tile is None:
        TB = min(_round_up(B, 16), 64)
    else:
        TB = _round_up(batch_tile, 16)
    B_pad = _round_up(B, TB)
    G = B_pad // TB
    NT = T * TB                            # rows per tile (time-major: row = t*TB + b)

    f32, bf16 = jnp.float32, jnp.bfloat16

    # ---- Embedding gathers + the i/s/e sums (XLA; no cheap Pallas gather) ----------
    i = (params["item_emb"][x1[:, :, 0]] + params["dept_emb"][x1[:, :, 1]]
         + params["cat_emb"][x1[:, :, 2]])
    s = params["store_emb"][x1[:, :, 3]] + params["state_emb"][x1[:, :, 4]]
    e = (params["event_name_emb"][x1[:, :, 5]] + params["event_name_emb"][x1[:, :, 6]]
         + params["event_type_emb"][x1[:, :, 7]] + params["event_type_emb"][x1[:, :, 8]])
    feat = jnp.concatenate([i, s, e, x2.astype(f32)], axis=-1)       # [B, T, F]
    feat = jnp.pad(feat, ((0, B_pad - B), (0, 0), (0, F_pad - F)))
    # -> per-tile time-major slabs [G, T*TB, F_pad], bf16 (halves HBM->VMEM DMA)
    feat = (feat.reshape(G, TB, T, F_pad).transpose(0, 2, 1, 3)
                .reshape(G, NT, F_pad).astype(bf16))

    # ---- Encoder: fold the calendar/prices Linear into encode (exact 2-linear fold) --
    we_t = params["we"].T                                            # [4E, E]
    w_cal = params["wc"].T @ we_t[3 * E:]                            # [6, E]
    w_in = jnp.concatenate([we_t[:3 * E], w_cal], axis=0)            # [F, E]
    w_in = jnp.pad(w_in, ((0, F_pad - F), (0, DI - E))).astype(bf16)   # [F_pad, DI]
    b_in = params["be"] + params["bc"] @ we_t[3 * E:]                # [E]
    b_in = jnp.pad(b_in, (0, DI - E)).reshape(1, DI).astype(f32)     # [1, DI]

    # ---- LSTM weights: transpose, zero-pad contraction rows, fold the 0.5 pre-scale
    #      of the i/f/o gate columns (single-tanh gate activation in-kernel).
    col = jnp.arange(H4)
    gate_pre = jnp.where((col >= 2 * H) & (col < 3 * H), 1.0, 0.5).astype(f32)
    wih_l, whh_l, bias_l = [], [], []
    for lp in params["lstm"]:
        wih_t = lp["wih"].T * gate_pre                               # [in_dim, 4H]
        wih_l.append(jnp.pad(wih_t, ((0, DI - wih_t.shape[0]), (0, 0))))
        whh_l.append(lp["whh"].T * gate_pre)                         # [H, 4H]
        bias_l.append(((lp["bih"] + lp["bhh"]) * gate_pre).reshape(1, H4))
    wih = jnp.stack(wih_l).astype(bf16)                              # [L, DI, 4H]
    whh = jnp.stack(whh_l).astype(bf16)                              # [L, H, 4H]
    bias = jnp.stack(bias_l).astype(f32)                             # [L, 1, 4H]

    # ---- Classifier weights (zero rows >= H annihilate stale lanes; zero cols pad lanes)
    w1 = jnp.pad(params["w1"].T, ((0, DI - H), (0, H1P - H))).astype(bf16)    # [DI, H1P]
    b1 = jnp.pad(params["b1"], (0, H1P - H)).reshape(1, H1P).astype(f32)
    w2 = jnp.pad(params["w2"].T, ((0, H1P - H), (0, O_pad - O))).astype(bf16)  # [H1P, O_pad]
    b2 = jnp.pad(params["b2"], (0, O_pad - O)).reshape(1, O_pad).astype(f32)

    def full(a):  # whole-array block, constant index map (DMA'd once, kept resident)
        return pl.BlockSpec(a.shape, lambda g, _n=a.ndim: (0,) * _n)

    flops = 2 * B_pad * T * (F_pad * DI + L * (DI * H4 + H * H4) + DI * H1P + H1P * O_pad)
    transc = B_pad * T * L * (H4 + H)
    bytes_acc = (feat.size * 2 + G * NT * O_pad * 4
                 + (w_in.size + wih.size + whh.size + w1.size + w2.size) * 2)

    kernel = functools.partial(_m5_fused_kernel, seq_len=T, tb=TB, hidden=H)
    out = pl.pallas_call(
        kernel,
        out_shape=jax.ShapeDtypeStruct((G, NT, O_pad), f32),
        grid=(G,),
        in_specs=[
            pl.BlockSpec((1, NT, F_pad), lambda g: (g, 0, 0)),
            full(w_in), full(b_in), full(wih), full(whh), full(bias),
            full(w1), full(b1), full(w2), full(b2),
        ],
        out_specs=pl.BlockSpec((1, NT, O_pad), lambda g: (g, 0, 0)),
        scratch_shapes=[
            pltpu.VMEM((NT, DI), bf16),    # layer-input sequence (encoder out / layer h's)
            pltpu.VMEM((NT, H4), bf16),    # hoisted X@Wih + b for the current layer
            pltpu.VMEM((TB, H), f32),      # h state
            pltpu.VMEM((TB, H), f32),      # c state
        ],
        compiler_params=pltpu.CompilerParams(
            dimension_semantics=("parallel",),
            vmem_limit_bytes=64 * 1024 * 1024),
        cost_estimate=pl.CostEstimate(flops=int(flops), transcendentals=int(transc),
                                      bytes_accessed=int(bytes_acc)),
    )(feat, w_in, b_in, wih, whh, bias, w1, b1, w2, b2)

    # [G, T*TB, O_pad] -> batch-first [B, T, O]
    out = (out.reshape(G, T, TB, O_pad).transpose(0, 2, 1, 3)
              .reshape(B_pad, T, O_pad)[:B, :, :O])
    return out


# -----------------------------------------------------------------------------
# Pure-JAX f32 reference (same math, no Pallas) for the correctness check
# -----------------------------------------------------------------------------
def m5net_reference(params, x1, x2):
    H = params["w1"].shape[0]
    item = params["item_emb"][x1[:, :, 0]]
    dept = params["dept_emb"][x1[:, :, 1]]
    cat = params["cat_emb"][x1[:, :, 2]]
    store = params["store_emb"][x1[:, :, 3]]
    state = params["state_emb"][x1[:, :, 4]]
    en1 = params["event_name_emb"][x1[:, :, 5]]
    en2 = params["event_name_emb"][x1[:, :, 6]]
    et1 = params["event_type_emb"][x1[:, :, 7]]
    et2 = params["event_type_emb"][x1[:, :, 8]]
    i = item + dept + cat
    s = store + state
    e = en1 + en2 + et1 + et2
    c = x2 @ params["wc"].T + params["bc"]
    x = jnp.concatenate([i, s, e, c], axis=-1) @ params["we"].T + params["be"]

    seq = x.transpose(1, 0, 2)                        # [T, B, E]
    B = seq.shape[1]
    for lp in params["lstm"]:
        wih_t, whh_t = lp["wih"].T, lp["whh"].T
        b = lp["bih"] + lp["bhh"]

        def step(carry, x_t):
            h, cc = carry
            gates = x_t @ wih_t + h @ whh_t + b
            ig = jax.nn.sigmoid(gates[:, 0 * H:1 * H])
            fg = jax.nn.sigmoid(gates[:, 1 * H:2 * H])
            gg = jnp.tanh(gates[:, 2 * H:3 * H])
            og = jax.nn.sigmoid(gates[:, 3 * H:4 * H])
            cc = fg * cc + ig * gg
            h = og * jnp.tanh(cc)
            return (h, cc), h

        init = (jnp.zeros((B, H), jnp.float32), jnp.zeros((B, H), jnp.float32))
        _, seq = jax.lax.scan(step, init, seq)
    y = seq.transpose(1, 0, 2)
    h1 = jnp.maximum(y @ params["w1"].T + params["b1"], 0.0)
    return h1 @ params["w2"].T + params["b2"]


# -----------------------------------------------------------------------------
# Deterministic parameter init (synthetic; shapes follow the nn.Module __init__)
# -----------------------------------------------------------------------------
def init_params(key, E, H, n_layer, output_dim):
    keys = iter(jax.random.split(key, 64))

    def w(shape, scale=0.1):
        return jax.random.normal(next(keys), shape, jnp.float32) * scale

    params = {
        "item_emb": w((3049, E)),
        "dept_emb": w((7, E)),
        "cat_emb": w((3, E)),
        "store_emb": w((10, E)),
        "state_emb": w((3, E)),
        "event_name_emb": w((31, E)),
        "event_type_emb": w((5, E)),
        "wc": w((E, 6)), "bc": w((E,)),
        "we": w((E, 4 * E)), "be": w((E,)),
        "w1": w((H, H)), "b1": w((H,)),
        "w2": w((output_dim, H)), "b2": w((output_dim,)),
        "lstm": [],
    }
    for layer in range(n_layer):
        in_dim = E if layer == 0 else H
        params["lstm"].append({
            "wih": w((4 * H, in_dim)),
            "whh": w((4 * H, H)),
            "bih": w((4 * H,)),
            "bhh": w((4 * H,)),
        })
    return params


if __name__ == "__main__":
    # Small shapes consistent with the module's forward:
    B, T = 2, 8                 # batch, sequence length
    E, H = 32, 32               # embedding_dim, hidden_dim
    N_LAYER, OUT = 2, 1         # LSTM layers, output_dim

    root = jax.random.PRNGKey(0)
    k_params, k_x1, k_x2 = jax.random.split(root, 3)

    params = init_params(k_params, E, H, N_LAYER, OUT)

    # x1: embedding ids with per-column vocab sizes; x2: 6 calendar/price features
    vocab = jnp.array([3049, 7, 3, 10, 3, 31, 31, 5, 5], dtype=jnp.int32)
    x1 = (jax.random.randint(k_x1, (B, T, 9), 0, 10_000, dtype=jnp.int32) % vocab)
    x2 = jax.random.normal(k_x2, (B, T, 6), jnp.float32)

    fwd = jax.jit(m5net_forward)
    out = jax.block_until_ready(fwd(params, x1, x2))
    assert out.shape == (B, T, OUT), out.shape

    ref = jax.block_until_ready(m5net_reference(params, x1, x2))
    # bf16 MXU path vs f32 reference -> relaxed tolerance.
    np.testing.assert_allclose(np.asarray(out), np.asarray(ref), rtol=5e-2, atol=2e-2)

    print("KERNEL_OK")
</pallas_src>

<mosaic_0001>
module attributes {stable_mosaic.version = 11 : i64} {
  func.func @_m5_fused_kernel(%arg0: i32, %arg1: memref<1x128x128xbf16, #tpu.memory_space<vmem>>, %arg2: memref<128x128xbf16, #tpu.memory_space<vmem>>, %arg3: memref<1x128xf32, #tpu.memory_space<vmem>>, %arg4: memref<2x128x128xbf16, #tpu.memory_space<vmem>>, %arg5: memref<2x32x128xbf16, #tpu.memory_space<vmem>>, %arg6: memref<2x1x128xf32, #tpu.memory_space<vmem>>, %arg7: memref<128x128xbf16, #tpu.memory_space<vmem>>, %arg8: memref<1x128xf32, #tpu.memory_space<vmem>>, %arg9: memref<128x128xbf16, #tpu.memory_space<vmem>>, %arg10: memref<1x128xf32, #tpu.memory_space<vmem>>, %arg11: memref<1x128x128xf32, #tpu.memory_space<vmem>>, %arg12: memref<128x128xbf16, #tpu.memory_space<vmem>>, %arg13: memref<128x128xbf16, #tpu.memory_space<vmem>>, %arg14: memref<16x32xf32, #tpu.memory_space<vmem>>, %arg15: memref<16x32xf32, #tpu.memory_space<vmem>>) attributes {dimension_semantics = [#tpu.dimension_semantics<parallel>], iteration_bounds = array<i64: 1>, scalar_prefetch = 0 : i64, scratch_operands = 4 : i64, tpu.core_type = #tpu.core_type<tc>, window_params = [{transform_indices = @transform_0, window_bounds = array<i64: 1, 128, 128>}, {pipeline_mode = #tpu.pipeline_mode<synchronous>, transform_indices = @transform_1, window_bounds = array<i64: 128, 128>}, {pipeline_mode = #tpu.pipeline_mode<synchronous>, transform_indices = @transform_2, window_bounds = array<i64: 1, 128>}, {pipeline_mode = #tpu.pipeline_mode<synchronous>, transform_indices = @transform_3, window_bounds = array<i64: 2, 128, 128>}, {pipeline_mode = #tpu.pipeline_mode<synchronous>, transform_indices = @transform_4, window_bounds = array<i64: 2, 32, 128>}, {pipeline_mode = #tpu.pipeline_mode<synchronous>, transform_indices = @transform_5, window_bounds = array<i64: 2, 1, 128>}, {pipeline_mode = #tpu.pipeline_mode<synchronous>, transform_indices = @transform_6, window_bounds = array<i64: 128, 128>}, {pipeline_mode = #tpu.pipeline_mode<synchronous>, transform_indices = @transform_7, window_bounds = array<i64: 1, 128>}, {pipeline_mode = #tpu.pipeline_mode<synchronous>, transform_indices = @transform_8, window_bounds = array<i64: 128, 128>}, {pipeline_mode = #tpu.pipeline_mode<synchronous>, transform_indices = @transform_9, window_bounds = array<i64: 1, 128>}, {transform_indices = @transform_10, window_bounds = array<i64: 1, 128, 128>}]} {
    %c0 = arith.constant 0 : index
    %c0_0 = arith.constant 0 : index
    %c0_1 = arith.constant 0 : index
    %0 = vector.load %arg1[%c0, %c0_0, %c0_1] : memref<1x128x128xbf16, #tpu.memory_space<vmem>>, vector<1x128x128xbf16>
    %1 = vector.shape_cast %0 : vector<1x128x128xbf16> to vector<128x128xbf16>
    %c0_2 = arith.constant 0 : index
    %c0_3 = arith.constant 0 : index
    %2 = vector.load %arg2[%c0_2, %c0_3] : memref<128x128xbf16, #tpu.memory_space<vmem>>, vector<128x128xbf16>
    %cst = arith.constant dense<0.000000e+00> : vector<128x128xf32>
    %3 = tpu.matmul %1, %2, %cst {dimension_numbers = #tpu.dot_dimension_numbers<[1], [0], [0], [1], [0, 0, 1, 1], [], []>} : vector<128x128xbf16>, vector<128x128xbf16>, vector<128x128xf32> -> vector<128x128xf32>
    %c0_4 = arith.constant 0 : index
    %c0_5 = arith.constant 0 : index
    %4 = vector.load %arg3[%c0_4, %c0_5] : memref<1x128xf32, #tpu.memory_space<vmem>>, vector<1x128xf32>
    %5 = vector.broadcast %4 : vector<1x128xf32> to vector<128x128xf32>
    %6 = arith.addf %3, %5 : vector<128x128xf32>
    %7 = arith.truncf %6 : vector<128x128xf32> to vector<128x128xbf16>
    %c0_6 = arith.constant 0 : index
    %c0_7 = arith.constant 0 : index
    %8 = vector.load %arg12[%c0_6, %c0_7] : memref<128x128xbf16, #tpu.memory_space<vmem>>, vector<128x128xbf16>
    tpu.vector_store %arg12[%c0_6, %c0_7], %7 {strides = array<i32>} : memref<128x128xbf16, #tpu.memory_space<vmem>>, vector<128x128xbf16>,
    %9 = tpu.iota {dimensions = array<i32: 1>} : vector<16x128xi32>
    %c64_i32 = arith.constant 64 : i32
    %10 = vector.broadcast %c64_i32 : i32 to vector<16x128xi32>
    %11 = arith.cmpi sge, %9, %10 : vector<16x128xi32>
    %c96_i32 = arith.constant 96 : i32
    %12 = vector.broadcast %c96_i32 : i32 to vector<16x128xi32>
    %13 = arith.cmpi slt, %9, %12 : vector<16x128xi32>
    %14 = arith.andi %11, %13 : vector<16x128xi1>
    %cst_8 = arith.constant 1.000000e+00 : f32
    %cst_9 = arith.constant 5.000000e-01 : f32
    %15 = vector.broadcast %cst_8 : f32 to vector<16x128xf32>
    %16 = vector.broadcast %cst_9 : f32 to vector<16x128xf32>
    %17 = arith.select %14, %15, %16 : vector<16x128xi1>, vector<16x128xf32>
    %cst_10 = arith.constant 0.000000e+00 : f32
    %cst_11 = arith.constant 5.000000e-01 : f32
    %18 = vector.broadcast %cst_10 : f32 to vector<16x128xf32>
    %19 = vector.broadcast %cst_11 : f32 to vector<16x128xf32>
    %20 = arith.select %14, %18, %19 : vector<16x128xi1>, vector<16x128xf32>
    %c0_12 = arith.constant 0 : index
    %c0_13 = arith.constant 0 : index
    %21 = vector.load %arg12[%c0_12, %c0_13] : memref<128x128xbf16, #tpu.memory_space<vmem>>, vector<128x128xbf16>
    %c0_14 = arith.constant 0 : index
    %c0_15 = arith.constant 0 : index
    %c0_16 = arith.constant 0 : index
    %22 = vector.load %arg4[%c0_14, %c0_15, %c0_16] : memref<2x128x128xbf16, #tpu.memory_space<vmem>>, vector<1x128x128xbf16>
    %23 = vector.shape_cast %22 : vector<1x128x128xbf16> to vector<128x128xbf16>
    %cst_17 = arith.constant dense<0.000000e+00> : vector<128x128xf32>
    %24 = tpu.matmul %21, %23, %cst_17 {dimension_numbers = #tpu.dot_dimension_numbers<[1], [0], [0], [1], [0, 0, 1, 1], [], []>} : vector<128x128xbf16>, vector<128x128xbf16>, vector<128x128xf32> -> vector<128x128xf32>
    %c0_18 = arith.constant 0 : index
    %c0_19 = arith.constant 0 : index
    %c0_20 = arith.constant 0 : index
    %25 = vector.load %arg6[%c0_18, %c0_19, %c0_20] : memref<2x1x128xf32, #tpu.memory_space<vmem>>, vector<1x1x128xf32>
    %26 = vector.shape_cast %25 : vector<1x1x128xf32> to vector<1x128xf32>
    %27 = vector.broadcast %26 : vector<1x128xf32> to vector<128x128xf32>
    %28 = arith.addf %24, %27 : vector<128x128xf32>
    %29 = arith.truncf %28 : vector<128x128xf32> to vector<128x128xbf16>
    %c0_21 = arith.constant 0 : index
    %c0_22 = arith.constant 0 : index
    %30 = vector.load %arg13[%c0_21, %c0_22] : memref<128x128xbf16, #tpu.memory_space<vmem>>, vector<128x128xbf16>
    tpu.vector_store %arg13[%c0_21, %c0_22], %29 {strides = array<i32>} : memref<128x128xbf16, #tpu.memory_space<vmem>>, vector<128x128xbf16>,
    %cst_23 = arith.constant 0.000000e+00 : f32
    %31 = vector.broadcast %cst_23 : f32 to vector<16x32xf32>
    %c0_24 = arith.constant 0 : index
    %c0_25 = arith.constant 0 : index
    %32 = vector.load %arg14[%c0_24, %c0_25] : memref<16x32xf32, #tpu.memory_space<vmem>>, vector<16x32xf32>
    tpu.vector_store %arg14[%c0_24, %c0_25], %31 {strides = array<i32>} : memref<16x32xf32, #tpu.memory_space<vmem>>, vector<16x32xf32>,
    %cst_26 = arith.constant 0.000000e+00 : f32
    %33 = vector.broadcast %cst_26 : f32 to vector<16x32xf32>
    %c0_27 = arith.constant 0 : index
    %c0_28 = arith.constant 0 : index
    %34 = vector.load %arg15[%c0_27, %c0_28] : memref<16x32xf32, #tpu.memory_space<vmem>>, vector<16x32xf32>
    tpu.vector_store %arg15[%c0_27, %c0_28], %33 {strides = array<i32>} : memref<16x32xf32, #tpu.memory_space<vmem>>, vector<16x32xf32>,
    %c0_29 = arith.constant 0 : index
    %c0_30 = arith.constant 0 : index
    %35 = vector.load %arg13[%c0_29, %c0_30] : memref<128x128xbf16, #tpu.memory_space<vmem>>, vector<16x128xbf16>
    %36 = arith.extf %35 : vector<16x128xbf16> to vector<16x128xf32>
    %c0_31 = arith.constant 0 : index
    %c0_32 = arith.constant 0 : index
    %37 = vector.load %arg14[%c0_31, %c0_32] : memref<16x32xf32, #tpu.memory_space<vmem>>, vector<16x32xf32>
    %38 = arith.truncf %37 : vector<16x32xf32> to vector<16x32xbf16>
    %c0_33 = arith.constant 0 : index
    %c0_34 = arith.constant 0 : index
    %c0_35 = arith.constant 0 : index
    %39 = vector.load %arg5[%c0_33, %c0_34, %c0_35] : memref<2x32x128xbf16, #tpu.memory_space<vmem>>, vector<1x32x128xbf16>
    %40 = vector.shape_cast %39 : vector<1x32x128xbf16> to vector<32x128xbf16>
    %cst_36 = arith.constant dense<0.000000e+00> : vector<16x128xf32>
    %41 = tpu.matmul %38, %40, %cst_36 {dimension_numbers = #tpu.dot_dimension_numbers<[1], [0], [0], [1], [0, 0, 1, 1], [], []>} : vector<16x32xbf16>, vector<32x128xbf16>, vector<16x128xf32> -> vector<16x128xf32>
    %42 = arith.addf %36, %41 : vector<16x128xf32>
    %43 = math.tanh %42 : vector<16x128xf32>
    %44 = arith.mulf %43, %17 : vector<16x128xf32>
    %45 = arith.addf %44, %20 : vector<16x128xf32>
    %46 = vector.extract_strided_slice %45 {offsets = [0, 0], sizes = [16, 32], strides = [1, 1]} : vector<16x128xf32> to vector<16x32xf32>
    %47 = vector.extract_strided_slice %45 {offsets = [0, 32], sizes = [16, 32], strides = [1, 1]} : vector<16x128xf32> to vector<16x32xf32>
    %48 = vector.extract_strided_slice %45 {offsets = [0, 64], sizes = [16, 32], strides = [1, 1]} : vector<16x128xf32> to vector<16x32xf32>
    %49 = vector.extract_strided_slice %45 {offsets = [0, 96], sizes = [16, 32], strides = [1, 1]} : vector<16x128xf32> to vector<16x32xf32>
    %c0_37 = arith.constant 0 : index
    %c0_38 = arith.constant 0 : index
    %50 = vector.load %arg15[%c0_37, %c0_38] : memref<16x32xf32, #tpu.memory_space<vmem>>, vector<16x32xf32>
    %51 = arith.mulf %47, %50 : vector<16x32xf32>
    %52 = arith.mulf %46, %48 : vector<16x32xf32>
    %53 = arith.addf %51, %52 : vector<16x32xf32>
    %54 = math.tanh %53 : vector<16x32xf32>
    %55 = arith.mulf %49, %54 : vector<16x32xf32>
    %c0_39 = arith.constant 0 : index
    %c0_40 = arith.constant 0 : index
    %56 = vector.load %arg15[%c0_39, %c0_40] : memref<16x32xf32, #tpu.memory_space<vmem>>, vector<16x32xf32>
    tpu.vector_store %arg15[%c0_39, %c0_40], %53 {strides = array<i32>} : memref<16x32xf32, #tpu.memory_space<vmem>>, vector<16x32xf32>,
    %c0_41 = arith.constant 0 : index
    %c0_42 = arith.constant 0 : index
    %57 = vector.load %arg14[%c0_41, %c0_42] : memref<16x32xf32, #tpu.memory_space<vmem>>, vector<16x32xf32>
    tpu.vector_store %arg14[%c0_41, %c0_42], %55 {strides = array<i32>} : memref<16x32xf32, #tpu.memory_space<vmem>>, vector<16x32xf32>,
    %58 = arith.truncf %55 : vector<16x32xf32> to vector<16x32xbf16>
    %c0_43 = arith.constant 0 : index
    %c0_44 = arith.constant 0 : index
    %59 = vector.load %arg12[%c0_43, %c0_44] : memref<128x128xbf16, #tpu.memory_space<vmem>>, vector<16x32xbf16>
    tpu.vector_store %arg12[%c0_43, %c0_44], %58 {strides = array<i32>} : memref<128x128xbf16, #tpu.memory_space<vmem>>, vector<16x32xbf16>,
    %c16 = arith.constant 16 : index
    %c0_45 = arith.constant 0 : index
    %60 = vector.load %arg13[%c16, %c0_45] : memref<128x128xbf16, #tpu.memory_space<vmem>>, vector<16x128xbf16>
    %61 = arith.extf %60 : vector<16x128xbf16> to vector<16x128xf32>
    %c0_46 = arith.constant 0 : index
    %c0_47 = arith.constant 0 : index
    %62 = vector.load %arg14[%c0_46, %c0_47] : memref<16x32xf32, #tpu.memory_space<vmem>>, vector<16x32xf32>
    %63 = arith.truncf %62 : vector<16x32xf32> to vector<16x32xbf16>
    %c0_48 = arith.constant 0 : index
    %c0_49 = arith.constant 0 : index
    %c0_50 = arith.constant 0 : index
    %64 = vector.load %arg5[%c0_48, %c0_49, %c0_50] : memref<2x32x128xbf16, #tpu.memory_space<vmem>>, vector<1x32x128xbf16>
    %65 = vector.shape_cast %64 : vector<1x32x128xbf16> to vector<32x128xbf16>
    %cst_51 = arith.constant dense<0.000000e+00> : vector<16x128xf32>
    %66 = tpu.matmul %63, %65, %cst_51 {dimension_numbers = #tpu.dot_dimension_numbers<[1], [0], [0], [1], [0, 0, 1, 1], [], []>} : vector<16x32xbf16>, vector<32x128xbf16>, vector<16x128xf32> -> vector<16x128xf32>
    %67 = arith.addf %61, %66 : vector<16x128xf32>
    %68 = math.tanh %67 : vector<16x128xf32>
    %69 = arith.mulf %68, %17 : vector<16x128xf32>
    %70 = arith.addf %69, %20 : vector<16x128xf32>
    %71 = vector.extract_strided_slice %70 {offsets = [0, 0], sizes = [16, 32], strides = [1, 1]} : vector<16x128xf32> to vector<16x32xf32>
    %72 = vector.extract_strided_slice %70 {offsets = [0, 32], sizes = [16, 32], strides = [1, 1]} : vector<16x128xf32> to vector<16x32xf32>
    %73 = vector.extract_strided_slice %70 {offsets = [0, 64], sizes = [16, 32], strides = [1, 1]} : vector<16x128xf32> to vector<16x32xf32>
    %74 = vector.extract_strided_slice %70 {offsets = [0, 96], sizes = [16, 32], strides = [1, 1]} : vector<16x128xf32> to vector<16x32xf32>
    %c0_52 = arith.constant 0 : index
    %c0_53 = arith.constant 0 : index
    %75 = vector.load %arg15[%c0_52, %c0_53] : memref<16x32xf32, #tpu.memory_space<vmem>>, vector<16x32xf32>
    %76 = arith.mulf %72, %75 : vector<16x32xf32>
    %77 = arith.mulf %71, %73 : vector<16x32xf32>
    %78 = arith.addf %76, %77 : vector<16x32xf32>
    %79 = math.tanh %78 : vector<16x32xf32>
    %80 = arith.mulf %74, %79 : vector<16x32xf32>
    %c0_54 = arith.constant 0 : index
    %c0_55 = arith.constant 0 : index
    %81 = vector.load %arg15[%c0_54, %c0_55] : memref<16x32xf32, #tpu.memory_space<vmem>>, vector<16x32xf32>
    tpu.vector_store %arg15[%c0_54, %c0_55], %78 {strides = array<i32>} : memref<16x32xf32, #tpu.memory_space<vmem>>, vector<16x32xf32>,
    %c0_56 = arith.constant 0 : index
    %c0_57 = arith.constant 0 : index
    %82 = vector.load %arg14[%c0_56, %c0_57] : memref<16x32xf32, #tpu.memory_space<vmem>>, vector<16x32xf32>
    tpu.vector_store %arg14[%c0_56, %c0_57], %80 {strides = array<i32>} : memref<16x32xf32, #tpu.memory_space<vmem>>, vector<16x32xf32>,
    %83 = arith.truncf %80 : vector<16x32xf32> to vector<16x32xbf16>
    %c16_58 = arith.constant 16 : index
    %c0_59 = arith.constant 0 : index
    %84 = vector.load %arg12[%c16_58, %c0_59] : memref<128x128xbf16, #tpu.memory_space<vmem>>, vector<16x32xbf16>
    tpu.vector_store %arg12[%c16_58, %c0_59], %83 {strides = array<i32>} : memref<128x128xbf16, #tpu.memory_space<vmem>>, vector<16x32xbf16>,
    %c32 = arith.constant 32 : index
    %c0_60 = arith.constant 0 : index
    %85 = vector.load %arg13[%c32, %c0_60] : memref<128x128xbf16, #tpu.memory_space<vmem>>, vector<16x128xbf16>
    %86 = arith.extf %85 : vector<16x128xbf16> to vector<16x128xf32>
    %c0_61 = arith.constant 0 : index
    %c0_62 = arith.constant 0 : index
    %87 = vector.load %arg14[%c0_61, %c0_62] : memref<16x32xf32, #tpu.memory_space<vmem>>, vector<16x32xf32>
    %88 = arith.truncf %87 : vector<16x32xf32> to vector<16x32xbf16>
    %c0_63 = arith.constant 0 : index
    %c0_64 = arith.constant 0 : index
    %c0_65 = arith.constant 0 : index
    %89 = vector.load %arg5[%c0_63, %c0_64, %c0_65] : memref<2x32x128xbf16, #tpu.memory_space<vmem>>, vector<1x32x128xbf16>
    %90 = vector.shape_cast %89 : vector<1x32x128xbf16> to vector<32x128xbf16>
    %cst_66 = arith.constant dense<0.000000e+00> : vector<16x128xf32>
    %91 = tpu.matmul %88, %90, %cst_66 {dimension_numbers = #tpu.dot_dimension_numbers<[1], [0], [0], [1], [0, 0, 1, 1], [], []>} : vector<16x32xbf16>, vector<32x128xbf16>, vector<16x128xf32> -> vector<16x128xf32>
    %92 = arith.addf %86, %91 : vector<16x128xf32>
    %93 = math.tanh %92 : vector<16x128xf32>
    %94 = arith.mulf %93, %17 : vector<16x128xf32>
    %95 = arith.addf %94, %20 : vector<16x128xf32>
    %96 = vector.extract_strided_slice %95 {offsets = [0, 0], sizes = [16, 32], strides = [1, 1]} : vector<16x128xf32> to vector<16x32xf32>
    %97 = vector.extract_strided_slice %95 {offsets = [0, 32], sizes = [16, 32], strides = [1, 1]} : vector<16x128xf32> to vector<16x32xf32>
    %98 = vector.extract_strided_slice %95 {offsets = [0, 64], sizes = [16, 32], strides = [1, 1]} : vector<16x128xf32> to vector<16x32xf32>
    %99 = vector.extract_strided_slice %95 {offsets = [0, 96], sizes = [16, 32], strides = [1, 1]} : vector<16x128xf32> to vector<16x32xf32>
    %c0_67 = arith.constant 0 : index
    %c0_68 = arith.constant 0 : index
    %100 = vector.load %arg15[%c0_67, %c0_68] : memref<16x32xf32, #tpu.memory_space<vmem>>, vector<16x32xf32>
    %101 = arith.mulf %97, %100 : vector<16x32xf32>
    %102 = arith.mulf %96, %98 : vector<16x32xf32>
    %103 = arith.addf %101, %102 : vector<16x32xf32>
    %104 = math.tanh %103 : vector<16x32xf32>
    %105 = arith.mulf %99, %104 : vector<16x32xf32>
    %c0_69 = arith.constant 0 : index
    %c0_70 = arith.constant 0 : index
    %106 = vector.load %arg15[%c0_69, %c0_70] : memref<16x32xf32, #tpu.memory_space<vmem>>, vector<16x32xf32>
    tpu.vector_store %arg15[%c0_69, %c0_70], %103 {strides = array<i32>} : memref<16x32xf32, #tpu.memory_space<vmem>>, vector<16x32xf32>,
    %c0_71 = arith.constant 0 : index
    %c0_72 = arith.constant 0 : index
    %107 = vector.load %arg14[%c0_71, %c0_72] : memref<16x32xf32, #tpu.memory_space<vmem>>, vector<16x32xf32>
    tpu.vector_store %arg14[%c0_71, %c0_72], %105 {strides = array<i32>} : memref<16x32xf32, #tpu.memory_space<vmem>>, vector<16x32xf32>,
    %108 = arith.truncf %105 : vector<16x32xf32> to vector<16x32xbf16>
    %c32_73 = arith.constant 32 : index
    %c0_74 = arith.constant 0 : index
    %109 = vector.load %arg12[%c32_73, %c0_74] : memref<128x128xbf16, #tpu.memory_space<vmem>>, vector<16x32xbf16>
    tpu.vector_store %arg12[%c32_73, %c0_74], %108 {strides = array<i32>} : memref<128x128xbf16, #tpu.memory_space<vmem>>, vector<16x32xbf16>,
    %c48 = arith.constant 48 : index
    %c0_75 = arith.constant 0 : index
    %110 = vector.load %arg13[%c48, %c0_75] : memref<128x128xbf16, #tpu.memory_space<vmem>>, vector<16x128xbf16>
    %111 = arith.extf %110 : vector<16x128xbf16> to vector<16x128xf32>
    %c0_76 = arith.constant 0 : index
    %c0_77 = arith.constant 0 : index
    %112 = vector.load %arg14[%c0_76, %c0_77] : memref<16x32xf32, #tpu.memory_space<vmem>>, vector<16x32xf32>
    %113 = arith.truncf %112 : vector<16x32xf32> to vector<16x32xbf16>
    %c0_78 = arith.constant 0 : index
    %c0_79 = arith.constant 0 : index
    %c0_80 = arith.constant 0 : index
    %114 = vector.load %arg5[%c0_78, %c0_79, %c0_80] : memref<2x32x128xbf16, #tpu.memory_space<vmem>>, vector<1x32x128xbf16>
    %115 = vector.shape_cast %114 : vector<1x32x128xbf16> to vector<32x128xbf16>
    %cst_81 = arith.constant dense<0.000000e+00> : vector<16x128xf32>
    %116 = tpu.matmul %113, %115, %cst_81 {dimension_numbers = #tpu.dot_dimension_numbers<[1], [0], [0], [1], [0, 0, 1, 1], [], []>} : vector<16x32xbf16>, vector<32x128xbf16>, vector<16x128xf32> -> vector<16x128xf32>
    %117 = arith.addf %111, %116 : vector<16x128xf32>
    %118 = math.tanh %117 : vector<16x128xf32>
    %119 = arith.mulf %118, %17 : vector<16x128xf32>
    %120 = arith.addf %119, %20 : vector<16x128xf32>
    %121 = vector.extract_strided_slice %120 {offsets = [0, 0], sizes = [16, 32], strides = [1, 1]} : vector<16x128xf32> to vector<16x32xf32>
    %122 = vector.extract_strided_slice %120 {offsets = [0, 32], sizes = [16, 32], strides = [1, 1]} : vector<16x128xf32> to vector<16x32xf32>
    %123 = vector.extract_strided_slice %120 {offsets = [0, 64], sizes = [16, 32], strides = [1, 1]} : vector<16x128xf32> to vector<16x32xf32>
    %124 = vector.extract_strided_slice %120 {offsets = [0, 96], sizes = [16, 32], strides = [1, 1]} : vector<16x128xf32> to vector<16x32xf32>
    %c0_82 = arith.constant 0 : index
    %c0_83 = arith.constant 0 : index
    %125 = vector.load %arg15[%c0_82, %c0_83] : memref<16x32xf32, #tpu.memory_space<vmem>>, vector<16x32xf32>
    %126 = arith.mulf %122, %125 : vector<16x32xf32>
    %127 = arith.mulf %121, %123 : vector<16x32xf32>
    %128 = arith.addf %126, %127 : vector<16x32xf32>
    %129 = math.tanh %128 : vector<16x32xf32>
    %130 = arith.mulf %124, %129 : vector<16x32xf32>
    %c0_84 = arith.constant 0 : index
    %c0_85 = arith.constant 0 : index
    %131 = vector.load %arg15[%c0_84, %c0_85] : memref<16x32xf32, #tpu.memory_space<vmem>>, vector<16x32xf32>
    tpu.vector_store %arg15[%c0_84, %c0_85], %128 {strides = array<i32>} : memref<16x32xf32, #tpu.memory_space<vmem>>, vector<16x32xf32>,
    %c0_86 = arith.constant 0 : index
    %c0_87 = arith.constant 0 : index
    %132 = vector.load %arg14[%c0_86, %c0_87] : memref<16x32xf32, #tpu.memory_space<vmem>>, vector<16x32xf32>
    tpu.vector_store %arg14[%c0_86, %c0_87], %130 {strides = array<i32>} : memref<16x32xf32, #tpu.memory_space<vmem>>, vector<16x32xf32>,
    %133 = arith.truncf %130 : vector<16x32xf32> to vector<16x32xbf16>
    %c48_88 = arith.constant 48 : index
    %c0_89 = arith.constant 0 : index
    %134 = vector.load %arg12[%c48_88, %c0_89] : memref<128x128xbf16, #tpu.memory_space<vmem>>, vector<16x32xbf16>
    tpu.vector_store %arg12[%c48_88, %c0_89], %133 {strides = array<i32>} : memref<128x128xbf16, #tpu.memory_space<vmem>>, vector<16x32xbf16>,
    %c64 = arith.constant 64 : index
    %c0_90 = arith.constant 0 : index
    %135 = vector.load %arg13[%c64, %c0_90] : memref<128x128xbf16, #tpu.memory_space<vmem>>, vector<16x128xbf16>
    %136 = arith.extf %135 : vector<16x128xbf16> to vector<16x128xf32>
    %c0_91 = arith.constant 0 : index
    %c0_92 = arith.constant 0 : index
    %137 = vector.load %arg14[%c0_91, %c0_92] : memref<16x32xf32, #tpu.memory_space<vmem>>, vector<16x32xf32>
    %138 = arith.truncf %137 : vector<16x32xf32> to vector<16x32xbf16>
    %c0_93 = arith.constant 0 : index
    %c0_94 = arith.constant 0 : index
    %c0_95 = arith.constant 0 : index
    %139 = vector.load %arg5[%c0_93, %c0_94, %c0_95] : memref<2x32x128xbf16, #tpu.memory_space<vmem>>, vector<1x32x128xbf16>
    %140 = vector.shape_cast %139 : vector<1x32x128xbf16> to vector<32x128xbf16>
    %cst_96 = arith.constant dense<0.000000e+00> : vector<16x128xf32>
    %141 = tpu.matmul %138, %140, %cst_96 {dimension_numbers = #tpu.dot_dimension_numbers<[1], [0], [0], [1], [0, 0, 1, 1], [], []>} : vector<16x32xbf16>, vector<32x128xbf16>, vector<16x128xf32> -> vector<16x128xf32>
    %142 = arith.addf %136, %141 : vector<16x128xf32>
    %143 = math.tanh %142 : vector<16x128xf32>
    %144 = arith.mulf %143, %17 : vector<16x128xf32>
    %145 = arith.addf %144, %20 : vector<16x128xf32>
    %146 = vector.extract_strided_slice %145 {offsets = [0, 0], sizes = [16, 32], strides = [1, 1]} : vector<16x128xf32> to vector<16x32xf32>
    %147 = vector.extract_strided_slice %145 {offsets = [0, 32], sizes = [16, 32], strides = [1, 1]} : vector<16x128xf32> to vector<16x32xf32>
    %148 = vector.extract_strided_slice %145 {offsets = [0, 64], sizes = [16, 32], strides = [1, 1]} : vector<16x128xf32> to vector<16x32xf32>
    %149 = vector.extract_strided_slice %145 {offsets = [0, 96], sizes = [16, 32], strides = [1, 1]} : vector<16x128xf32> to vector<16x32xf32>
    %c0_97 = arith.constant 0 : index
    %c0_98 = arith.constant 0 : index
    %150 = vector.load %arg15[%c0_97, %c0_98] : memref<16x32xf32, #tpu.memory_space<vmem>>, vector<16x32xf32>
    %151 = arith.mulf %147, %150 : vector<16x32xf32>
    %152 = arith.mulf %146, %148 : vector<16x32xf32>
    %153 = arith.addf %151, %152 : vector<16x32xf32>
    %154 = math.tanh %153 : vector<16x32xf32>
    %155 = arith.mulf %149, %154 : vector<16x32xf32>
    %c0_99 = arith.constant 0 : index
    %c0_100 = arith.constant 0 : index
    %156 = vector.load %arg15[%c0_99, %c0_100] : memref<16x32xf32, #tpu.memory_space<vmem>>, vector<16x32xf32>
    tpu.vector_store %arg15[%c0_99, %c0_100], %153 {strides = array<i32>} : memref<16x32xf32, #tpu.memory_space<vmem>>, vector<16x32xf32>,
    %c0_101 = arith.constant 0 : index
    %c0_102 = arith.constant 0 : index
    %157 = vector.load %arg14[%c0_101, %c0_102] : memref<16x32xf32, #tpu.memory_space<vmem>>, vector<16x32xf32>
    tpu.vector_store %arg14[%c0_101, %c0_102], %155 {strides = array<i32>} : memref<16x32xf32, #tpu.memory_space<vmem>>, vector<16x32xf32>,
    %158 = arith.truncf %155 : vector<16x32xf32> to vector<16x32xbf16>
    %c64_103 = arith.constant 64 : index
    %c0_104 = arith.constant 0 : index
    %159 = vector.load %arg12[%c64_103, %c0_104] : memref<128x128xbf16, #tpu.memory_space<vmem>>, vector<16x32xbf16>
    tpu.vector_store %arg12[%c64_103, %c0_104], %158 {strides = array<i32>} : memref<128x128xbf16, #tpu.memory_space<vmem>>, vector<16x32xbf16>,
    %c80 = arith.constant 80 : index
    %c0_105 = arith.constant 0 : index
    %160 = vector.load %arg13[%c80, %c0_105] : memref<128x128xbf16, #tpu.memory_space<vmem>>, vector<16x128xbf16>
    %161 = arith.extf %160 : vector<16x128xbf16> to vector<16x128xf32>
    %c0_106 = arith.constant 0 : index
    %c0_107 = arith.constant 0 : index
    %162 = vector.load %arg14[%c0_106, %c0_107] : memref<16x32xf32, #tpu.memory_space<vmem>>, vector<16x32xf32>
    %163 = arith.truncf %162 : vector<16x32xf32> to vector<16x32xbf16>
    %c0_108 = arith.constant 0 : index
    %c0_109 = arith.constant 0 : index
    %c0_110 = arith.constant 0 : index
    %164 = vector.load %arg5[%c0_108, %c0_109, %c0_110] : memref<2x32x128xbf16, #tpu.memory_space<vmem>>, vector<1x32x128xbf16>
    %165 = vector.shape_cast %164 : vector<1x32x128xbf16> to vector<32x128xbf16>
    %cst_111 = arith.constant dense<0.000000e+00> : vector<16x128xf32>
    %166 = tpu.matmul %163, %165, %cst_111 {dimension_numbers = #tpu.dot_dimension_numbers<[1], [0], [0], [1], [0, 0, 1, 1], [], []>} : vector<16x32xbf16>, vector<32x128xbf16>, vector<16x128xf32> -> vector<16x128xf32>
    %167 = arith.addf %161, %166 : vector<16x128xf32>
    %168 = math.tanh %167 : vector<16x128xf32>
    %169 = arith.mulf %168, %17 : vector<16x128xf32>
    %170 = arith.addf %169, %20 : vector<16x128xf32>
    %171 = vector.extract_strided_slice %170 {offsets = [0, 0], sizes = [16, 32], strides = [1, 1]} : vector<16x128xf32> to vector<16x32xf32>
    %172 = vector.extract_strided_slice %170 {offsets = [0, 32], sizes = [16, 32], strides = [1, 1]} : vector<16x128xf32> to vector<16x32xf32>
    %173 = vector.extract_strided_slice %170 {offsets = [0, 64], sizes = [16, 32], strides = [1, 1]} : vector<16x128xf32> to vector<16x32xf32>
    %174 = vector.extract_strided_slice %170 {offsets = [0, 96], sizes = [16, 32], strides = [1, 1]} : vector<16x128xf32> to vector<16x32xf32>
    %c0_112 = arith.constant 0 : index
    %c0_113 = arith.constant 0 : index
    %175 = vector.load %arg15[%c0_112, %c0_113] : memref<16x32xf32, #tpu.memory_space<vmem>>, vector<16x32xf32>
    %176 = arith.mulf %172, %175 : vector<16x32xf32>
    %177 = arith.mulf %171, %173 : vector<16x32xf32>
    %178 = arith.addf %176, %177 : vector<16x32xf32>
    %179 = math.tanh %178 : vector<16x32xf32>
    %180 = arith.mulf %174, %179 : vector<16x32xf32>
    %c0_114 = arith.constant 0 : index
    %c0_115 = arith.constant 0 : index
    %181 = vector.load %arg15[%c0_114, %c0_115] : memref<16x32xf32, #tpu.memory_space<vmem>>, vector<16x32xf32>
    tpu.vector_store %arg15[%c0_114, %c0_115], %178 {strides = array<i32>} : memref<16x32xf32, #tpu.memory_space<vmem>>, vector<16x32xf32>,
    %c0_116 = arith.constant 0 : index
    %c0_117 = arith.constant 0 : index
    %182 = vector.load %arg14[%c0_116, %c0_117] : memref<16x32xf32, #tpu.memory_space<vmem>>, vector<16x32xf32>
    tpu.vector_store %arg14[%c0_116, %c0_117], %180 {strides = array<i32>} : memref<16x32xf32, #tpu.memory_space<vmem>>, vector<16x32xf32>,
    %183 = arith.truncf %180 : vector<16x32xf32> to vector<16x32xbf16>
    %c80_118 = arith.constant 80 : index
    %c0_119 = arith.constant 0 : index
    %184 = vector.load %arg12[%c80_118, %c0_119] : memref<128x128xbf16, #tpu.memory_space<vmem>>, vector<16x32xbf16>
    tpu.vector_store %arg12[%c80_118, %c0_119], %183 {strides = array<i32>} : memref<128x128xbf16, #tpu.memory_space<vmem>>, vector<16x32xbf16>,
    %c96 = arith.constant 96 : index
    %c0_120 = arith.constant 0 : index
    %185 = vector.load %arg13[%c96, %c0_120] : memref<128x128xbf16, #tpu.memory_space<vmem>>, vector<16x128xbf16>
    %186 = arith.extf %185 : vector<16x128xbf16> to vector<16x128xf32>
    %c0_121 = arith.constant 0 : index
    %c0_122 = arith.constant 0 : index
    %187 = vector.load %arg14[%c0_121, %c0_122] : memref<16x32xf32, #tpu.memory_space<vmem>>, vector<16x32xf32>
    %188 = arith.truncf %187 : vector<16x32xf32> to vector<16x32xbf16>
    %c0_123 = arith.constant 0 : index
    %c0_124 = arith.constant 0 : index
    %c0_125 = arith.constant 0 : index
    %189 = vector.load %arg5[%c0_123, %c0_124, %c0_125] : memref<2x32x128xbf16, #tpu.memory_space<vmem>>, vector<1x32x128xbf16>
    %190 = vector.shape_cast %189 : vector<1x32x128xbf16> to vector<32x128xbf16>
    %cst_126 = arith.constant dense<0.000000e+00> : vector<16x128xf32>
    %191 = tpu.matmul %188, %190, %cst_126 {dimension_numbers = #tpu.dot_dimension_numbers<[1], [0], [0], [1], [0, 0, 1, 1], [], []>} : vector<16x32xbf16>, vector<32x128xbf16>, vector<16x128xf32> -> vector<16x128xf32>
    %192 = arith.addf %186, %191 : vector<16x128xf32>
    %193 = math.tanh %192 : vector<16x128xf32>
    %194 = arith.mulf %193, %17 : vector<16x128xf32>
    %195 = arith.addf %194, %20 : vector<16x128xf32>
    %196 = vector.extract_strided_slice %195 {offsets = [0, 0], sizes = [16, 32], strides = [1, 1]} : vector<16x128xf32> to vector<16x32xf32>
    %197 = vector.extract_strided_slice %195 {offsets = [0, 32], sizes = [16, 32], strides = [1, 1]} : vector<16x128xf32> to vector<16x32xf32>
    %198 = vector.extract_strided_slice %195 {offsets = [0, 64], sizes = [16, 32], strides = [1, 1]} : vector<16x128xf32> to vector<16x32xf32>
    %199 = vector.extract_strided_slice %195 {offsets = [0, 96], sizes = [16, 32], strides = [1, 1]} : vector<16x128xf32> to vector<16x32xf32>
    %c0_127 = arith.constant 0 : index
    %c0_128 = arith.constant 0 : index
    %200 = vector.load %arg15[%c0_127, %c0_128] : memref<16x32xf32, #tpu.memory_space<vmem>>, vector<16x32xf32>
    %201 = arith.mulf %197, %200 : vector<16x32xf32>
    %202 = arith.mulf %196, %198 : vector<16x32xf32>
    %203 = arith.addf %201, %202 : vector<16x32xf32>
    %204 = math.tanh %203 : vector<16x32xf32>
    %205 = arith.mulf %199, %204 : vector<16x32xf32>
    %c0_129 = arith.constant 0 : index
    %c0_130 = arith.constant 0 : index
    %206 = vector.load %arg15[%c0_129, %c0_130] : memref<16x32xf32, #tpu.memory_space<vmem>>, vector<16x32xf32>
    tpu.vector_store %arg15[%c0_129, %c0_130], %203 {strides = array<i32>} : memref<16x32xf32, #tpu.memory_space<vmem>>, vector<16x32xf32>,
    %c0_131 = arith.constant 0 : index
    %c0_132 = arith.constant 0 : index
    %207 = vector.load %arg14[%c0_131, %c0_132] : memref<16x32xf32, #tpu.memory_space<vmem>>, vector<16x32xf32>
    tpu.vector_store %arg14[%c0_131, %c0_132], %205 {strides = array<i32>} : memref<16x32xf32, #tpu.memory_space<vmem>>, vector<16x32xf32>,
    %208 = arith.truncf %205 : vector<16x32xf32> to vector<16x32xbf16>
    %c96_133 = arith.constant 96 : index
    %c0_134 = arith.constant 0 : index
    %209 = vector.load %arg12[%c96_133, %c0_134] : memref<128x128xbf16, #tpu.memory_space<vmem>>, vector<16x32xbf16>
    tpu.vector_store %arg12[%c96_133, %c0_134], %208 {strides = array<i32>} : memref<128x128xbf16, #tpu.memory_space<vmem>>, vector<16x32xbf16>,
    %c112 = arith.constant 112 : index
    %c0_135 = arith.constant 0 : index
    %210 = vector.load %arg13[%c112, %c0_135] : memref<128x128xbf16, #tpu.memory_space<vmem>>, vector<16x128xbf16>
    %211 = arith.extf %210 : vector<16x128xbf16> to vector<16x128xf32>
    %c0_136 = arith.constant 0 : index
    %c0_137 = arith.constant 0 : index
    %212 = vector.load %arg14[%c0_136, %c0_137] : memref<16x32xf32, #tpu.memory_space<vmem>>, vector<16x32xf32>
    %213 = arith.truncf %212 : vector<16x32xf32> to vector<16x32xbf16>
    %c0_138 = arith.constant 0 : index
    %c0_139 = arith.constant 0 : index
    %c0_140 = arith.constant 0 : index
    %214 = vector.load %arg5[%c0_138, %c0_139, %c0_140] : memref<2x32x128xbf16, #tpu.memory_space<vmem>>, vector<1x32x128xbf16>
    %215 = vector.shape_cast %214 : vector<1x32x128xbf16> to vector<32x128xbf16>
    %cst_141 = arith.constant dense<0.000000e+00> : vector<16x128xf32>
    %216 = tpu.matmul %213, %215, %cst_141 {dimension_numbers = #tpu.dot_dimension_numbers<[1], [0], [0], [1], [0, 0, 1, 1], [], []>} : vector<16x32xbf16>, vector<32x128xbf16>, vector<16x128xf32> -> vector<16x128xf32>
    %217 = arith.addf %211, %216 : vector<16x128xf32>
    %218 = math.tanh %217 : vector<16x128xf32>
    %219 = arith.mulf %218, %17 : vector<16x128xf32>
    %220 = arith.addf %219, %20 : vector<16x128xf32>
    %221 = vector.extract_strided_slice %220 {offsets = [0, 0], sizes = [16, 32], strides = [1, 1]} : vector<16x128xf32> to vector<16x32xf32>
    %222 = vector.extract_strided_slice %220 {offsets = [0, 32], sizes = [16, 32], strides = [1, 1]} : vector<16x128xf32> to vector<16x32xf32>
    %223 = vector.extract_strided_slice %220 {offsets = [0, 64], sizes = [16, 32], strides = [1, 1]} : vector<16x128xf32> to vector<16x32xf32>
    %224 = vector.extract_strided_slice %220 {offsets = [0, 96], sizes = [16, 32], strides = [1, 1]} : vector<16x128xf32> to vector<16x32xf32>
    %c0_142 = arith.constant 0 : index
    %c0_143 = arith.constant 0 : index
    %225 = vector.load %arg15[%c0_142, %c0_143] : memref<16x32xf32, #tpu.memory_space<vmem>>, vector<16x32xf32>
    %226 = arith.mulf %222, %225 : vector<16x32xf32>
    %227 = arith.mulf %221, %223 : vector<16x32xf32>
    %228 = arith.addf %226, %227 : vector<16x32xf32>
    %229 = math.tanh %228 : vector<16x32xf32>
    %230 = arith.mulf %224, %229 : vector<16x32xf32>
    %c0_144 = arith.constant 0 : index
    %c0_145 = arith.constant 0 : index
    %231 = vector.load %arg15[%c0_144, %c0_145] : memref<16x32xf32, #tpu.memory_space<vmem>>, vector<16x32xf32>
    tpu.vector_store %arg15[%c0_144, %c0_145], %228 {strides = array<i32>} : memref<16x32xf32, #tpu.memory_space<vmem>>, vector<16x32xf32>,
    %c0_146 = arith.constant 0 : index
    %c0_147 = arith.constant 0 : index
    %232 = vector.load %arg14[%c0_146, %c0_147] : memref<16x32xf32, #tpu.memory_space<vmem>>, vector<16x32xf32>
    tpu.vector_store %arg14[%c0_146, %c0_147], %230 {strides = array<i32>} : memref<16x32xf32, #tpu.memory_space<vmem>>, vector<16x32xf32>,
    %233 = arith.truncf %230 : vector<16x32xf32> to vector<16x32xbf16>
    %c112_148 = arith.constant 112 : index
    %c0_149 = arith.constant 0 : index
    %234 = vector.load %arg12[%c112_148, %c0_149] : memref<128x128xbf16, #tpu.memory_space<vmem>>, vector<16x32xbf16>
    tpu.vector_store %arg12[%c112_148, %c0_149], %233 {strides = array<i32>} : memref<128x128xbf16, #tpu.memory_space<vmem>>, vector<16x32xbf16>,
    %c0_150 = arith.constant 0 : index
    %c0_151 = arith.constant 0 : index
    %235 = vector.load %arg12[%c0_150, %c0_151] : memref<128x128xbf16, #tpu.memory_space<vmem>>, vector<128x128xbf16>
    %c1 = arith.constant 1 : index
    %c0_152 = arith.constant 0 : index
    %c0_153 = arith.constant 0 : index
    %236 = vector.load %arg4[%c1, %c0_152, %c0_153] : memref<2x128x128xbf16, #tpu.memory_space<vmem>>, vector<1x128x128xbf16>
    %237 = vector.shape_cast %236 : vector<1x128x128xbf16> to vector<128x128xbf16>
    %cst_154 = arith.constant dense<0.000000e+00> : vector<128x128xf32>
    %238 = tpu.matmul %235, %237, %cst_154 {dimension_numbers = #tpu.dot_dimension_numbers<[1], [0], [0], [1], [0, 0, 1, 1], [], []>} : vector<128x128xbf16>, vector<128x128xbf16>, vector<128x128xf32> -> vector<128x128xf32>
    %c1_155 = arith.constant 1 : index
    %c0_156 = arith.constant 0 : index
    %c0_157 = arith.constant 0 : index
    %239 = vector.load %arg6[%c1_155, %c0_156, %c0_157] : memref<2x1x128xf32, #tpu.memory_space<vmem>>, vector<1x1x128xf32>
    %240 = vector.shape_cast %239 : vector<1x1x128xf32> to vector<1x128xf32>
    %241 = vector.broadcast %240 : vector<1x128xf32> to vector<128x128xf32>
    %242 = arith.addf %238, %241 : vector<128x128xf32>
    %243 = arith.truncf %242 : vector<128x128xf32> to vector<128x128xbf16>
    %c0_158 = arith.constant 0 : index
    %c0_159 = arith.constant 0 : index
    %244 = vector.load %arg13[%c0_158, %c0_159] : memref<128x128xbf16, #tpu.memory_space<vmem>>, vector<128x128xbf16>
    tpu.vector_store %arg13[%c0_158, %c0_159], %243 {strides = array<i32>} : memref<128x128xbf16, #tpu.memory_space<vmem>>, vector<128x128xbf16>,
    %cst_160 = arith.constant 0.000000e+00 : f32
    %245 = vector.broadcast %cst_160 : f32 to vector<16x32xf32>
    %c0_161 = arith.constant 0 : index
    %c0_162 = arith.constant 0 : index
    %246 = vector.load %arg14[%c0_161, %c0_162] : memref<16x32xf32, #tpu.memory_space<vmem>>, vector<16x32xf32>
    tpu.vector_store %arg14[%c0_161, %c0_162], %245 {strides = array<i32>} : memref<16x32xf32, #tpu.memory_space<vmem>>, vector<16x32xf32>,
    %cst_163 = arith.constant 0.000000e+00 : f32
    %247 = vector.broadcast %cst_163 : f32 to vector<16x32xf32>
    %c0_164 = arith.constant 0 : index
    %c0_165 = arith.constant 0 : index
    %248 = vector.load %arg15[%c0_164, %c0_165] : memref<16x32xf32, #tpu.memory_space<vmem>>, vector<16x32xf32>
    tpu.vector_store %arg15[%c0_164, %c0_165], %247 {strides = array<i32>} : memref<16x32xf32, #tpu.memory_space<vmem>>, vector<16x32xf32>,
    %c0_166 = arith.constant 0 : index
    %c0_167 = arith.constant 0 : index
    %249 = vector.load %arg13[%c0_166, %c0_167] : memref<128x128xbf16, #tpu.memory_space<vmem>>, vector<16x128xbf16>
    %250 = arith.extf %249 : vector<16x128xbf16> to vector<16x128xf32>
    %c0_168 = arith.constant 0 : index
    %c0_169 = arith.constant 0 : index
    %251 = vector.load %arg14[%c0_168, %c0_169] : memref<16x32xf32, #tpu.memory_space<vmem>>, vector<16x32xf32>
    %252 = arith.truncf %251 : vector<16x32xf32> to vector<16x32xbf16>
    %c1_170 = arith.constant 1 : index
    %c0_171 = arith.constant 0 : index
    %c0_172 = arith.constant 0 : index
    %253 = vector.load %arg5[%c1_170, %c0_171, %c0_172] : memref<2x32x128xbf16, #tpu.memory_space<vmem>>, vector<1x32x128xbf16>
    %254 = vector.shape_cast %253 : vector<1x32x128xbf16> to vector<32x128xbf16>
    %cst_173 = arith.constant dense<0.000000e+00> : vector<16x128xf32>
    %255 = tpu.matmul %252, %254, %cst_173 {dimension_numbers = #tpu.dot_dimension_numbers<[1], [0], [0], [1], [0, 0, 1, 1], [], []>} : vector<16x32xbf16>, vector<32x128xbf16>, vector<16x128xf32> -> vector<16x128xf32>
    %256 = arith.addf %250, %255 : vector<16x128xf32>
    %257 = math.tanh %256 : vector<16x128xf32>
    %258 = arith.mulf %257, %17 : vector<16x128xf32>
    %259 = arith.addf %258, %20 : vector<16x128xf32>
    %260 = vector.extract_strided_slice %259 {offsets = [0, 0], sizes = [16, 32], strides = [1, 1]} : vector<16x128xf32> to vector<16x32xf32>
    %261 = vector.extract_strided_slice %259 {offsets = [0, 32], sizes = [16, 32], strides = [1, 1]} : vector<16x128xf32> to vector<16x32xf32>
    %262 = vector.extract_strided_slice %259 {offsets = [0, 64], sizes = [16, 32], strides = [1, 1]} : vector<16x128xf32> to vector<16x32xf32>
    %263 = vector.extract_strided_slice %259 {offsets = [0, 96], sizes = [16, 32], strides = [1, 1]} : vector<16x128xf32> to vector<16x32xf32>
    %c0_174 = arith.constant 0 : index
    %c0_175 = arith.constant 0 : index
    %264 = vector.load %arg15[%c0_174, %c0_175] : memref<16x32xf32, #tpu.memory_space<vmem>>, vector<16x32xf32>
    %265 = arith.mulf %261, %264 : vector<16x32xf32>
    %266 = arith.mulf %260, %262 : vector<16x32xf32>
    %267 = arith.addf %265, %266 : vector<16x32xf32>
    %268 = math.tanh %267 : vector<16x32xf32>
    %269 = arith.mulf %263, %268 : vector<16x32xf32>
    %c0_176 = arith.constant 0 : index
    %c0_177 = arith.constant 0 : index
    %270 = vector.load %arg15[%c0_176, %c0_177] : memref<16x32xf32, #tpu.memory_space<vmem>>, vector<16x32xf32>
    tpu.vector_store %arg15[%c0_176, %c0_177], %267 {strides = array<i32>} : memref<16x32xf32, #tpu.memory_space<vmem>>, vector<16x32xf32>,
    %c0_178 = arith.constant 0 : index
    %c0_179 = arith.constant 0 : index
    %271 = vector.load %arg14[%c0_178, %c0_179] : memref<16x32xf32, #tpu.memory_space<vmem>>, vector<16x32xf32>
    tpu.vector_store %arg14[%c0_178, %c0_179], %269 {strides = array<i32>} : memref<16x32xf32, #tpu.memory_space<vmem>>, vector<16x32xf32>,
    %272 = arith.truncf %269 : vector<16x32xf32> to vector<16x32xbf16>
    %c0_180 = arith.constant 0 : index
    %c0_181 = arith.constant 0 : index
    %273 = vector.load %arg12[%c0_180, %c0_181] : memref<128x128xbf16, #tpu.memory_space<vmem>>, vector<16x32xbf16>
    tpu.vector_store %arg12[%c0_180, %c0_181], %272 {strides = array<i32>} : memref<128x128xbf16, #tpu.memory_space<vmem>>, vector<16x32xbf16>,
    %c16_182 = arith.constant 16 : index
    %c0_183 = arith.constant 0 : index
    %274 = vector.load %arg13[%c16_182, %c0_183] : memref<128x128xbf16, #tpu.memory_space<vmem>>, vector<16x128xbf16>
    %275 = arith.extf %274 : vector<16x128xbf16> to vector<16x128xf32>
    %c0_184 = arith.constant 0 : index
    %c0_185 = arith.constant 0 : index
    %276 = vector.load %arg14[%c0_184, %c0_185] : memref<16x32xf32, #tpu.memory_space<vmem>>, vector<16x32xf32>
    %277 = arith.truncf %276 : vector<16x32xf32> to vector<16x32xbf16>
    %c1_186 = arith.constant 1 : index
    %c0_187 = arith.constant 0 : index
    %c0_188 = arith.constant 0 : index
    %278 = vector.load %arg5[%c1_186, %c0_187, %c0_188] : memref<2x32x128xbf16, #tpu.memory_space<vmem>>, vector<1x32x128xbf16>
    %279 = vector.shape_cast %278 : vector<1x32x128xbf16> to vector<32x128xbf16>
    %cst_189 = arith.constant dense<0.000000e+00> : vector<16x128xf32>
    %280 = tpu.matmul %277, %279, %cst_189 {dimension_numbers = #tpu.dot_dimension_numbers<[1], [0], [0], [1], [0, 0, 1, 1], [], []>} : vector<16x32xbf16>, vector<32x128xbf16>, vector<16x128xf32> -> vector<16x128xf32>
    %281 = arith.addf %275, %280 : vector<16x128xf32>
    %282 = math.tanh %281 : vector<16x128xf32>
    %283 = arith.mulf %282, %17 : vector<16x128xf32>
    %284 = arith.addf %283, %20 : vector<16x128xf32>
    %285 = vector.extract_strided_slice %284 {offsets = [0, 0], sizes = [16, 32], strides = [1, 1]} : vector<16x128xf32> to vector<16x32xf32>
    %286 = vector.extract_strided_slice %284 {offsets = [0, 32], sizes = [16, 32], strides = [1, 1]} : vector<16x128xf32> to vector<16x32xf32>
    %287 = vector.extract_strided_slice %284 {offsets = [0, 64], sizes = [16, 32], strides = [1, 1]} : vector<16x128xf32> to vector<16x32xf32>
    %288 = vector.extract_strided_slice %284 {offsets = [0, 96], sizes = [16, 32], strides = [1, 1]} : vector<16x128xf32> to vector<16x32xf32>
    %c0_190 = arith.constant 0 : index
    %c0_191 = arith.constant 0 : index
    %289 = vector.load %arg15[%c0_190, %c0_191] : memref<16x32xf32, #tpu.memory_space<vmem>>, vector<16x32xf32>
    %290 = arith.mulf %286, %289 : vector<16x32xf32>
    %291 = arith.mulf %285, %287 : vector<16x32xf32>
    %292 = arith.addf %290, %291 : vector<16x32xf32>
    %293 = math.tanh %292 : vector<16x32xf32>
    %294 = arith.mulf %288, %293 : vector<16x32xf32>
    %c0_192 = arith.constant 0 : index
    %c0_193 = arith.constant 0 : index
    %295 = vector.load %arg15[%c0_192, %c0_193] : memref<16x32xf32, #tpu.memory_space<vmem>>, vector<16x32xf32>
    tpu.vector_store %arg15[%c0_192, %c0_193], %292 {strides = array<i32>} : memref<16x32xf32, #tpu.memory_space<vmem>>, vector<16x32xf32>,
    %c0_194 = arith.constant 0 : index
    %c0_195 = arith.constant 0 : index
    %296 = vector.load %arg14[%c0_194, %c0_195] : memref<16x32xf32, #tpu.memory_space<vmem>>, vector<16x32xf32>
    tpu.vector_store %arg14[%c0_194, %c0_195], %294 {strides = array<i32>} : memref<16x32xf32, #tpu.memory_space<vmem>>, vector<16x32xf32>,
    %297 = arith.truncf %294 : vector<16x32xf32> to vector<16x32xbf16>
    %c16_196 = arith.constant 16 : index
    %c0_197 = arith.constant 0 : index
    %298 = vector.load %arg12[%c16_196, %c0_197] : memref<128x128xbf16, #tpu.memory_space<vmem>>, vector<16x32xbf16>
    tpu.vector_store %arg12[%c16_196, %c0_197], %297 {strides = array<i32>} : memref<128x128xbf16, #tpu.memory_space<vmem>>, vector<16x32xbf16>,
    %c32_198 = arith.constant 32 : index
    %c0_199 = arith.constant 0 : index
    %299 = vector.load %arg13[%c32_198, %c0_199] : memref<128x128xbf16, #tpu.memory_space<vmem>>, vector<16x128xbf16>
    %300 = arith.extf %299 : vector<16x128xbf16> to vector<16x128xf32>
    %c0_200 = arith.constant 0 : index
    %c0_201 = arith.constant 0 : index
    %301 = vector.load %arg14[%c0_200, %c0_201] : memref<16x32xf32, #tpu.memory_space<vmem>>, vector<16x32xf32>
    %302 = arith.truncf %301 : vector<16x32xf32> to vector<16x32xbf16>
    %c1_202 = arith.constant 1 : index
    %c0_203 = arith.constant 0 : index
    %c0_204 = arith.constant 0 : index
    %303 = vector.load %arg5[%c1_202, %c0_203, %c0_204] : memref<2x32x128xbf16, #tpu.memory_space<vmem>>, vector<1x32x128xbf16>
    %304 = vector.shape_cast %303 : vector<1x32x128xbf16> to vector<32x128xbf16>
    %cst_205 = arith.constant dense<0.000000e+00> : vector<16x128xf32>
    %305 = tpu.matmul %302, %304, %cst_205 {dimension_numbers = #tpu.dot_dimension_numbers<[1], [0], [0], [1], [0, 0, 1, 1], [], []>} : vector<16x32xbf16>, vector<32x128xbf16>, vector<16x128xf32> -> vector<16x128xf32>
    %306 = arith.addf %300, %305 : vector<16x128xf32>
    %307 = math.tanh %306 : vector<16x128xf32>
    %308 = arith.mulf %307, %17 : vector<16x128xf32>
    %309 = arith.addf %308, %20 : vector<16x128xf32>
    %310 = vector.extract_strided_slice %309 {offsets = [0, 0], sizes = [16, 32], strides = [1, 1]} : vector<16x128xf32> to vector<16x32xf32>
    %311 = vector.extract_strided_slice %309 {offsets = [0, 32], sizes = [16, 32], strides = [1, 1]} : vector<16x128xf32> to vector<16x32xf32>
    %312 = vector.extract_strided_slice %309 {offsets = [0, 64], sizes = [16, 32], strides = [1, 1]} : vector<16x128xf32> to vector<16x32xf32>
    %313 = vector.extract_strided_slice %309 {offsets = [0, 96], sizes = [16, 32], strides = [1, 1]} : vector<16x128xf32> to vector<16x32xf32>
    %c0_206 = arith.constant 0 : index
    %c0_207 = arith.constant 0 : index
    %314 = vector.load %arg15[%c0_206, %c0_207] : memref<16x32xf32, #tpu.memory_space<vmem>>, vector<16x32xf32>
    %315 = arith.mulf %311, %314 : vector<16x32xf32>
    %316 = arith.mulf %310, %312 : vector<16x32xf32>
    %317 = arith.addf %315, %316 : vector<16x32xf32>
    %318 = math.tanh %317 : vector<16x32xf32>
    %319 = arith.mulf %313, %318 : vector<16x32xf32>
    %c0_208 = arith.constant 0 : index
    %c0_209 = arith.constant 0 : index
    %320 = vector.load %arg15[%c0_208, %c0_209] : memref<16x32xf32, #tpu.memory_space<vmem>>, vector<16x32xf32>
    tpu.vector_store %arg15[%c0_208, %c0_209], %317 {strides = array<i32>} : memref<16x32xf32, #tpu.memory_space<vmem>>, vector<16x32xf32>,
    %c0_210 = arith.constant 0 : index
    %c0_211 = arith.constant 0 : index
    %321 = vector.load %arg14[%c0_210, %c0_211] : memref<16x32xf32, #tpu.memory_space<vmem>>, vector<16x32xf32>
    tpu.vector_store %arg14[%c0_210, %c0_211], %319 {strides = array<i32>} : memref<16x32xf32, #tpu.memory_space<vmem>>, vector<16x32xf32>,
    %322 = arith.truncf %319 : vector<16x32xf32> to vector<16x32xbf16>
    %c32_212 = arith.constant 32 : index
    %c0_213 = arith.constant 0 : index
    %323 = vector.load %arg12[%c32_212, %c0_213] : memref<128x128xbf16, #tpu.memory_space<vmem>>, vector<16x32xbf16>
    tpu.vector_store %arg12[%c32_212, %c0_213], %322 {strides = array<i32>} : memref<128x128xbf16, #tpu.memory_space<vmem>>, vector<16x32xbf16>,
    %c48_214 = arith.constant 48 : index
    %c0_215 = arith.constant 0 : index
    %324 = vector.load %arg13[%c48_214, %c0_215] : memref<128x128xbf16, #tpu.memory_space<vmem>>, vector<16x128xbf16>
    %325 = arith.extf %324 : vector<16x128xbf16> to vector<16x128xf32>
    %c0_216 = arith.constant 0 : index
    %c0_217 = arith.constant 0 : index
    %326 = vector.load %arg14[%c0_216, %c0_217] : memref<16x32xf32, #tpu.memory_space<vmem>>, vector<16x32xf32>
    %327 = arith.truncf %326 : vector<16x32xf32> to vector<16x32xbf16>
    %c1_218 = arith.constant 1 : index
    %c0_219 = arith.constant 0 : index
    %c0_220 = arith.constant 0 : index
    %328 = vector.load %arg5[%c1_218, %c0_219, %c0_220] : memref<2x32x128xbf16, #tpu.memory_space<vmem>>, vector<1x32x128xbf16>
    %329 = vector.shape_cast %328 : vector<1x32x128xbf16> to vector<32x128xbf16>
    %cst_221 = arith.constant dense<0.000000e+00> : vector<16x128xf32>
    %330 = tpu.matmul %327, %329, %cst_221 {dimension_numbers = #tpu.dot_dimension_numbers<[1], [0], [0], [1], [0, 0, 1, 1], [], []>} : vector<16x32xbf16>, vector<32x128xbf16>, vector<16x128xf32> -> vector<16x128xf32>
    %331 = arith.addf %325, %330 : vector<16x128xf32>
    %332 = math.tanh %331 : vector<16x128xf32>
    %333 = arith.mulf %332, %17 : vector<16x128xf32>
    %334 = arith.addf %333, %20 : vector<16x128xf32>
    %335 = vector.extract_strided_slice %334 {offsets = [0, 0], sizes = [16, 32], strides = [1, 1]} : vector<16x128xf32> to vector<16x32xf32>
    %336 = vector.extract_strided_slice %334 {offsets = [0, 32], sizes = [16, 32], strides = [1, 1]} : vector<16x128xf32> to vector<16x32xf32>
    %337 = vector.extract_strided_slice %334 {offsets = [0, 64], sizes = [16, 32], strides = [1, 1]} : vector<16x128xf32> to vector<16x32xf32>
    %338 = vector.extract_strided_slice %334 {offsets = [0, 96], sizes = [16, 32], strides = [1, 1]} : vector<16x128xf32> to vector<16x32xf32>
    %c0_222 = arith.constant 0 : index
    %c0_223 = arith.constant 0 : index
    %339 = vector.load %arg15[%c0_222, %c0_223] : memref<16x32xf32, #tpu.memory_space<vmem>>, vector<16x32xf32>
    %340 = arith.mulf %336, %339 : vector<16x32xf32>
    %341 = arith.mulf %335, %337 : vector<16x32xf32>
    %342 = arith.addf %340, %341 : vector<16x32xf32>
    %343 = math.tanh %342 : vector<16x32xf32>
    %344 = arith.mulf %338, %343 : vector<16x32xf32>
    %c0_224 = arith.constant 0 : index
    %c0_225 = arith.constant 0 : index
    %345 = vector.load %arg15[%c0_224, %c0_225] : memref<16x32xf32, #tpu.memory_space<vmem>>, vector<16x32xf32>
    tpu.vector_store %arg15[%c0_224, %c0_225], %342 {strides = array<i32>} : memref<16x32xf32, #tpu.memory_space<vmem>>, vector<16x32xf32>,
    %c0_226 = arith.constant 0 : index
    %c0_227 = arith.constant 0 : index
    %346 = vector.load %arg14[%c0_226, %c0_227] : memref<16x32xf32, #tpu.memory_space<vmem>>, vector<16x32xf32>
    tpu.vector_store %arg14[%c0_226, %c0_227], %344 {strides = array<i32>} : memref<16x32xf32, #tpu.memory_space<vmem>>, vector<16x32xf32>,
    %347 = arith.truncf %344 : vector<16x32xf32> to vector<16x32xbf16>
    %c48_228 = arith.constant 48 : index
    %c0_229 = arith.constant 0 : index
    %348 = vector.load %arg12[%c48_228, %c0_229] : memref<128x128xbf16, #tpu.memory_space<vmem>>, vector<16x32xbf16>
    tpu.vector_store %arg12[%c48_228, %c0_229], %347 {strides = array<i32>} : memref<128x128xbf16, #tpu.memory_space<vmem>>, vector<16x32xbf16>,
    %c64_230 = arith.constant 64 : index
    %c0_231 = arith.constant 0 : index
    %349 = vector.load %arg13[%c64_230, %c0_231] : memref<128x128xbf16, #tpu.memory_space<vmem>>, vector<16x128xbf16>
    %350 = arith.extf %349 : vector<16x128xbf16> to vector<16x128xf32>
    %c0_232 = arith.constant 0 : index
    %c0_233 = arith.constant 0 : index
    %351 = vector.load %arg14[%c0_232, %c0_233] : memref<16x32xf32, #tpu.memory_space<vmem>>, vector<16x32xf32>
    %352 = arith.truncf %351 : vector<16x32xf32> to vector<16x32xbf16>
    %c1_234 = arith.constant 1 : index
    %c0_235 = arith.constant 0 : index
    %c0_236 = arith.constant 0 : index
    %353 = vector.load %arg5[%c1_234, %c0_235, %c0_236] : memref<2x32x128xbf16, #tpu.memory_space<vmem>>, vector<1x32x128xbf16>
    %354 = vector.shape_cast %353 : vector<1x32x128xbf16> to vector<32x128xbf16>
    %cst_237 = arith.constant dense<0.000000e+00> : vector<16x128xf32>
    %355 = tpu.matmul %352, %354, %cst_237 {dimension_numbers = #tpu.dot_dimension_numbers<[1], [0], [0], [1], [0, 0, 1, 1], [], []>} : vector<16x32xbf16>, vector<32x128xbf16>, vector<16x128xf32> -> vector<16x128xf32>
    %356 = arith.addf %350, %355 : vector<16x128xf32>
    %357 = math.tanh %356 : vector<16x128xf32>
    %358 = arith.mulf %357, %17 : vector<16x128xf32>
    %359 = arith.addf %358, %20 : vector<16x128xf32>
    %360 = vector.extract_strided_slice %359 {offsets = [0, 0], sizes = [16, 32], strides = [1, 1]} : vector<16x128xf32> to vector<16x32xf32>
    %361 = vector.extract_strided_slice %359 {offsets = [0, 32], sizes = [16, 32], strides = [1, 1]} : vector<16x128xf32> to vector<16x32xf32>
    %362 = vector.extract_strided_slice %359 {offsets = [0, 64], sizes = [16, 32], strides = [1, 1]} : vector<16x128xf32> to vector<16x32xf32>
    %363 = vector.extract_strided_slice %359 {offsets = [0, 96], sizes = [16, 32], strides = [1, 1]} : vector<16x128xf32> to vector<16x32xf32>
    %c0_238 = arith.constant 0 : index
    %c0_239 = arith.constant 0 : index
    %364 = vector.load %arg15[%c0_238, %c0_239] : memref<16x32xf32, #tpu.memory_space<vmem>>, vector<16x32xf32>
    %365 = arith.mulf %361, %364 : vector<16x32xf32>
    %366 = arith.mulf %360, %362 : vector<16x32xf32>
    %367 = arith.addf %365, %366 : vector<16x32xf32>
    %368 = math.tanh %367 : vector<16x32xf32>
    %369 = arith.mulf %363, %368 : vector<16x32xf32>
    %c0_240 = arith.constant 0 : index
    %c0_241 = arith.constant 0 : index
    %370 = vector.load %arg15[%c0_240, %c0_241] : memref<16x32xf32, #tpu.memory_space<vmem>>, vector<16x32xf32>
    tpu.vector_store %arg15[%c0_240, %c0_241], %367 {strides = array<i32>} : memref<16x32xf32, #tpu.memory_space<vmem>>, vector<16x32xf32>,
    %c0_242 = arith.constant 0 : index
    %c0_243 = arith.constant 0 : index
    %371 = vector.load %arg14[%c0_242, %c0_243] : memref<16x32xf32, #tpu.memory_space<vmem>>, vector<16x32xf32>
    tpu.vector_store %arg14[%c0_242, %c0_243], %369 {strides = array<i32>} : memref<16x32xf32, #tpu.memory_space<vmem>>, vector<16x32xf32>,
    %372 = arith.truncf %369 : vector<16x32xf32> to vector<16x32xbf16>
    %c64_244 = arith.constant 64 : index
    %c0_245 = arith.constant 0 : index
    %373 = vector.load %arg12[%c64_244, %c0_245] : memref<128x128xbf16, #tpu.memory_space<vmem>>, vector<16x32xbf16>
    tpu.vector_store %arg12[%c64_244, %c0_245], %372 {strides = array<i32>} : memref<128x128xbf16, #tpu.memory_space<vmem>>, vector<16x32xbf16>,
    %c80_246 = arith.constant 80 : index
    %c0_247 = arith.constant 0 : index
    %374 = vector.load %arg13[%c80_246, %c0_247] : memref<128x128xbf16, #tpu.memory_space<vmem>>, vector<16x128xbf16>
    %375 = arith.extf %374 : vector<16x128xbf16> to vector<16x128xf32>
    %c0_248 = arith.constant 0 : index
    %c0_249 = arith.constant 0 : index
    %376 = vector.load %arg14[%c0_248, %c0_249] : memref<16x32xf32, #tpu.memory_space<vmem>>, vector<16x32xf32>
    %377 = arith.truncf %376 : vector<16x32xf32> to vector<16x32xbf16>
    %c1_250 = arith.constant 1 : index
    %c0_251 = arith.constant 0 : index
    %c0_252 = arith.constant 0 : index
    %378 = vector.load %arg5[%c1_250, %c0_251, %c0_252] : memref<2x32x128xbf16, #tpu.memory_space<vmem>>, vector<1x32x128xbf16>
    %379 = vector.shape_cast %378 : vector<1x32x128xbf16> to vector<32x128xbf16>
    %cst_253 = arith.constant dense<0.000000e+00> : vector<16x128xf32>
    %380 = tpu.matmul %377, %379, %cst_253 {dimension_numbers = #tpu.dot_dimension_numbers<[1], [0], [0], [1], [0, 0, 1, 1], [], []>} : vector<16x32xbf16>, vector<32x128xbf16>, vector<16x128xf32> -> vector<16x128xf32>
    %381 = arith.addf %375, %380 : vector<16x128xf32>
    %382 = math.tanh %381 : vector<16x128xf32>
    %383 = arith.mulf %382, %17 : vector<16x128xf32>
    %384 = arith.addf %383, %20 : vector<16x128xf32>
    %385 = vector.extract_strided_slice %384 {offsets = [0, 0], sizes = [16, 32], strides = [1, 1]} : vector<16x128xf32> to vector<16x32xf32>
    %386 = vector.extract_strided_slice %384 {offsets = [0, 32], sizes = [16, 32], strides = [1, 1]} : vector<16x128xf32> to vector<16x32xf32>
    %387 = vector.extract_strided_slice %384 {offsets = [0, 64], sizes = [16, 32], strides = [1, 1]} : vector<16x128xf32> to vector<16x32xf32>
    %388 = vector.extract_strided_slice %384 {offsets = [0, 96], sizes = [16, 32], strides = [1, 1]} : vector<16x128xf32> to vector<16x32xf32>
    %c0_254 = arith.constant 0 : index
    %c0_255 = arith.constant 0 : index
    %389 = vector.load %arg15[%c0_254, %c0_255] : memref<16x32xf32, #tpu.memory_space<vmem>>, vector<16x32xf32>
    %390 = arith.mulf %386, %389 : vector<16x32xf32>
    %391 = arith.mulf %385, %387 : vector<16x32xf32>
    %392 = arith.addf %390, %391 : vector<16x32xf32>
    %393 = math.tanh %392 : vector<16x32xf32>
    %394 = arith.mulf %388, %393 : vector<16x32xf32>
    %c0_256 = arith.constant 0 : index
    %c0_257 = arith.constant 0 : index
    %395 = vector.load %arg15[%c0_256, %c0_257] : memref<16x32xf32, #tpu.memory_space<vmem>>, vector<16x32xf32>
    tpu.vector_store %arg15[%c0_256, %c0_257], %392 {strides = array<i32>} : memref<16x32xf32, #tpu.memory_space<vmem>>, vector<16x32xf32>,
    %c0_258 = arith.constant 0 : index
    %c0_259 = arith.constant 0 : index
    %396 = vector.load %arg14[%c0_258, %c0_259] : memref<16x32xf32, #tpu.memory_space<vmem>>, vector<16x32xf32>
    tpu.vector_store %arg14[%c0_258, %c0_259], %394 {strides = array<i32>} : memref<16x32xf32, #tpu.memory_space<vmem>>, vector<16x32xf32>,
    %397 = arith.truncf %394 : vector<16x32xf32> to vector<16x32xbf16>
    %c80_260 = arith.constant 80 : index
    %c0_261 = arith.constant 0 : index
    %398 = vector.load %arg12[%c80_260, %c0_261] : memref<128x128xbf16, #tpu.memory_space<vmem>>, vector<16x32xbf16>
    tpu.vector_store %arg12[%c80_260, %c0_261], %397 {strides = array<i32>} : memref<128x128xbf16, #tpu.memory_space<vmem>>, vector<16x32xbf16>,
    %c96_262 = arith.constant 96 : index
    %c0_263 = arith.constant 0 : index
    %399 = vector.load %arg13[%c96_262, %c0_263] : memref<128x128xbf16, #tpu.memory_space<vmem>>, vector<16x128xbf16>
    %400 = arith.extf %399 : vector<16x128xbf16> to vector<16x128xf32>
    %c0_264 = arith.constant 0 : index
    %c0_265 = arith.constant 0 : index
    %401 = vector.load %arg14[%c0_264, %c0_265] : memref<16x32xf32, #tpu.memory_space<vmem>>, vector<16x32xf32>
    %402 = arith.truncf %401 : vector<16x32xf32> to vector<16x32xbf16>
    %c1_266 = arith.constant 1 : index
    %c0_267 = arith.constant 0 : index
    %c0_268 = arith.constant 0 : index
    %403 = vector.load %arg5[%c1_266, %c0_267, %c0_268] : memref<2x32x128xbf16, #tpu.memory_space<vmem>>, vector<1x32x128xbf16>
    %404 = vector.shape_cast %403 : vector<1x32x128xbf16> to vector<32x128xbf16>
    %cst_269 = arith.constant dense<0.000000e+00> : vector<16x128xf32>
    %405 = tpu.matmul %402, %404, %cst_269 {dimension_numbers = #tpu.dot_dimension_numbers<[1], [0], [0], [1], [0, 0, 1, 1], [], []>} : vector<16x32xbf16>, vector<32x128xbf16>, vector<16x128xf32> -> vector<16x128xf32>
    %406 = arith.addf %400, %405 : vector<16x128xf32>
    %407 = math.tanh %406 : vector<16x128xf32>
    %408 = arith.mulf %407, %17 : vector<16x128xf32>
    %409 = arith.addf %408, %20 : vector<16x128xf32>
    %410 = vector.extract_strided_slice %409 {offsets = [0, 0], sizes = [16, 32], strides = [1, 1]} : vector<16x128xf32> to vector<16x32xf32>
    %411 = vector.extract_strided_slice %409 {offsets = [0, 32], sizes = [16, 32], strides = [1, 1]} : vector<16x128xf32> to vector<16x32xf32>
    %412 = vector.extract_strided_slice %409 {offsets = [0, 64], sizes = [16, 32], strides = [1, 1]} : vector<16x128xf32> to vector<16x32xf32>
    %413 = vector.extract_strided_slice %409 {offsets = [0, 96], sizes = [16, 32], strides = [1, 1]} : vector<16x128xf32> to vector<16x32xf32>
    %c0_270 = arith.constant 0 : index
    %c0_271 = arith.constant 0 : index
    %414 = vector.load %arg15[%c0_270, %c0_271] : memref<16x32xf32, #tpu.memory_space<vmem>>, vector<16x32xf32>
    %415 = arith.mulf %411, %414 : vector<16x32xf32>
    %416 = arith.mulf %410, %412 : vector<16x32xf32>
    %417 = arith.addf %415, %416 : vector<16x32xf32>
    %418 = math.tanh %417 : vector<16x32xf32>
    %419 = arith.mulf %413, %418 : vector<16x32xf32>
    %c0_272 = arith.constant 0 : index
    %c0_273 = arith.constant 0 : index
    %420 = vector.load %arg15[%c0_272, %c0_273] : memref<16x32xf32, #tpu.memory_space<vmem>>, vector<16x32xf32>
    tpu.vector_store %arg15[%c0_272, %c0_273], %417 {strides = array<i32>} : memref<16x32xf32, #tpu.memory_space<vmem>>, vector<16x32xf32>,
    %c0_274 = arith.constant 0 : index
    %c0_275 = arith.constant 0 : index
    %421 = vector.load %arg14[%c0_274, %c0_275] : memref<16x32xf32, #tpu.memory_space<vmem>>, vector<16x32xf32>
    tpu.vector_store %arg14[%c0_274, %c0_275], %419 {strides = array<i32>} : memref<16x32xf32, #tpu.memory_space<vmem>>, vector<16x32xf32>,
    %422 = arith.truncf %419 : vector<16x32xf32> to vector<16x32xbf16>
    %c96_276 = arith.constant 96 : index
    %c0_277 = arith.constant 0 : index
    %423 = vector.load %arg12[%c96_276, %c0_277] : memref<128x128xbf16, #tpu.memory_space<vmem>>, vector<16x32xbf16>
    tpu.vector_store %arg12[%c96_276, %c0_277], %422 {strides = array<i32>} : memref<128x128xbf16, #tpu.memory_space<vmem>>, vector<16x32xbf16>,
    %c112_278 = arith.constant 112 : index
    %c0_279 = arith.constant 0 : index
    %424 = vector.load %arg13[%c112_278, %c0_279] : memref<128x128xbf16, #tpu.memory_space<vmem>>, vector<16x128xbf16>
    %425 = arith.extf %424 : vector<16x128xbf16> to vector<16x128xf32>
    %c0_280 = arith.constant 0 : index
    %c0_281 = arith.constant 0 : index
    %426 = vector.load %arg14[%c0_280, %c0_281] : memref<16x32xf32, #tpu.memory_space<vmem>>, vector<16x32xf32>
    %427 = arith.truncf %426 : vector<16x32xf32> to vector<16x32xbf16>
    %c1_282 = arith.constant 1 : index
    %c0_283 = arith.constant 0 : index
    %c0_284 = arith.constant 0 : index
    %428 = vector.load %arg5[%c1_282, %c0_283, %c0_284] : memref<2x32x128xbf16, #tpu.memory_space<vmem>>, vector<1x32x128xbf16>
    %429 = vector.shape_cast %428 : vector<1x32x128xbf16> to vector<32x128xbf16>
    %cst_285 = arith.constant dense<0.000000e+00> : vector<16x128xf32>
    %430 = tpu.matmul %427, %429, %cst_285 {dimension_numbers = #tpu.dot_dimension_numbers<[1], [0], [0], [1], [0, 0, 1, 1], [], []>} : vector<16x32xbf16>, vector<32x128xbf16>, vector<16x128xf32> -> vector<16x128xf32>
    %431 = arith.addf %425, %430 : vector<16x128xf32>
    %432 = math.tanh %431 : vector<16x128xf32>
    %433 = arith.mulf %432, %17 : vector<16x128xf32>
    %434 = arith.addf %433, %20 : vector<16x128xf32>
    %435 = vector.extract_strided_slice %434 {offsets = [0, 0], sizes = [16, 32], strides = [1, 1]} : vector<16x128xf32> to vector<16x32xf32>
    %436 = vector.extract_strided_slice %434 {offsets = [0, 32], sizes = [16, 32], strides = [1, 1]} : vector<16x128xf32> to vector<16x32xf32>
    %437 = vector.extract_strided_slice %434 {offsets = [0, 64], sizes = [16, 32], strides = [1, 1]} : vector<16x128xf32> to vector<16x32xf32>
    %438 = vector.extract_strided_slice %434 {offsets = [0, 96], sizes = [16, 32], strides = [1, 1]} : vector<16x128xf32> to vector<16x32xf32>
    %c0_286 = arith.constant 0 : index
    %c0_287 = arith.constant 0 : index
    %439 = vector.load %arg15[%c0_286, %c0_287] : memref<16x32xf32, #tpu.memory_space<vmem>>, vector<16x32xf32>
    %440 = arith.mulf %436, %439 : vector<16x32xf32>
    %441 = arith.mulf %435, %437 : vector<16x32xf32>
    %442 = arith.addf %440, %441 : vector<16x32xf32>
    %443 = math.tanh %442 : vector<16x32xf32>
    %444 = arith.mulf %438, %443 : vector<16x32xf32>
    %c0_288 = arith.constant 0 : index
    %c0_289 = arith.constant 0 : index
    %445 = vector.load %arg15[%c0_288, %c0_289] : memref<16x32xf32, #tpu.memory_space<vmem>>, vector<16x32xf32>
    tpu.vector_store %arg15[%c0_288, %c0_289], %442 {strides = array<i32>} : memref<16x32xf32, #tpu.memory_space<vmem>>, vector<16x32xf32>,
    %c0_290 = arith.constant 0 : index
    %c0_291 = arith.constant 0 : index
    %446 = vector.load %arg14[%c0_290, %c0_291] : memref<16x32xf32, #tpu.memory_space<vmem>>, vector<16x32xf32>
    tpu.vector_store %arg14[%c0_290, %c0_291], %444 {strides = array<i32>} : memref<16x32xf32, #tpu.memory_space<vmem>>, vector<16x32xf32>,
    %447 = arith.truncf %444 : vector<16x32xf32> to vector<16x32xbf16>
    %c112_292 = arith.constant 112 : index
    %c0_293 = arith.constant 0 : index
    %448 = vector.load %arg12[%c112_292, %c0_293] : memref<128x128xbf16, #tpu.memory_space<vmem>>, vector<16x32xbf16>
    tpu.vector_store %arg12[%c112_292, %c0_293], %447 {strides = array<i32>} : memref<128x128xbf16, #tpu.memory_space<vmem>>, vector<16x32xbf16>,
    %c0_294 = arith.constant 0 : index
    %c0_295 = arith.constant 0 : index
    %449 = vector.load %arg12[%c0_294, %c0_295] : memref<128x128xbf16, #tpu.memory_space<vmem>>, vector<128x128xbf16>
    %c0_296 = arith.constant 0 : index
    %c0_297 = arith.constant 0 : index
    %450 = vector.load %arg7[%c0_296, %c0_297] : memref<128x128xbf16, #tpu.memory_space<vmem>>, vector<128x128xbf16>
    %cst_298 = arith.constant dense<0.000000e+00> : vector<128x128xf32>
    %451 = tpu.matmul %449, %450, %cst_298 {dimension_numbers = #tpu.dot_dimension_numbers<[1], [0], [0], [1], [0, 0, 1, 1], [], []>} : vector<128x128xbf16>, vector<128x128xbf16>, vector<128x128xf32> -> vector<128x128xf32>
    %c0_299 = arith.constant 0 : index
    %c0_300 = arith.constant 0 : index
    %452 = vector.load %arg8[%c0_299, %c0_300] : memref<1x128xf32, #tpu.memory_space<vmem>>, vector<1x128xf32>
    %453 = vector.broadcast %452 : vector<1x128xf32> to vector<128x128xf32>
    %454 = arith.addf %451, %453 : vector<128x128xf32>
    %cst_301 = arith.constant 0.000000e+00 : f32
    %455 = vector.broadcast %cst_301 : f32 to vector<128x128xf32>
    %456 = arith.maximumf %454, %455 : vector<128x128xf32>
    %457 = arith.truncf %456 : vector<128x128xf32> to vector<128x128xbf16>
    %c0_302 = arith.constant 0 : index
    %c0_303 = arith.constant 0 : index
    %458 = vector.load %arg9[%c0_302, %c0_303] : memref<128x128xbf16, #tpu.memory_space<vmem>>, vector<128x128xbf16>
    %cst_304 = arith.constant dense<0.000000e+00> : vector<128x128xf32>
    %459 = tpu.matmul %457, %458, %cst_304 {dimension_numbers = #tpu.dot_dimension_numbers<[1], [0], [0], [1], [0, 0, 1, 1], [], []>} : vector<128x128xbf16>, vector<128x128xbf16>, vector<128x128xf32> -> vector<128x128xf32>
    %c0_305 = arith.constant 0 : index
    %c0_306 = arith.constant 0 : index
    %460 = vector.load %arg10[%c0_305, %c0_306] : memref<1x128xf32, #tpu.memory_space<vmem>>, vector<1x128xf32>
    %461 = vector.broadcast %460 : vector<1x128xf32> to vector<128x128xf32>
    %462 = arith.addf %459, %461 : vector<128x128xf32>
    %c0_307 = arith.constant 0 : index
    %c0_308 = arith.constant 0 : index
    %c0_309 = arith.constant 0 : index
    %463 = vector.load %arg11[%c0_307, %c0_308, %c0_309] : memref<1x128x128xf32, #tpu.memory_space<vmem>>, vector<1x128x128xf32>
    %464 = vector.shape_cast %463 : vector<1x128x128xf32> to vector<128x128xf32>
    %465 = vector.shape_cast %462 : vector<128x128xf32> to vector<1x128x128xf32>
    tpu.vector_store %arg11[%c0_307, %c0_308, %c0_309], %465 {strides = array<i32>} : memref<1x128x128xf32, #tpu.memory_space<vmem>>, vector<1x128x128xf32>,
    return
  }
  func.func @transform_0(%arg0: i32) -> (i32, i32, i32) {
    %c0_i32 = arith.constant 0 : i32
    %c0_i32_0 = arith.constant 0 : i32
    %c0_i32_1 = arith.constant 0 : i32
    return %arg0, %c0_i32, %c0_i32_0 : i32, i32, i32
  }
  func.func @transform_1(%arg0: i32) -> (i32, i32) {
    %c0_i32 = arith.constant 0 : i32
    %c0_i32_0 = arith.constant 0 : i32
    %c0_i32_1 = arith.constant 0 : i32
    return %c0_i32, %c0_i32_0 : i32, i32
  }
  func.func @transform_2(%arg0: i32) -> (i32, i32) {
    %c0_i32 = arith.constant 0 : i32
    %c0_i32_0 = arith.constant 0 : i32
    %c0_i32_1 = arith.constant 0 : i32
    return %c0_i32, %c0_i32_0 : i32, i32
  }
  func.func @transform_3(%arg0: i32) -> (i32, i32, i32) {
    %c0_i32 = arith.constant 0 : i32
    %c0_i32_0 = arith.constant 0 : i32
    %c0_i32_1 = arith.constant 0 : i32
    %c0_i32_2 = arith.constant 0 : i32
    return %c0_i32, %c0_i32_0, %c0_i32_1 : i32, i32, i32
  }
  func.func @transform_4(%arg0: i32) -> (i32, i32, i32) {
    %c0_i32 = arith.constant 0 : i32
    %c0_i32_0 = arith.constant 0 : i32
    %c0_i32_1 = arith.constant 0 : i32
    %c0_i32_2 = arith.constant 0 : i32
    return %c0_i32, %c0_i32_0, %c0_i32_1 : i32, i32, i32
  }
  func.func @transform_5(%arg0: i32) -> (i32, i32, i32) {
    %c0_i32 = arith.constant 0 : i32
    %c0_i32_0 = arith.constant 0 : i32
    %c0_i32_1 = arith.constant 0 : i32
    %c0_i32_2 = arith.constant 0 : i32
    return %c0_i32, %c0_i32_0, %c0_i32_1 : i32, i32, i32
  }
  func.func @transform_6(%arg0: i32) -> (i32, i32) {
    %c0_i32 = arith.constant 0 : i32
    %c0_i32_0 = arith.constant 0 : i32
    %c0_i32_1 = arith.constant 0 : i32
    return %c0_i32, %c0_i32_0 : i32, i32
  }
  func.func @transform_7(%arg0: i32) -> (i32, i32) {
    %c0_i32 = arith.constant 0 : i32
    %c0_i32_0 = arith.constant 0 : i32
    %c0_i32_1 = arith.constant 0 : i32
    return %c0_i32, %c0_i32_0 : i32, i32
  }
  func.func @transform_8(%arg0: i32) -> (i32, i32) {
    %c0_i32 = arith.constant 0 : i32
    %c0_i32_0 = arith.constant 0 : i32
    %c0_i32_1 = arith.constant 0 : i32
    return %c0_i32, %c0_i32_0 : i32, i32
  }
  func.func @transform_9(%arg0: i32) -> (i32, i32) {
    %c0_i32 = arith.constant 0 : i32
    %c0_i32_0 = arith.constant 0 : i32
    %c0_i32_1 = arith.constant 0 : i32
    return %c0_i32, %c0_i32_0 : i32, i32
  }
  func.func @transform_10(%arg0: i32) -> (i32, i32, i32) {
    %c0_i32 = arith.constant 0 : i32
    %c0_i32_0 = arith.constant 0 : i32
    %c0_i32_1 = arith.constant 0 : i32
    return %arg0, %c0_i32, %c0_i32_0 : i32, i32, i32
  }
}

</mosaic_0001>

<bundles_post_ra>
// kernel: m5net_forward.1
= control target key start
LH: loop header
LB: loop body
LE: loop exit
PB: predicated region body
PF: predicated region fallthrough
CT: control target
= control target key end

     0   :  { %15 = vsyncpa [#allocation7], 0  ;;  %s5450_s0 = inlined_call_operand.hbm [shape: bf16[1,128,128], index: 0, kind: input, shape index: {}]   ;;  %s5451_s1 = inlined_call_operand.hbm [shape: bf16[128,128], index: 1, kind: input, shape index: {}]   ;;  %s5452_s2 = inlined_call_operand.hbm [shape: f32[1,128], index: 2, kind: input, shape index: {}]   ;;  %s5453_s3 = inlined_call_operand.hbm [shape: bf16[2,128,128], index: 3, kind: input, shape index: {}]   ;;  %s5454_s4 = inlined_call_operand.hbm [shape: bf16[2,32,128], index: 4, kind: input, shape index: {}]   ;;  %s5455_s5 = inlined_call_operand.hbm [shape: f32[2,1,128], index: 5, kind: input, shape index: {}]   ;;  %s5456_s6 = inlined_call_operand.hbm [shape: bf16[128,128], index: 6, kind: input, shape index: {}]   ;;  %s5457_s7 = inlined_call_operand.hbm [shape: f32[1,128], index: 7, kind: input, shape index: {}]   ;;  %s5458_s8 = inlined_call_operand.hbm [shape: bf16[128,128], index: 8, kind: input, shape index: {}]   ;;  %s5459_s9 = inlined_call_operand.hbm [shape: f32[1,128], index: 9, kind: input, shape index: {}]   ;;  %s5460_s10 = inlined_call_operand.hbm [shape: f32[1,128,128], index: 10, kind: output, shape index: {}]  }
   0x1   :  { %16 = vsyncpa [#allocation10], 0 }
   0x2   :  { %17 = vsyncpa [#allocation13], 0 }
   0x3   :  { %18 = vsyncpa [#allocation16], 0 }
   0x4   :  { %19 = vsyncpa [#allocation19], 0 }
   0x5   :  { %20 = vsyncpa [#allocation22], 0 }
   0x6   :  { %21 = vsyncpa [#allocation8], 0  ;;  %s4531_s13 = smov [#allocation9]   ;;  %s4532_s15 = smov [#allocation12]  }
   0x7   :  { %s39_s14 = sshll.u32 %s4531_s13, 4  ;;  %s61_s16 = sshll.u32 %s4532_s15, 4  ;;  %s40_s14 = int_to_ptr.vmem [resolvable:$true] %s39_s14  ;;  %s4608_s16 = int_to_ptr.vmem [resolvable:$true] %s61_s16 }
   0x8   :  { %s4275_s19 = scalar_lea.hbm %s5451_s1, 1024 }
   0x9   :  { %p4276_p0 = scmp.ne.s32.totalorder %s5451_s1, %s4275_s19  ;;  %p4279_p1 = scmp.lt.u32.totalorder %s4275_s19, %s5451_s1 }
   0xb   :  { %p4281_p2 = pnand %p4279_p1, %p4276_p0 }
   0xd   :  { %4284 = shalt.err (!%p4281_p2)
}
   0xe   :  { %s4285_s24 = scalar_lea.vmem %s40_s14, 1024  ;;  %p4290_p4 = scmp.lt.s32.totalorder %s40_s14, %s40_s14 }
   0xf   :  { %p4286_p3 = scmp.ne.s32.totalorder %s40_s14, %s4285_s24  ;;  %p4291_p5 = scmp.lt.s32.totalorder %s4285_s24, %s4285_s24 }
  0x11   :  { %p4292_p6 = por %p4291_p5, %p4290_p4 }
  0x13   :  { %p4293_p7 = pnand %p4292_p6, %p4286_p3 }
  0x15   :  { %4296 = shalt.err (!%p4293_p7)
}
  0x16   :  { %s4533_s25 = smov 64   ;;  %s4534_s26 = smov 4  }
  0x17   :  { %45 = dma.hbm_to_vmem [thread:$0]  %s5451_s1, 1024, %s40_s14, [#allocation10], %s4533_s25, %s4533_s25, %s4534_s26  }
  0x18   :  { %s4297_s11 = scalar_lea.hbm %s5453_s3, 2048 }
  0x19   :  { %p4298_p8 = scmp.ne.s32.totalorder %s5453_s3, %s4297_s11  ;;  %p4301_p9 = scmp.lt.u32.totalorder %s4297_s11, %s5453_s3 }
  0x1b   :  { %p4303_p10 = pnand %p4301_p9, %p4298_p8 }
  0x1d   :  { %4306 = shalt.err (!%p4303_p10)
}
  0x1e   :  { %s4307_s18 = scalar_lea.vmem %s4608_s16, 2048  ;;  %p4312_p12 = scmp.lt.s32.totalorder %s4608_s16, %s4608_s16 }
  0x1f   :  { %p4308_p11 = scmp.ne.s32.totalorder %s4608_s16, %s4307_s18  ;;  %p4313_p13 = scmp.lt.s32.totalorder %s4307_s18, %s4307_s18 }
  0x21   :  { %p4314_p0 = por %p4313_p13, %p4312_p12 }
  0x23   :  { %p4315_p1 = pnand %p4314_p0, %p4308_p11 }
  0x25   :  { %4318 = shalt.err (!%p4315_p1)
}
  0x26   :  { %67 = dma.hbm_to_vmem [thread:$0]  %s5453_s3, 2048, %s4608_s16, [#allocation13], %s4533_s25, %s4533_s25, %s4534_s26  }
  0x27   :  { %s4535_s19 = smov [#allocation15]   ;;  %s4319_s23 = scalar_lea.hbm %s5455_s5, 32 }
  0x28   :  { %s85_s20 = sshll.u32 %s4535_s19, 4  ;;  %p4320_p2 = scmp.ne.s32.totalorder %s5455_s5, %s4319_s23  ;;  %s86_s20 = int_to_ptr.vmem [resolvable:$true] %s85_s20 }
  0x29   :  { %p4323_p3 = scmp.lt.u32.totalorder %s4319_s23, %s5455_s5 }
  0x2b   :  { %p4325_p4 = pnand %p4323_p3, %p4320_p2 }
  0x2d   :  { %4328 = shalt.err (!%p4325_p4)
}
  0x2e   :  { %s4329_s30 = scalar_lea.vmem %s86_s20, 32  ;;  %p4334_p6 = scmp.lt.s32.totalorder %s86_s20, %s86_s20 }
  0x2f   :  { %p4330_p5 = scmp.ne.s32.totalorder %s86_s20, %s4329_s30  ;;  %p4335_p7 = scmp.lt.s32.totalorder %s4329_s30, %s4329_s30 }
  0x31   :  { %p4336_p8 = por %p4335_p7, %p4334_p6 }
  0x33   :  { %p4337_p9 = pnand %p4336_p8, %p4330_p5 }
  0x35   :  { %4340 = shalt.err (!%p4337_p9)
}
  0x36   :  { %s4536_s3 = smov 16   ;;  %s4537_s16 = smov 1  }
  0x37   :  { %91 = dma.hbm_to_vmem [thread:$0]  %s5455_s5, 32, %s86_s20, [#allocation16], %s4536_s3, %s4536_s3, %s4537_s16  }
  0x38   :  { %s4538_s13 = smov [#allocation18]   ;;  %s4539_s17 = smov [#allocation6]  }
  0x39   :  { %s110_s15 = sshll.u32 %s4538_s13, 4  ;;  %s27_s18 = sshll.u32 %s4539_s17, 4  ;;  %s111_s15 = int_to_ptr.vmem [resolvable:$true] %s110_s15  ;;  %s28_s18 = int_to_ptr.vmem [resolvable:$true] %s27_s18 }
  0x3a   :  { %s4341_s19 = scalar_lea.hbm %s5457_s7, 16 }
  0x3b   :  { %p4342_p10 = scmp.ne.s32.totalorder %s5457_s7, %s4341_s19  ;;  %p4345_p11 = scmp.lt.u32.totalorder %s4341_s19, %s5457_s7 }
  0x3d   :  { %p4347_p12 = pnand %p4345_p11, %p4342_p10 }
  0x3f   :  { %4350 = shalt.err (!%p4347_p12)
}
  0x40   :  { %s4351_s5 = scalar_lea.vmem %s111_s15, 16  ;;  %s4355_s20 = scalar_lea.vmem %s111_s15, 32 }
  0x41   :  { %p4352_p13 = scmp.ne.s32.totalorder %s111_s15, %s4351_s5  ;;  %p4356_p0 = scmp.lt.s32.totalorder %s111_s15, %s111_s15 }
  0x42   :  { %p4357_p1 = scmp.lt.s32.totalorder %s4355_s20, %s4351_s5 }
  0x44   :  { %p4358_p2 = por %p4357_p1, %p4356_p0 }
  0x46   :  { %p4359_p3 = pnand %p4358_p2, %p4352_p13 }
  0x48   :  { %4362 = shalt.err (!%p4359_p3)
}
  0x49   :  { %113 = dma.hbm_to_vmem [thread:$0]  %s5457_s7, 16, %s111_s15, [#allocation19]  }
  0x4a   :  { %s4363_s3 = scalar_lea.hbm %s5450_s0, 1024 }
  0x4b   :  { %p4364_p4 = scmp.ne.s32.totalorder %s5450_s0, %s4363_s3  ;;  %p4367_p5 = scmp.lt.u32.totalorder %s4363_s3, %s5450_s0 }
  0x4d   :  { %p4369_p6 = pnand %p4367_p5, %p4364_p4 }
  0x4f   :  { %4372 = shalt.err (!%p4369_p6)
}
  0x50   :  { %s4373_s17 = scalar_lea.vmem %s28_s18, 1024  ;;  %p4378_p8 = scmp.lt.s32.totalorder %s28_s18, %s28_s18 }
  0x51   :  { %p4374_p7 = scmp.ne.s32.totalorder %s28_s18, %s4373_s17  ;;  %p4379_p9 = scmp.lt.s32.totalorder %s4373_s17, %s4373_s17 }
  0x53   :  { %p4380_p10 = por %p4379_p9, %p4378_p8 }
  0x55   :  { %p4381_p11 = pnand %p4380_p10, %p4374_p7 }
  0x57   :  { %4384 = shalt.err (!%p4381_p11)
}
  0x58   :  { %33 = dma.hbm_to_vmem [thread:$0]  %s5450_s0, 1024, %s28_s18, [#allocation7], %s4533_s25, %s4533_s25, %s4534_s26  }
  0x59   :  { %s4540_s1 = smov [#allocation11]   ;;  %s4541_s19 = smov [#allocation14]  }
  0x5a   :  { %s52_s14 = sshll.u32 %s4540_s1, 4  ;;  %s73_s21 = sshll.u32 %s4541_s19, 4  ;;  %s53_s14 = int_to_ptr.vmem [resolvable:$true] %s52_s14  ;;  %s74_s21 = int_to_ptr.vmem [resolvable:$true] %s73_s21 }
  0x5b   :  { %s4385_s24 = scalar_lea.hbm %s5452_s2, 16 }
  0x5c   :  { %p4386_p12 = scmp.ne.s32.totalorder %s5452_s2, %s4385_s24  ;;  %p4389_p13 = scmp.lt.u32.totalorder %s4385_s24, %s5452_s2 }
  0x5e   :  { %p4391_p0 = pnand %p4389_p13, %p4386_p12 }
  0x60   :  { %4394 = shalt.err (!%p4391_p0)
}
  0x61   :  { %s4395_s0 = scalar_lea.vmem %s53_s14, 16  ;;  %s4399_s18 = scalar_lea.vmem %s53_s14, 32 }
  0x62   :  { %p4396_p1 = scmp.ne.s32.totalorder %s53_s14, %s4395_s0  ;;  %p4400_p2 = scmp.lt.s32.totalorder %s53_s14, %s53_s14 }
  0x63   :  { %p4401_p3 = scmp.lt.s32.totalorder %s4399_s18, %s4395_s0 }
  0x65   :  { %p4402_p4 = por %p4401_p3, %p4400_p2 }
  0x67   :  { %p4403_p5 = pnand %p4402_p4, %p4396_p1 }
  0x69   :  { %4406 = shalt.err (!%p4403_p5)
}
  0x6a   :  { %55 = dma.hbm_to_vmem [thread:$0]  %s5452_s2, 16, %s53_s14, [#allocation10]  }
  0x6b   :  { %s4407_s11 = scalar_lea.hbm %s5454_s4, 512 }
  0x6c   :  { %p4408_p6 = scmp.ne.s32.totalorder %s5454_s4, %s4407_s11  ;;  %p4411_p7 = scmp.lt.u32.totalorder %s4407_s11, %s5454_s4 }
  0x6e   :  { %p4413_p8 = pnand %p4411_p7, %p4408_p6 }
  0x70   :  { %4416 = shalt.err (!%p4413_p8)
}
  0x71   :  { %s4417_s15 = scalar_lea.vmem %s74_s21, 512  ;;  %p4422_p10 = scmp.lt.s32.totalorder %s74_s21, %s74_s21 }
  0x72   :  { %p4418_p9 = scmp.ne.s32.totalorder %s74_s21, %s4417_s15  ;;  %p4423_p11 = scmp.lt.s32.totalorder %s4417_s15, %s4417_s15 }
  0x74   :  { %p4424_p12 = por %p4423_p11, %p4422_p10 }
  0x76   :  { %p4425_p13 = pnand %p4424_p12, %p4418_p9 }
  0x78   :  { %4428 = shalt.err (!%p4425_p13)
}
  0x79   :  { %79 = dma.hbm_to_vmem [thread:$0]  %s5454_s4, 512, %s74_s21, [#allocation13], %s4533_s25, %s4533_s25, %s4534_s26  }
  0x7a   :  { %s4542_s14 = smov [#allocation17]   ;;  %s4543_s22 = smov [#allocation20]  }
  0x7b   :  { %s97_s19 = sshll.u32 %s4542_s14, 4  ;;  %s119_s23 = sshll.u32 %s4543_s22, 4  ;;  %s98_s19 = int_to_ptr.vmem [resolvable:$true] %s97_s19  ;;  %s120_s23 = int_to_ptr.vmem [resolvable:$true] %s119_s23 }
  0x7c   :  { %s4429_s20 = scalar_lea.hbm %s5456_s6, 1024 }
  0x7d   :  { %p4430_p0 = scmp.ne.s32.totalorder %s5456_s6, %s4429_s20  ;;  %p4433_p1 = scmp.lt.u32.totalorder %s4429_s20, %s5456_s6 }
  0x7f   :  { %p4435_p2 = pnand %p4433_p1, %p4430_p0 }
  0x81   :  { %4438 = shalt.err (!%p4435_p2)
}
  0x82   :  { %s4439_s4 = scalar_lea.vmem %s98_s19, 1024  ;;  %p4444_p4 = scmp.lt.s32.totalorder %s98_s19, %s98_s19 }
  0x83   :  { %p4440_p3 = scmp.ne.s32.totalorder %s98_s19, %s4439_s4  ;;  %p4445_p5 = scmp.lt.s32.totalorder %s4439_s4, %s4439_s4 }
  0x85   :  { %p4446_p6 = por %p4445_p5, %p4444_p4 }
  0x87   :  { %p4447_p7 = pnand %p4446_p6, %p4440_p3 }
  0x89   :  { %4450 = shalt.err (!%p4447_p7)
}
  0x8a   :  { %103 = dma.hbm_to_vmem [thread:$0]  %s5456_s6, 1024, %s98_s19, [#allocation16], %s4533_s25, %s4533_s25, %s4534_s26  }
  0x8b   :  { %s4451_s16 = scalar_lea.hbm %s5458_s8, 1024 }
  0x8c   :  { %p4452_p8 = scmp.ne.s32.totalorder %s5458_s8, %s4451_s16  ;;  %p4455_p9 = scmp.lt.u32.totalorder %s4451_s16, %s5458_s8 }
  0x8e   :  { %p4457_p10 = pnand %p4455_p9, %p4452_p8 }
  0x90   :  { %4460 = shalt.err (!%p4457_p10)
}
  0x91   :  { %s4461_s7 = scalar_lea.vmem %s120_s23, 1024  ;;  %p4466_p12 = scmp.lt.s32.totalorder %s120_s23, %s120_s23 }
  0x92   :  { %p4462_p11 = scmp.ne.s32.totalorder %s120_s23, %s4461_s7  ;;  %p4467_p13 = scmp.lt.s32.totalorder %s4461_s7, %s4461_s7 }
  0x94   :  { %p4468_p0 = por %p4467_p13, %p4466_p12 }
  0x96   :  { %p4469_p1 = pnand %p4468_p0, %p4462_p11 }
  0x98   :  { %4472 = shalt.err (!%p4469_p1)
}
  0x99   :  { %125 = dma.hbm_to_vmem [thread:$0]  %s5458_s8, 1024, %s120_s23, [#allocation19], %s4533_s25, %s4533_s25, %s4534_s26  }
  0x9a   :  { %s4544_s2 = smov [#allocation21]   ;;  %s4473_s22 = scalar_lea.hbm %s5459_s9, 16 }
  0x9b   :  { %s132_s1 = sshll.u32 %s4544_s2, 4  ;;  %p4474_p2 = scmp.ne.s32.totalorder %s5459_s9, %s4473_s22  ;;  %s133_s1 = int_to_ptr.vmem [resolvable:$true] %s132_s1 }
  0x9c   :  { %p4477_p3 = scmp.lt.u32.totalorder %s4473_s22, %s5459_s9 }
  0x9e   :  { %p4479_p4 = pnand %p4477_p3, %p4474_p2 }
  0xa0   :  { %4482 = shalt.err (!%p4479_p4)
}
  0xa1   :  { %s4483_s28 = scalar_lea.vmem %s133_s1, 16  ;;  %s4487_s8 = scalar_lea.vmem %s133_s1, 32 }
  0xa2   :  { %p4484_p5 = scmp.ne.s32.totalorder %s133_s1, %s4483_s28  ;;  %p4488_p6 = scmp.lt.s32.totalorder %s133_s1, %s133_s1 }
  0xa3   :  { %p4489_p7 = scmp.lt.s32.totalorder %s4487_s8, %s4483_s28 }
  0xa5   :  { %p4490_p8 = por %p4489_p7, %p4488_p6 }
  0xa7   :  { %p4491_p9 = pnand %p4490_p8, %p4484_p5 }
  0xa9   :  { %4494 = shalt.err (!%p4491_p9)
}
  0xaa   :  { %135 = dma.hbm_to_vmem [thread:$0]  %s5459_s9, 16, %s133_s1, [#allocation22]  }
  0xab   :  { %4517 = dma.done.wait [#allocation7], 1024  }
  0xac   :  { %4518 = vsyncadd [#allocation7], 4294966272 }
  0xad   :  { %4519 = dma.done.wait [#allocation10], 1040  }
  0xae   :  { %4520 = vsyncadd [#allocation10], 4294966256 }
  0xaf   :  { %4521 = dma.done.wait [#allocation13], 2560  }
  0xb0   :  { %4522 = vsyncadd [#allocation13], 4294964736 }
  0xb1   :  { %4523 = dma.done.wait [#allocation16], 1056  }
  0xb2   :  { %4524 = vsyncadd [#allocation16], 4294966240 }
  0xb3   :  { %4525 = dma.done.wait [#allocation19], 1040  }
  0xb4   :  { %4526 = vsyncadd [#allocation19], 4294966256 }
  0xb5   :  { %4527 = dma.done.wait [#allocation22], 16  }
  0xb6   :  { %4528 = vsyncadd [#allocation22], 4294967280  ;;  %v4067_v0 = vld [vmem:[#allocation9] sm:$0xff]   ;;  %v4068_v1 = vld [vmem:[#allocation9 + $0x8] sm:$0xff]   ;;  %v4545_v16 = vmov 0.0   ;;  %vm614_vm0 = vcmask 261120  }
  0xb7   :  { %3757 = vmatprep.subr.bf16.mxu0 %v4067_v0  ;;  %v4069_v2 = vld [vmem:[#allocation9 + $0x10] sm:$0xff]   ;;  %v4070_v3 = vld [vmem:[#allocation9 + $0x18] sm:$0xff]   ;;  %v4075_v4 = vld [vmem:[#allocation6] sm:$0xff]   ;;  %615 = vst.msk [vmem:[#allocation4] sm:$0xff] %vm614_vm0, %v4545_v16  ;;  %vm4546_vm1 = vmmov 0   ;;  %s4547_s9 = smov 32  }
  0xb8   :  { %3758 = vmatpush3.bf16.msra.mxu0 %v4067_v0  ;;  %3773 = vmatprep.mubr.bf16.mxu0 %v4075_v4  ;;  %v4077_v5 = vld [vmem:[#allocation12] sm:$0xff]   ;;  %v4078_v6 = vld [vmem:[#allocation12 + $0x8] sm:$0xff]   ;;  %v4079_v8 = vld [vmem:[#allocation12 + $0x10] sm:$0xff]   ;;  %616 = vst.msk [vmem:[#allocation4 + $0x8] sm:$0xff] %vm614_vm0, %v4545_v16  ;;  %s4549_s0 = smov 96  }
  0xb9   :  { %3759 = vmatprep.subr.bf16.mxu0 %v4068_v1  ;;  %v4071_v7 = vld [vmem:[#allocation9 + $0x20] sm:$0xff]   ;;  %3789 = vmatprep.subr.bf16.mxu1 %v4077_v5  ;;  %v4072_v9 = vld [vmem:[#allocation9 + $0x28] sm:$0xff]   ;;  %v4073_v11 = vld [vmem:[#allocation9 + $0x30] sm:$0xff]   ;;  %617 = vst.msk [vmem:[#allocation5] sm:$0xff] %vm614_vm0, %v4545_v16 }
  0xba   :  { %3790 = vmatpush3.bf16.msra.mxu1 %v4077_v5  ;;  %v4083_v10 = vld [vmem:[#allocation12 + $0x18] sm:$0xff]   ;;  %v4076_v13 = vld [vmem:[#allocation6 + $0x8] sm:$0xff]   ;;  %v4080_v14 = vld [vmem:[#allocation6 + $0x10] sm:$0xff]   ;;  %618 = vst.msk [vmem:[#allocation5 + $0x8] sm:$0xff] %vm614_vm0, %v4545_v16 }
  0xbb   :  { %3791 = vmatprep.subr.bf16.mxu1 %v4078_v6  ;;  %v4074_v12 = vld [vmem:[#allocation9 + $0x38] sm:$0xff]   ;;  %v4081_v15 = vld [vmem:[#allocation14] sm:$0xff]   ;;  %v4087_v21 = vld [vmem:[#allocation12 + $0x28] sm:$0xff]  }
  0xbc   :  { %3760 = vmatpush3.bf16.msra.mxu0 %v4068_v1  ;;  %v4082_v17 = vld [vmem:[#allocation6 + $0x18] sm:$0xff]   ;;  %v4084_v18 = vld [vmem:[#allocation12 + $0x20] sm:$0xff]   ;;  %v4089_v23 = vld [vmem:[#allocation6 + $0x30] sm:$0xff]  }
  0xbd   :  { %3761 = vmatprep.subr.bf16.mxu0 %v4069_v2  ;;  %v4085_v19 = vld [vmem:[#allocation6 + $0x20] sm:$0xff]   ;;  %v4086_v20 = vld [vmem:[#allocation6 + $0x28] sm:$0xff]   ;;  %v4088_v22 = vld [vmem:[#allocation12 + $0x30] sm:$0xff]  }
  0xbe   :  { %3792 = vmatpush3.bf16.msra.mxu1 %v4078_v6  ;;  %v4091_v24 = vld [vmem:[#allocation6 + $0x38] sm:$0xff]   ;;  %v4090_v26 = vld [vmem:[#allocation14 + $0x8] sm:$0xff]   ;;  %v622_v27 = vld [vmem:[#allocation4] sm:$0xff] }
  0xbf   :  { %3793 = vmatprep.subr.bf16.mxu1 %v4079_v8  ;;  %v4092_v25 = vld [vmem:[#allocation12 + $0x38] sm:$0xff]   ;;  %v623_v28 = vld [vmem:[#allocation4 + $0x8] sm:$0xff] }
  0xc0   :  { %3762 = vmatpush3.bf16.msra.mxu0 %v4069_v2  ;;  %v693_v29 = vld [vmem:[#allocation5] sm:$0xff]  ;;  %v624_v30 = vpack.c.bf16 %v623_v28, %v622_v27  ;;  %v3528_v33 = vld [vmem:[#allocation11] ss:$0 sm:$0xff] }
  0xc1   :  { %3763 = vmatprep.subr.bf16.mxu0 %v4070_v3  ;;  %697 = vrot.lane.b32.xlu1 %v693_v29, %s4547_s9  ;;  %v694_v31 = vld [vmem:[#allocation5 + $0x8] sm:$0xff] }
  0xc2   :  { %3794 = vmatpush3.bf16.msra.mxu1 %v4079_v8 }
  0xc3   :  { %3795 = vmatprep.subr.bf16.mxu1 %v4083_v10 }
  0xc4   :  { %3764 = vmatpush3.bf16.msra.mxu0 %v4070_v3 }
  0xc5   :  { %3765 = vmatprep.subr.bf16.mxu0 %v4071_v7  ;;  %699 = vrot.lane.b32.xlu1 %v694_v31, %s4547_s9  ;;  %v4548_v31 = vmov 0.5  }
  0xc6   :  { %3796 = vmatpush3.bf16.msra.mxu1 %v4083_v10 }
  0xc7   :  { %3797 = vmatprep.subr.bf16.mxu1 %v4084_v18 }
  0xc8   :  { %3766 = vmatpush3.bf16.msra.mxu0 %v4071_v7 }
  0xc9   :  { %3767 = vmatprep.subr.bf16.mxu0 %v4072_v9 }
  0xca   :  { %3798 = vmatpush3.bf16.msra.mxu1 %v4084_v18 }
  0xcb   :  { %3799 = vmatprep.subr.bf16.mxu1 %v4087_v21 }
  0xcc   :  { %3768 = vmatpush3.bf16.msra.mxu0 %v4072_v9 }
  0xcd   :  { %3769 = vmatprep.subr.bf16.mxu0 %v4073_v11 }
  0xce   :  { %3800 = vmatpush3.bf16.msra.mxu1 %v4087_v21 }
  0xcf   :  { %3801 = vmatprep.subr.bf16.mxu1 %v4088_v22 }
  0xd0   :  { %3770 = vmatpush3.bf16.msra.mxu0 %v4073_v11 }
  0xd1   :  { %3771 = vmatprep.subr.bf16.mxu0 %v4074_v12 }
  0xd2   :  { %3802 = vmatpush3.bf16.msra.mxu1 %v4088_v22 }
  0xd3   :  { %3803 = vmatprep.subr.bf16.mxu1 %v4092_v25 }
  0xd4   :  { %3772 = vmatpush3.bf16.msra.mxu0 %v4074_v12 }
  0xd5   :  { %3821 = vmatprep.subr.bf16.mxu0 %v4545_v16 }
  0xd6   :  { %3804 = vmatpush3.bf16.msra.mxu1 %v4092_v25  ;;  %v415_v25 = vlaneseq }
  0xd7   :  { %3774 = vmatmul.mubr.bf16.vlgmr.msra.gmra.mrb[0].mxu0 %v4076_v13  ;;  %3829 = vmatprep.subr.bf16.mxu1 %v4545_v16 }
  0xd8   :  { %3777 = vmatprep.mubr.bf16.mxu0 %v4080_v14  ;;  %3822 = vmatpush3.bf16.msra.mxu0 %v4081_v15  ;;  %v3545_v14 = vld [vmem:[#allocation15] ss:$0 sm:$0xff] }
  0xd9   :  { %3823 = vmatprep.subr.bf16.mxu0 %v4545_v16 }
  0xdc   :  { %3824 = vmatpush3.bf16.msra.mxu0 %v4090_v26 }
  0xdd   :  { %3837 = vmatprep.subr.bf16.mxu0 %v4545_v16 }
  0xdf   :  { %3778 = vmatmul.mubr.bf16.gmra.mrb[4].mxu0 %v4082_v17 }
  0xe0   :  { %3781 = vmatprep.mubr.bf16.mxu0 %v4085_v19 }
  0xe7   :  { %3782 = vmatmul.mubr.bf16.gmra.mrb[8].mxu0 %v4086_v20 }
  0xe8   :  { %3785 = vmatprep.mubr.bf16.mxu0 %v4089_v23 }
  0xef   :  { %3786 = vmatmul.mubr.bf16.gmra.mrb[12].mxu0 %v4091_v24 }
  0xf0   :  { %3825 = vmatprep.mubr.msk.bf16.mxu0 %vm4546_vm1, %v4545_v16 }
  0xf7   :  { %3826 = vmatmul.mubr.msk.bf16.vlgmr.msra.gmra.mrb[16].mxu0 %vm614_vm0, %v624_v30  ;;  %v416_v30 = vand.u32 127, %v415_v25 }
  0xf8   :  { %3841 = vmatprep.mubr.msk.bf16.mxu0 %vm4546_vm1, %v4545_v16 }
  0xf9   :  { %vm417_vm2 = vcmp.ge.s32.totalorder %v416_v30, 64  ;;  %vm418_vm3 = vcmp.lt.s32.totalorder %v416_v30, 96 }
  0xfa   :  { %vm419_vm4 = vmand %vm417_vm2, %vm418_vm3 }
 0x1aa   :  { %v3775_v32 = vpop.f32.mrb[0].mxu0 }
 0x1ab   :  { %v336_v34 = vpop.f32.mrb[1].mxu0  ;;  %v345_v36 = vadd.f32 %v3775_v32, %v3528_v33  ;;  %v4776_v32 = vsel %vm419_vm4, 1.0, %v4548_v31 }
 0x1ac   :  { %v3776_v35 = vpop.f32.mrb[2].mxu0  ;;  %v337_v39 = vadd.f32 %v3528_v33, %v336_v34 }
 0x1ad   :  { %v348_v37 = vadd.f32 %v3776_v35, %v3528_v33  ;;  %v339_v38 = vpop.f32.mrb[3].mxu0 }
 0x1ae   :  { %v340_v40 = vadd.f32 %v3528_v33, %v339_v38 }
 0x1af   :  { %v400_v41 = vpack.c.bf16 %v348_v37, %v345_v36  ;;  %v4778_v37 = vsel %vm419_vm4, 0.0, %v4548_v31 }
 0x1b0   :  { %v399_v42 = vpack.c.bf16 %v340_v40, %v337_v39 }
 0x1b1   :  { %408 = vst [vmem:[#allocation2 + $0x8] sm:$0xff] %v400_v41 }
 0x1b2   :  { %407 = vst [vmem:[#allocation2] sm:$0xff] %v399_v42  ;;  %3805 = vmatprep.mubr.bf16.mxu1 %v399_v42  ;;  %v3779_v43 = vpop.f32.mrb[4].mxu0 }
 0x1b3   :  { %3806 = vmatmul.mubr.bf16.vlgmr.msra.gmra.mrb[0].mxu1 %v400_v41  ;;  %v361_v44 = vadd.f32 %v3779_v43, %v3528_v33  ;;  %v352_v45 = vpop.f32.mrb[5].mxu0 }
 0x1b4   :  { %v353_v46 = vadd.f32 %v3528_v33, %v352_v45  ;;  %v3780_v47 = vpop.f32.mrb[6].mxu0 }
 0x1b5   :  { %v364_v48 = vadd.f32 %v3780_v47, %v3528_v33  ;;  %v355_v49 = vpop.f32.mrb[7].mxu0 }
 0x1b6   :  { %v356_v50 = vadd.f32 %v3528_v33, %v355_v49 }
 0x1b7   :  { %v402_v51 = vpack.c.bf16 %v364_v48, %v361_v44 }
 0x1b8   :  { %v401_v52 = vpack.c.bf16 %v356_v50, %v353_v46 }
 0x1b9   :  { %410 = vst [vmem:[#allocation2 + $0x18] sm:$0xff] %v402_v51 }
 0x1ba   :  { %409 = vst [vmem:[#allocation2 + $0x10] sm:$0xff] %v401_v52  ;;  %3809 = vmatprep.mubr.bf16.mxu1 %v401_v52  ;;  %v3783_v53 = vpop.f32.mrb[8].mxu0 }
 0x1bb   :  { %3810 = vmatmul.mubr.bf16.gmra.mrb[4].mxu1 %v402_v51  ;;  %v377_v54 = vadd.f32 %v3783_v53, %v3528_v33  ;;  %v368_v55 = vpop.f32.mrb[9].mxu0 }
 0x1bc   :  { %v369_v56 = vadd.f32 %v3528_v33, %v368_v55  ;;  %v3784_v57 = vpop.f32.mrb[10].mxu0 }
 0x1bd   :  { %v380_v58 = vadd.f32 %v3784_v57, %v3528_v33  ;;  %v371_v59 = vpop.f32.mrb[11].mxu0 }
 0x1be   :  { %v372_v60 = vadd.f32 %v3528_v33, %v371_v59 }
 0x1bf   :  { %v404_v61 = vpack.c.bf16 %v380_v58, %v377_v54 }
 0x1c0   :  { %v403_v62 = vpack.c.bf16 %v372_v60, %v369_v56 }
 0x1c1   :  { %412 = vst [vmem:[#allocation2 + $0x28] sm:$0xff] %v404_v61 }
 0x1c2   :  { %411 = vst [vmem:[#allocation2 + $0x20] sm:$0xff] %v403_v62  ;;  %v3787_v63 = vpop.f32.mrb[12].mxu0  ;;  %3813 = vmatprep.mubr.bf16.mxu1 %v403_v62 }
 0x1c3   :  { %v393_v0 = vadd.f32 %v3787_v63, %v3528_v33  ;;  %v384_v1 = vpop.f32.mrb[13].mxu0  ;;  %3814 = vmatmul.mubr.bf16.gmra.mrb[8].mxu1 %v404_v61 }
 0x1c4   :  { %v385_v2 = vadd.f32 %v3528_v33, %v384_v1  ;;  %v3788_v3 = vpop.f32.mrb[14].mxu0 }
 0x1c5   :  { %v396_v4 = vadd.f32 %v3788_v3, %v3528_v33  ;;  %v387_v5 = vpop.f32.mrb[15].mxu0 }
 0x1c6   :  { %v388_v6 = vadd.f32 %v3528_v33, %v387_v5 }
 0x1c7   :  { %v406_v7 = vpack.c.bf16 %v396_v4, %v393_v0 }
 0x1c8   :  { %v405_v8 = vpack.c.bf16 %v388_v6, %v385_v2 }
 0x1c9   :  { %414 = vst [vmem:[#allocation2 + $0x38] sm:$0xff] %v406_v7 }
 0x1ca   :  { %413 = vst [vmem:[#allocation2 + $0x30] sm:$0xff] %v405_v8  ;;  %3817 = vmatprep.mubr.bf16.mxu1 %v405_v8  ;;  %v678_v9 = vpop.f32.mrb[16].mxu0 }
 0x1cb   :  { %3818 = vmatmul.mubr.bf16.gmra.mrb[12].mxu1 %v406_v7  ;;  %v3827_v10 = vpop.f32.mrb[17].mxu0 }
 0x1cc   :  { %3833 = vmatprep.mubr.msk.bf16.mxu1 %vm4546_vm1, %v4545_v16  ;;  %v681_v11 = vpop.f32.mrb[18].mxu0  ;;  %v698_v10 = vpop.permute.xlu1 %697 }
 0x1cd   :  { %v3828_v12 = vpop.f32.mrb[19].mxu0 }
 0x1d0   :  { %v700_v12 = vpop.permute.xlu1 %699 }
 0x286   :  { %v3807_v13 = vpop.f32.mrb[0].mxu1 }
 0x287   :  { %v535_v15 = vpop.f32.mrb[1].mxu1  ;;  %v544_v18 = vadd.f32 %v3807_v13, %v3545_v14 }
 0x288   :  { %v3808_v17 = vpop.f32.mrb[2].mxu1  ;;  %v536_v21 = vadd.f32 %v3545_v14, %v535_v15 }
 0x289   :  { %v547_v19 = vadd.f32 %v3808_v17, %v3545_v14  ;;  %v538_v20 = vpop.f32.mrb[3].mxu1 }
 0x28a   :  { %v539_v22 = vadd.f32 %v3545_v14, %v538_v20 }
 0x28b   :  { %v4774_v23 = vpack.c.bf16 %v547_v19, %v544_v18  ;;  %v4093_v19 = vld [vmem:[#allocation14] sm:$0xff]  }
 0x28c   :  { %v598_v24 = vpack.c.bf16 %v539_v22, %v536_v21  ;;  %3830 = vmatpush3.bf16.msra.mxu1 %v4093_v19  ;;  %v4094_v21 = vld [vmem:[#allocation14 + $0x8] sm:$0xff]  }
 0x28d   :  { %3831 = vmatprep.subr.bf16.mxu1 %v4545_v16 }
 0x28e   :  { %v620_v26 = vunpack.c.l.bf16 %v598_v24  ;;  %v621_v27 = vunpack.c.h.bf16 %v598_v24  ;;  %v3811_v33 = vpop.f32.mrb[4].mxu1 }
 0x28f   :  { %v560_v34 = vadd.f32 %v3811_v33, %v3545_v14  ;;  %v551_v35 = vpop.f32.mrb[5].mxu1 }
 0x290   :  { %v685_v28 = vadd.f32 %v678_v9, %v620_v26  ;;  %v686_v29 = vadd.f32 %v681_v11, %v621_v27  ;;  %v552_v38 = vadd.f32 %v3545_v14, %v551_v35  ;;  %v3812_v39 = vpop.f32.mrb[6].mxu1  ;;  %3832 = vmatpush3.bf16.msra.mxu1 %v4094_v21 }
 0x291   :  { %v563_v42 = vadd.f32 %v3812_v39, %v3545_v14  ;;  %v554_v43 = vpop.f32.mrb[7].mxu1  ;;  %3845 = vmatprep.subr.bf16.mxu1 %v4545_v16 }
 0x292   :  { %4147 = vtanh.f32 %v685_v28  ;;  %v555_v44 = vadd.f32 %v3545_v14, %v554_v43 }
 0x293   :  { %4149 = vtanh.f32 %v686_v29  ;;  %v4783_v47 = vpack.c.bf16 %v563_v42, %v560_v34  ;;  %v765_v42 = vunpack.c.h.bf16 %v4774_v23 }
 0x294   :  { %v4785_v48 = vpack.c.bf16 %v555_v44, %v552_v38  ;;  %v764_v38 = vunpack.c.l.bf16 %v4774_v23 }
 0x296   :  { %v3815_v50 = vpop.f32.mrb[8].mxu1 }
 0x297   :  { %v576_v51 = vadd.f32 %v3815_v50, %v3545_v14  ;;  %v567_v52 = vpop.f32.mrb[9].mxu1 }
 0x298   :  { %v568_v53 = vadd.f32 %v3545_v14, %v567_v52  ;;  %v3816_v54 = vpop.f32.mrb[10].mxu1 }
 0x299   :  { %v579_v55 = vadd.f32 %v3816_v54, %v3545_v14  ;;  %v570_v56 = vpop.f32.mrb[11].mxu1 }
 0x29a   :  { %v571_v57 = vadd.f32 %v3545_v14, %v570_v56 }
 0x29b   :  { %v4790_v58 = vpack.c.bf16 %v579_v55, %v576_v51 }
 0x29c   :  { %v4148_v36 = vpop.eup %4147  ;;  %v4792_v59 = vpack.c.bf16 %v571_v57, %v568_v53 }
 0x29d   :  { %v4150_v40 = vpop.eup %4149  ;;  %v689_v41 = vmul.f32 %v4148_v36, %v4776_v32 }
 0x29e   :  { %v690_v46 = vmul.f32 %v4150_v40, %v4776_v32  ;;  %v3819_v60 = vpop.f32.mrb[12].mxu1 }
 0x29f   :  { %v691_v45 = vadd.f32 %v689_v41, %v4778_v37  ;;  %v592_v61 = vadd.f32 %v3819_v60, %v3545_v14  ;;  %v583_v62 = vpop.f32.mrb[13].mxu1 }
 0x2a0   :  { %v692_v49 = vadd.f32 %v690_v46, %v4778_v37  ;;  %v584_v63 = vadd.f32 %v3545_v14, %v583_v62  ;;  %v3820_v0 = vpop.f32.mrb[14].mxu1 }
 0x2a1   :  { %707 = vrot.lane.b32.xlu0 %v691_v45, %s4533_s25  ;;  %v595_v1 = vadd.f32 %v3820_v0, %v3545_v14  ;;  %v586_v2 = vpop.f32.mrb[15].mxu1  ;;  %v703_v11 = vmul.f32 %v698_v10, %v691_v45  ;;  %v4096_v10 = vld [vmem:[#allocation14 + $0x8] sm:$0xff]  }
 0x2a2   :  { %v587_v3 = vadd.f32 %v3545_v14, %v586_v2  ;;  %v704_v17 = vmul.f32 %v700_v12, %v692_v49 }
 0x2a3   :  { %v4794_v4 = vpack.c.bf16 %v595_v1, %v592_v61 }
 0x2a4   :  { %v4796_v5 = vpack.c.bf16 %v587_v3, %v584_v63 }
 0x2a5   :  { %709 = vrot.lane.b32.xlu0 %v692_v49, %s4533_s25 }
 0x313   :  { %v708_v6 = vpop.permute.xlu0 %707 }
 0x314   :  { %v713_v7 = vmul.f32 %v708_v6, %v691_v45 }
 0x316   :  { %717 = vrot.lane.b32.xlu0 %v713_v7, %s4547_s9 }
 0x317   :  { %v710_v8 = vpop.permute.xlu0 %709 }
 0x318   :  { %v714_v9 = vmul.f32 %v710_v8, %v692_v49 }
 0x31a   :  { %719 = vrot.lane.b32.xlu1 %v714_v9, %s4547_s9  ;;  %v4095_v9 = vld [vmem:[#allocation14] sm:$0xff]  }
 0x31b   :  { %3838 = vmatpush3.bf16.msra.mxu0 %v4095_v9 }
 0x31c   :  { %3839 = vmatprep.subr.bf16.mxu0 %v4545_v16 }
 0x31f   :  { %3840 = vmatpush3.bf16.msra.mxu0 %v4096_v10 }
 0x320   :  { %3853 = vmatprep.subr.bf16.mxu0 %v4545_v16 }
 0x388   :  { %v718_v13 = vpop.permute.xlu0 %717 }
 0x389   :  { %v723_v15 = vadd.f32 %v718_v13, %v703_v11 }
 0x38b   :  { %4151 = vtanh.f32 %v723_v15 }
 0x38c   :  { %v720_v14 = vpop.permute.xlu1 %719 }
 0x38d   :  { %v724_v18 = vadd.f32 %v720_v14, %v704_v17 }
 0x38f   :  { %4153 = vtanh.f32 %v724_v18 }
 0x395   :  { %v4152_v20 = vpop.eup %4151 }
 0x396   :  { %729 = vrot.lane.b32.xlu0 %v4152_v20, %s4533_s25 }
 0x399   :  { %v4154_v22 = vpop.eup %4153 }
 0x39a   :  { %731 = vrot.lane.b32.xlu1 %v4154_v22, %s4533_s25 }
 0x408   :  { %v730_v24 = vpop.permute.xlu0 %729 }
 0x409   :  { %v4804_v25 = vmul.f32 %v730_v24, %v691_v45 }
 0x40b   :  { %749 = vrot.lane.b32.xlu0 %v4804_v25, %s4547_s9 }
 0x40c   :  { %v732_v26 = vpop.permute.xlu1 %731 }
 0x40d   :  { %v4808_v27 = vmul.f32 %v732_v26, %v692_v49  ;;  %v908_v26 = vunpack.c.l.bf16 %v4785_v48 }
 0x40f   :  { %v757_v28 = vpack.c.bf16 %v4808_v27, %v4804_v25  ;;  %751 = vrot.lane.b32.xlu1 %v4808_v27, %s4547_s9  ;;  %739 = vrot.lane.b32.xlu0 %v723_v15, %s4549_s0 }
 0x413   :  { %741 = vrot.lane.b32.xlu1 %v724_v18, %s4549_s0 }
 0x47d   :  { %v750_v29 = vpop.permute.xlu0 %749 }
 0x47e   :  { %755 = vst.msk [vmem:[#allocation4] sm:$0xff] %vm614_vm0, %v750_v29 }
 0x481   :  { %v752_v30 = vpop.permute.xlu1 %751  ;;  %v740_v31 = vpop.permute.xlu0 %739 }
 0x482   :  { %756 = vst.msk [vmem:[#allocation4 + $0x8] sm:$0xff] %vm614_vm0, %v752_v30  ;;  %745 = vst.msk [vmem:[#allocation5] sm:$0xff] %vm614_vm0, %v740_v31 }
 0x485   :  { %v742_v33 = vpop.permute.xlu1 %741  ;;  %v766_v34 = vld [vmem:[#allocation4] sm:$0xff] }
 0x486   :  { %746 = vst.msk [vmem:[#allocation5 + $0x8] sm:$0xff] %vm614_vm0, %v742_v33  ;;  %v909_v33 = vunpack.c.h.bf16 %v4785_v48 }
 0x489   :  { %v767_v35 = vld [vmem:[#allocation4 + $0x8] sm:$0xff]  ;;  %v837_v23 = vld [vmem:[#allocation5] sm:$0xff] }
 0x48a   :  { %v768_v36 = vpack.c.bf16 %v767_v35, %v766_v34 }
 0x48c   :  { %3834 = vmatmul.mubr.msk.bf16.vlgmr.msra.gmra.mrb[16].mxu1 %vm614_vm0, %v768_v36 }
 0x48d   :  { %3849 = vmatprep.mubr.msk.bf16.mxu1 %vm4546_vm1, %v4545_v16  ;;  %v838_v54 = vld [vmem:[#allocation5 + $0x8] sm:$0xff] }
 0x55f   :  { %v822_v39 = vpop.f32.mrb[16].mxu1 }
 0x560   :  { %v829_v40 = vadd.f32 %v822_v39, %v764_v38  ;;  %v3835_v41 = vpop.f32.mrb[17].mxu1 }
 0x561   :  { %v825_v43 = vpop.f32.mrb[18].mxu1 }
 0x562   :  { %4155 = vtanh.f32 %v829_v40  ;;  %v830_v44 = vadd.f32 %v825_v43, %v765_v42  ;;  %v3836_v45 = vpop.f32.mrb[19].mxu1 }
 0x564   :  { %4157 = vtanh.f32 %v830_v44 }
 0x56c   :  { %v4156_v46 = vpop.eup %4155 }
 0x56d   :  { %v833_v49 = vmul.f32 %v4156_v46, %v4776_v32 }
 0x56e   :  { %v4158_v50 = vpop.eup %4157 }
 0x56f   :  { %v835_v51 = vadd.f32 %v833_v49, %v4778_v37  ;;  %v834_v52 = vmul.f32 %v4158_v50, %v4776_v32 }
 0x571   :  { %851 = vrot.lane.b32.xlu0 %v835_v51, %s4533_s25  ;;  %v836_v53 = vadd.f32 %v834_v52, %v4778_v37 }
 0x573   :  { %853 = vrot.lane.b32.xlu1 %v836_v53, %s4533_s25 }
 0x575   :  { %841 = vrot.lane.b32.xlu0 %v837_v23, %s4547_s9 }
 0x577   :  { %843 = vrot.lane.b32.xlu1 %v838_v54, %s4547_s9 }
 0x5e3   :  { %v852_v55 = vpop.permute.xlu0 %851 }
 0x5e4   :  { %v857_v56 = vmul.f32 %v852_v55, %v835_v51 }
 0x5e5   :  { %v854_v57 = vpop.permute.xlu1 %853 }
 0x5e6   :  { %v858_v60 = vmul.f32 %v854_v57, %v836_v53  ;;  %861 = vrot.lane.b32.xlu0 %v857_v56, %s4547_s9 }
 0x5e7   :  { %v842_v61 = vpop.permute.xlu0 %841 }
 0x5e8   :  { %863 = vrot.lane.b32.xlu1 %v858_v60, %s4547_s9  ;;  %v847_v63 = vmul.f32 %v842_v61, %v835_v51 }
 0x5e9   :  { %v844_v62 = vpop.permute.xlu1 %843 }
 0x5ea   :  { %v848_v1 = vmul.f32 %v844_v62, %v836_v53  ;;  %v4097_v62 = vld [vmem:[#allocation14] sm:$0xff]  }
 0x5eb   :  { %3846 = vmatpush3.bf16.msra.mxu1 %v4097_v62 }
 0x5ec   :  { %3847 = vmatprep.subr.bf16.mxu1 %v4545_v16 }
 0x658   :  { %v862_v0 = vpop.permute.xlu0 %861 }
 0x659   :  { %v867_v2 = vadd.f32 %v862_v0, %v847_v63  ;;  %v4098_v63 = vld [vmem:[#allocation14 + $0x8] sm:$0xff]  }
 0x65a   :  { %v864_v3 = vpop.permute.xlu1 %863  ;;  %3848 = vmatpush3.bf16.msra.mxu1 %v4098_v63 }
 0x65b   :  { %4159 = vtanh.f32 %v867_v2  ;;  %v868_v6 = vadd.f32 %v864_v3, %v848_v1  ;;  %3861 = vmatprep.subr.bf16.mxu1 %v4545_v16 }
 0x65d   :  { %4161 = vtanh.f32 %v868_v6 }
 0x665   :  { %v4160_v7 = vpop.eup %4159 }
 0x666   :  { %873 = vrot.lane.b32.xlu0 %v4160_v7, %s4533_s25 }
 0x667   :  { %v4162_v8 = vpop.eup %4161 }
 0x668   :  { %875 = vrot.lane.b32.xlu1 %v4162_v8, %s4533_s25 }
 0x6d8   :  { %v874_v11 = vpop.permute.xlu0 %873 }
 0x6d9   :  { %v4838_v12 = vmul.f32 %v874_v11, %v835_v51 }
 0x6da   :  { %v876_v13 = vpop.permute.xlu1 %875 }
 0x6db   :  { %v4841_v15 = vmul.f32 %v876_v13, %v836_v53  ;;  %893 = vrot.lane.b32.xlu0 %v4838_v12, %s4547_s9 }
 0x6dd   :  { %v901_v17 = vpack.c.bf16 %v4841_v15, %v4838_v12  ;;  %895 = vrot.lane.b32.xlu1 %v4841_v15, %s4547_s9 }
 0x6df   :  { %883 = vrot.lane.b32.xlu0 %v867_v2, %s4549_s0 }
 0x6e1   :  { %885 = vrot.lane.b32.xlu1 %v868_v6, %s4549_s0 }
 0x74d   :  { %v894_v14 = vpop.permute.xlu0 %893 }
 0x74e   :  { %899 = vst.msk [vmem:[#allocation4] sm:$0xff] %vm614_vm0, %v894_v14 }
 0x74f   :  { %v896_v18 = vpop.permute.xlu1 %895 }
 0x750   :  { %900 = vst.msk [vmem:[#allocation4 + $0x8] sm:$0xff] %vm614_vm0, %v896_v18  ;;  %v1052_v18 = vunpack.c.l.bf16 %v4783_v47 }
 0x751   :  { %v884_v19 = vpop.permute.xlu0 %883 }
 0x752   :  { %889 = vst.msk [vmem:[#allocation5] sm:$0xff] %vm614_vm0, %v884_v19 }
 0x753   :  { %v886_v20 = vpop.permute.xlu1 %885 }
 0x754   :  { %890 = vst.msk [vmem:[#allocation5 + $0x8] sm:$0xff] %vm614_vm0, %v886_v20 }
 0x755   :  { %v910_v21 = vld [vmem:[#allocation4] sm:$0xff] }
 0x757   :  { %v911_v22 = vld [vmem:[#allocation4 + $0x8] sm:$0xff] }
 0x758   :  { %v912_v24 = vpack.c.bf16 %v911_v22, %v910_v21  ;;  %v1053_v22 = vunpack.c.h.bf16 %v4783_v47 }
 0x759   :  { %v981_v48 = vld [vmem:[#allocation5] sm:$0xff] }
 0x75a   :  { %3842 = vmatmul.mubr.msk.bf16.vlgmr.msra.gmra.mrb[20].mxu0 %vm614_vm0, %v912_v24 }
 0x75b   :  { %3857 = vmatprep.mubr.msk.bf16.mxu0 %vm4546_vm1, %v4545_v16  ;;  %v982_v44 = vld [vmem:[#allocation5 + $0x8] sm:$0xff] }
 0x82d   :  { %v966_v29 = vpop.f32.mrb[20].mxu0 }
 0x82e   :  { %v973_v30 = vadd.f32 %v966_v29, %v908_v26  ;;  %v3843_v31 = vpop.f32.mrb[21].mxu0 }
 0x82f   :  { %v969_v34 = vpop.f32.mrb[22].mxu0 }
 0x830   :  { %4163 = vtanh.f32 %v973_v30  ;;  %v974_v35 = vadd.f32 %v969_v34, %v909_v33  ;;  %v3844_v36 = vpop.f32.mrb[23].mxu0 }
 0x832   :  { %4165 = vtanh.f32 %v974_v35 }
 0x83a   :  { %v4164_v38 = vpop.eup %4163 }
 0x83b   :  { %v977_v39 = vmul.f32 %v4164_v38, %v4776_v32 }
 0x83c   :  { %v4166_v40 = vpop.eup %4165 }
 0x83d   :  { %v979_v41 = vadd.f32 %v977_v39, %v4778_v37  ;;  %v978_v42 = vmul.f32 %v4166_v40, %v4776_v32 }
 0x83f   :  { %995 = vrot.lane.b32.xlu0 %v979_v41, %s4533_s25  ;;  %v980_v43 = vadd.f32 %v978_v42, %v4778_v37 }
 0x841   :  { %997 = vrot.lane.b32.xlu1 %v980_v43, %s4533_s25 }
 0x843   :  { %985 = vrot.lane.b32.xlu0 %v981_v48, %s4547_s9 }
 0x845   :  { %987 = vrot.lane.b32.xlu1 %v982_v44, %s4547_s9 }
 0x8b1   :  { %v996_v45 = vpop.permute.xlu0 %995 }
 0x8b2   :  { %v1001_v46 = vmul.f32 %v996_v45, %v979_v41 }
 0x8b3   :  { %v998_v49 = vpop.permute.xlu1 %997 }
 0x8b4   :  { %v1002_v50 = vmul.f32 %v998_v49, %v980_v43  ;;  %1005 = vrot.lane.b32.xlu0 %v1001_v46, %s4547_s9 }
 0x8b5   :  { %v986_v51 = vpop.permute.xlu0 %985 }
 0x8b6   :  { %1007 = vrot.lane.b32.xlu1 %v1002_v50, %s4547_s9  ;;  %v991_v53 = vmul.f32 %v986_v51, %v979_v41 }
 0x8b7   :  { %v988_v52 = vpop.permute.xlu1 %987 }
 0x8b8   :  { %v992_v54 = vmul.f32 %v988_v52, %v980_v43 }
 0x926   :  { %v1006_v23 = vpop.permute.xlu0 %1005 }
 0x927   :  { %v1011_v55 = vadd.f32 %v1006_v23, %v991_v53  ;;  %v4099_v23 = vld [vmem:[#allocation14] sm:$0xff]  }
 0x928   :  { %v1008_v56 = vpop.permute.xlu1 %1007  ;;  %3854 = vmatpush3.bf16.msra.mxu0 %v4099_v23 }
 0x929   :  { %4167 = vtanh.f32 %v1011_v55  ;;  %v1012_v57 = vadd.f32 %v1008_v56, %v992_v54  ;;  %v4100_v54 = vld [vmem:[#allocation14 + $0x8] sm:$0xff]   ;;  %3855 = vmatprep.subr.bf16.mxu0 %v4545_v16 }
 0x92b   :  { %4169 = vtanh.f32 %v1012_v57 }
 0x92c   :  { %3856 = vmatpush3.bf16.msra.mxu0 %v4100_v54 }
 0x92d   :  { %3869 = vmatprep.subr.bf16.mxu0 %v4545_v16 }
 0x933   :  { %v4168_v60 = vpop.eup %4167 }
 0x934   :  { %1017 = vrot.lane.b32.xlu0 %v4168_v60, %s4533_s25 }
 0x935   :  { %v4170_v61 = vpop.eup %4169 }
 0x936   :  { %1019 = vrot.lane.b32.xlu1 %v4170_v61, %s4533_s25 }
 0x9a6   :  { %v1018_v0 = vpop.permute.xlu0 %1017 }
 0x9a7   :  { %v4873_v1 = vmul.f32 %v1018_v0, %v979_v41 }
 0x9a8   :  { %v1020_v2 = vpop.permute.xlu1 %1019 }
 0x9a9   :  { %v4876_v3 = vmul.f32 %v1020_v2, %v980_v43  ;;  %1037 = vrot.lane.b32.xlu0 %v4873_v1, %s4547_s9 }
 0x9ab   :  { %v1045_v6 = vpack.c.bf16 %v4876_v3, %v4873_v1  ;;  %1039 = vrot.lane.b32.xlu1 %v4876_v3, %s4547_s9 }
 0x9ad   :  { %1027 = vrot.lane.b32.xlu0 %v1011_v55, %s4549_s0 }
 0x9af   :  { %1029 = vrot.lane.b32.xlu1 %v1012_v57, %s4549_s0 }
 0xa1b   :  { %v1038_v7 = vpop.permute.xlu0 %1037 }
 0xa1c   :  { %1043 = vst.msk [vmem:[#allocation4] sm:$0xff] %vm614_vm0, %v1038_v7 }
 0xa1d   :  { %v1040_v8 = vpop.permute.xlu1 %1039 }
 0xa1e   :  { %1044 = vst.msk [vmem:[#allocation4 + $0x8] sm:$0xff] %vm614_vm0, %v1040_v8 }
 0xa1f   :  { %v1028_v9 = vpop.permute.xlu0 %1027 }
 0xa20   :  { %1033 = vst.msk [vmem:[#allocation5] sm:$0xff] %vm614_vm0, %v1028_v9 }
 0xa21   :  { %v1030_v10 = vpop.permute.xlu1 %1029 }
 0xa22   :  { %1034 = vst.msk [vmem:[#allocation5 + $0x8] sm:$0xff] %vm614_vm0, %v1030_v10  ;;  %v1196_v10 = vunpack.c.l.bf16 %v4792_v59 }
 0xa23   :  { %v1054_v11 = vld [vmem:[#allocation4] sm:$0xff] }
 0xa25   :  { %v1055_v13 = vld [vmem:[#allocation4 + $0x8] sm:$0xff] }
 0xa26   :  { %v1056_v14 = vpack.c.bf16 %v1055_v13, %v1054_v11 }
 0xa27   :  { %v1125_v47 = vld [vmem:[#allocation5] sm:$0xff] }
 0xa28   :  { %3850 = vmatmul.mubr.msk.bf16.vlgmr.msra.gmra.mrb[20].mxu1 %vm614_vm0, %v1056_v14 }
 0xa29   :  { %3865 = vmatprep.mubr.msk.bf16.mxu1 %vm4546_vm1, %v4545_v16  ;;  %v1126_v38 = vld [vmem:[#allocation5 + $0x8] sm:$0xff] }
 0xafb   :  { %v1110_v19 = vpop.f32.mrb[20].mxu1 }
 0xafc   :  { %v1117_v20 = vadd.f32 %v1110_v19, %v1052_v18  ;;  %v3851_v21 = vpop.f32.mrb[21].mxu1  ;;  %v1197_v18 = vunpack.c.h.bf16 %v4792_v59 }
 0xafd   :  { %v1113_v24 = vpop.f32.mrb[22].mxu1 }
 0xafe   :  { %4171 = vtanh.f32 %v1117_v20  ;;  %v1118_v26 = vadd.f32 %v1113_v24, %v1053_v22  ;;  %v3852_v29 = vpop.f32.mrb[23].mxu1 }
 0xb00   :  { %4173 = vtanh.f32 %v1118_v26 }
 0xb08   :  { %v4172_v30 = vpop.eup %4171 }
 0xb09   :  { %v1121_v31 = vmul.f32 %v4172_v30, %v4776_v32 }
 0xb0a   :  { %v4174_v33 = vpop.eup %4173 }
 0xb0b   :  { %v1123_v34 = vadd.f32 %v1121_v31, %v4778_v37  ;;  %v1122_v35 = vmul.f32 %v4174_v33, %v4776_v32 }
 0xb0d   :  { %1139 = vrot.lane.b32.xlu0 %v1123_v34, %s4533_s25  ;;  %v1124_v36 = vadd.f32 %v1122_v35, %v4778_v37 }
 0xb0f   :  { %1141 = vrot.lane.b32.xlu1 %v1124_v36, %s4533_s25 }
 0xb11   :  { %1129 = vrot.lane.b32.xlu0 %v1125_v47, %s4547_s9 }
 0xb13   :  { %1131 = vrot.lane.b32.xlu1 %v1126_v38, %s4547_s9 }
 0xb7f   :  { %v1140_v39 = vpop.permute.xlu0 %1139 }
 0xb80   :  { %v1145_v40 = vmul.f32 %v1140_v39, %v1123_v34 }
 0xb81   :  { %v1142_v41 = vpop.permute.xlu1 %1141 }
 0xb82   :  { %v1146_v42 = vmul.f32 %v1142_v41, %v1124_v36  ;;  %1149 = vrot.lane.b32.xlu0 %v1145_v40, %s4547_s9 }
 0xb83   :  { %v1130_v43 = vpop.permute.xlu0 %1129 }
 0xb84   :  { %1151 = vrot.lane.b32.xlu1 %v1146_v42, %s4547_s9  ;;  %v1135_v44 = vmul.f32 %v1130_v43, %v1123_v34 }
 0xb85   :  { %v1132_v48 = vpop.permute.xlu1 %1131 }
 0xb86   :  { %v1136_v46 = vmul.f32 %v1132_v48, %v1124_v36 }
 0xbf4   :  { %v1150_v45 = vpop.permute.xlu0 %1149 }
 0xbf5   :  { %v1155_v49 = vadd.f32 %v1150_v45, %v1135_v44 }
 0xbf6   :  { %v1152_v50 = vpop.permute.xlu1 %1151 }
 0xbf7   :  { %4175 = vtanh.f32 %v1155_v49  ;;  %v1156_v51 = vadd.f32 %v1152_v50, %v1136_v46  ;;  %v4102_v50 = vld [vmem:[#allocation14 + $0x8] sm:$0xff]  }
 0xbf9   :  { %4177 = vtanh.f32 %v1156_v51 }
 0xc01   :  { %v4176_v52 = vpop.eup %4175 }
 0xc02   :  { %1161 = vrot.lane.b32.xlu0 %v4176_v52, %s4533_s25 }
 0xc03   :  { %v4178_v53 = vpop.eup %4177 }
 0xc04   :  { %1163 = vrot.lane.b32.xlu1 %v4178_v53, %s4533_s25 }
 0xc74   :  { %v1162_v55 = vpop.permute.xlu0 %1161 }
 0xc75   :  { %v4908_v56 = vmul.f32 %v1162_v55, %v1123_v34 }
 0xc76   :  { %v1164_v57 = vpop.permute.xlu1 %1163 }
 0xc77   :  { %v4911_v60 = vmul.f32 %v1164_v57, %v1124_v36  ;;  %1181 = vrot.lane.b32.xlu0 %v4908_v56, %s4547_s9 }
 0xc79   :  { %v1189_v61 = vpack.c.bf16 %v4911_v60, %v4908_v56  ;;  %1183 = vrot.lane.b32.xlu1 %v4911_v60, %s4547_s9 }
 0xc7b   :  { %1171 = vrot.lane.b32.xlu0 %v1155_v49, %s4549_s0  ;;  %v4101_v49 = vld [vmem:[#allocation14] sm:$0xff]  }
 0xc7c   :  { %3862 = vmatpush3.bf16.msra.mxu1 %v4101_v49 }
 0xc7d   :  { %1173 = vrot.lane.b32.xlu1 %v1156_v51, %s4549_s0  ;;  %3863 = vmatprep.subr.bf16.mxu1 %v4545_v16 }
 0xc80   :  { %3864 = vmatpush3.bf16.msra.mxu1 %v4102_v50 }
 0xc81   :  { %3877 = vmatprep.subr.bf16.mxu1 %v4545_v16 }
 0xce9   :  { %v1182_v62 = vpop.permute.xlu0 %1181 }
 0xcea   :  { %1187 = vst.msk [vmem:[#allocation4] sm:$0xff] %vm614_vm0, %v1182_v62 }
 0xceb   :  { %v1184_v63 = vpop.permute.xlu1 %1183 }
 0xcec   :  { %1188 = vst.msk [vmem:[#allocation4 + $0x8] sm:$0xff] %vm614_vm0, %v1184_v63 }
 0xced   :  { %v1172_v0 = vpop.permute.xlu0 %1171 }
 0xcee   :  { %1177 = vst.msk [vmem:[#allocation5] sm:$0xff] %vm614_vm0, %v1172_v0 }
 0xcef   :  { %v1174_v2 = vpop.permute.xlu1 %1173 }
 0xcf0   :  { %1178 = vst.msk [vmem:[#allocation5 + $0x8] sm:$0xff] %vm614_vm0, %v1174_v2 }
 0xcf1   :  { %v1198_v7 = vld [vmem:[#allocation4] sm:$0xff] }
 0xcf3   :  { %v1199_v8 = vld [vmem:[#allocation4 + $0x8] sm:$0xff] }
 0xcf4   :  { %v1200_v9 = vpack.c.bf16 %v1199_v8, %v1198_v7  ;;  %v1340_v8 = vunpack.c.l.bf16 %v4790_v58 }
 0xcf5   :  { %v1269_v59 = vld [vmem:[#allocation5] sm:$0xff] }
 0xcf6   :  { %3858 = vmatmul.mubr.msk.bf16.vlgmr.msra.gmra.mrb[24].mxu0 %vm614_vm0, %v1200_v9 }
 0xcf7   :  { %3873 = vmatprep.mubr.msk.bf16.mxu0 %vm4546_vm1, %v4545_v16  ;;  %v1270_v33 = vld [vmem:[#allocation5 + $0x8] sm:$0xff] }
 0xdc9   :  { %v1254_v11 = vpop.f32.mrb[24].mxu0 }
 0xdca   :  { %v1261_v13 = vadd.f32 %v1254_v11, %v1196_v10  ;;  %v3859_v14 = vpop.f32.mrb[25].mxu0 }
 0xdcb   :  { %v1257_v19 = vpop.f32.mrb[26].mxu0 }
 0xdcc   :  { %4179 = vtanh.f32 %v1261_v13  ;;  %v1262_v20 = vadd.f32 %v1257_v19, %v1197_v18  ;;  %v3860_v21 = vpop.f32.mrb[27].mxu0  ;;  %v1341_v13 = vunpack.c.h.bf16 %v4790_v58 }
 0xdce   :  { %4181 = vtanh.f32 %v1262_v20 }
 0xdd6   :  { %v4180_v22 = vpop.eup %4179 }
 0xdd7   :  { %v1265_v24 = vmul.f32 %v4180_v22, %v4776_v32 }
 0xdd8   :  { %v4182_v26 = vpop.eup %4181 }
 0xdd9   :  { %v1267_v29 = vadd.f32 %v1265_v24, %v4778_v37  ;;  %v1266_v30 = vmul.f32 %v4182_v26, %v4776_v32 }
 0xddb   :  { %1283 = vrot.lane.b32.xlu0 %v1267_v29, %s4533_s25  ;;  %v1268_v31 = vadd.f32 %v1266_v30, %v4778_v37 }
 0xddd   :  { %1285 = vrot.lane.b32.xlu1 %v1268_v31, %s4533_s25 }
 0xddf   :  { %1273 = vrot.lane.b32.xlu0 %v1269_v59, %s4547_s9 }
 0xde1   :  { %1275 = vrot.lane.b32.xlu1 %v1270_v33, %s4547_s9 }
 0xe4d   :  { %v1284_v34 = vpop.permute.xlu0 %1283 }
 0xe4e   :  { %v1289_v35 = vmul.f32 %v1284_v34, %v1267_v29 }
 0xe4f   :  { %v1286_v36 = vpop.permute.xlu1 %1285 }
 0xe50   :  { %v1290_v47 = vmul.f32 %v1286_v36, %v1268_v31  ;;  %1293 = vrot.lane.b32.xlu0 %v1289_v35, %s4547_s9 }
 0xe51   :  { %v1274_v38 = vpop.permute.xlu0 %1273 }
 0xe52   :  { %1295 = vrot.lane.b32.xlu1 %v1290_v47, %s4547_s9  ;;  %v1279_v40 = vmul.f32 %v1274_v38, %v1267_v29 }
 0xe53   :  { %v1276_v39 = vpop.permute.xlu1 %1275 }
 0xe54   :  { %v1280_v42 = vmul.f32 %v1276_v39, %v1268_v31 }
 0xec2   :  { %v1294_v41 = vpop.permute.xlu0 %1293 }
 0xec3   :  { %v1299_v43 = vadd.f32 %v1294_v41, %v1279_v40 }
 0xec4   :  { %v1296_v48 = vpop.permute.xlu1 %1295 }
 0xec5   :  { %4183 = vtanh.f32 %v1299_v43  ;;  %v1300_v44 = vadd.f32 %v1296_v48, %v1280_v42 }
 0xec7   :  { %4185 = vtanh.f32 %v1300_v44 }
 0xecf   :  { %v4184_v45 = vpop.eup %4183 }
 0xed0   :  { %1305 = vrot.lane.b32.xlu0 %v4184_v45, %s4533_s25  ;;  %v4104_v45 = vld [vmem:[#allocation14 + $0x8] sm:$0xff]  }
 0xed1   :  { %v4186_v46 = vpop.eup %4185 }
 0xed2   :  { %1307 = vrot.lane.b32.xlu1 %v4186_v46, %s4533_s25 }
 0xf42   :  { %v1306_v51 = vpop.permute.xlu0 %1305 }
 0xf43   :  { %v4943_v52 = vmul.f32 %v1306_v51, %v1267_v29 }
 0xf44   :  { %v1308_v53 = vpop.permute.xlu1 %1307 }
 0xf45   :  { %v4946_v23 = vmul.f32 %v1308_v53, %v1268_v31  ;;  %1325 = vrot.lane.b32.xlu0 %v4943_v52, %s4547_s9 }
 0xf47   :  { %v1333_v54 = vpack.c.bf16 %v4946_v23, %v4943_v52  ;;  %1327 = vrot.lane.b32.xlu1 %v4946_v23, %s4547_s9 }
 0xf49   :  { %1315 = vrot.lane.b32.xlu0 %v1299_v43, %s4549_s0 }
 0xf4b   :  { %1317 = vrot.lane.b32.xlu1 %v1300_v44, %s4549_s0  ;;  %v4103_v44 = vld [vmem:[#allocation14] sm:$0xff]  }
 0xf4c   :  { %3870 = vmatpush3.bf16.msra.mxu0 %v4103_v44  ;;  %v4106_v44 = vld [vmem:[#allocation14 + $0x8] sm:$0xff]  }
 0xf4d   :  { %3871 = vmatprep.subr.bf16.mxu0 %v4545_v16 }
 0xf50   :  { %3872 = vmatpush3.bf16.msra.mxu0 %v4104_v45 }
 0xfb7   :  { %v1326_v55 = vpop.permute.xlu0 %1325 }
 0xfb8   :  { %1331 = vst.msk [vmem:[#allocation4] sm:$0xff] %vm614_vm0, %v1326_v55 }
 0xfb9   :  { %v1328_v57 = vpop.permute.xlu1 %1327 }
 0xfba   :  { %1332 = vst.msk [vmem:[#allocation4 + $0x8] sm:$0xff] %vm614_vm0, %v1328_v57 }
 0xfbb   :  { %v1316_v62 = vpop.permute.xlu0 %1315 }
 0xfbc   :  { %1321 = vst.msk [vmem:[#allocation5] sm:$0xff] %vm614_vm0, %v1316_v62 }
 0xfbd   :  { %v1318_v63 = vpop.permute.xlu1 %1317 }
 0xfbe   :  { %1322 = vst.msk [vmem:[#allocation5 + $0x8] sm:$0xff] %vm614_vm0, %v1318_v63 }
 0xfbf   :  { %v1342_v0 = vld [vmem:[#allocation4] sm:$0xff] }
 0xfc1   :  { %v1343_v2 = vld [vmem:[#allocation4 + $0x8] sm:$0xff] }
 0xfc2   :  { %v1344_v7 = vpack.c.bf16 %v1343_v2, %v1342_v0 }
 0xfc3   :  { %v1413_v58 = vld [vmem:[#allocation5] sm:$0xff] }
 0xfc4   :  { %3866 = vmatmul.mubr.msk.bf16.vlgmr.msra.gmra.mrb[24].mxu1 %vm614_vm0, %v1344_v7 }
 0xfc5   :  { %3881 = vmatprep.mubr.msk.bf16.mxu1 %vm4546_vm1, %v4545_v16  ;;  %v1414_v30 = vld [vmem:[#allocation5 + $0x8] sm:$0xff] }
0x1097   :  { %v1398_v9 = vpop.f32.mrb[24].mxu1 }
0x1098   :  { %v1405_v10 = vadd.f32 %v1398_v9, %v1340_v8  ;;  %v3867_v11 = vpop.f32.mrb[25].mxu1  ;;  %v1484_v8 = vunpack.c.l.bf16 %v4796_v5 }
0x1099   :  { %v1401_v14 = vpop.f32.mrb[26].mxu1 }
0x109a   :  { %4187 = vtanh.f32 %v1405_v10  ;;  %v1406_v18 = vadd.f32 %v1401_v14, %v1341_v13  ;;  %v3868_v19 = vpop.f32.mrb[27].mxu1  ;;  %v1485_v13 = vunpack.c.h.bf16 %v4796_v5 }
0x109c   :  { %4189 = vtanh.f32 %v1406_v18 }
0x10a4   :  { %v4188_v20 = vpop.eup %4187 }
0x10a5   :  { %v1409_v21 = vmul.f32 %v4188_v20, %v4776_v32 }
0x10a6   :  { %v4190_v22 = vpop.eup %4189 }
0x10a7   :  { %v1411_v24 = vadd.f32 %v1409_v21, %v4778_v37  ;;  %v1410_v26 = vmul.f32 %v4190_v22, %v4776_v32 }
0x10a9   :  { %1427 = vrot.lane.b32.xlu0 %v1411_v24, %s4533_s25  ;;  %v1412_v29 = vadd.f32 %v1410_v26, %v4778_v37 }
0x10ab   :  { %1429 = vrot.lane.b32.xlu1 %v1412_v29, %s4533_s25 }
0x10ad   :  { %1417 = vrot.lane.b32.xlu0 %v1413_v58, %s4547_s9 }
0x10af   :  { %1419 = vrot.lane.b32.xlu1 %v1414_v30, %s4547_s9 }
0x111b   :  { %v1428_v31 = vpop.permute.xlu0 %1427 }
0x111c   :  { %v1433_v59 = vmul.f32 %v1428_v31, %v1411_v24 }
0x111d   :  { %v1430_v33 = vpop.permute.xlu1 %1429 }
0x111e   :  { %v1434_v34 = vmul.f32 %v1430_v33, %v1412_v29  ;;  %1437 = vrot.lane.b32.xlu0 %v1433_v59, %s4547_s9 }
0x111f   :  { %v1418_v35 = vpop.permute.xlu0 %1417 }
0x1120   :  { %1439 = vrot.lane.b32.xlu1 %v1434_v34, %s4547_s9  ;;  %v1423_v47 = vmul.f32 %v1418_v35, %v1411_v24 }
0x1121   :  { %v1420_v36 = vpop.permute.xlu1 %1419 }
0x1122   :  { %v1424_v39 = vmul.f32 %v1420_v36, %v1412_v29 }
0x1190   :  { %v1438_v38 = vpop.permute.xlu0 %1437 }
0x1191   :  { %v1443_v40 = vadd.f32 %v1438_v38, %v1423_v47 }
0x1192   :  { %v1440_v41 = vpop.permute.xlu1 %1439 }
0x1193   :  { %4191 = vtanh.f32 %v1443_v40  ;;  %v1444_v42 = vadd.f32 %v1440_v41, %v1424_v39 }
0x1195   :  { %4193 = vtanh.f32 %v1444_v42 }
0x119d   :  { %v4192_v43 = vpop.eup %4191 }
0x119e   :  { %1449 = vrot.lane.b32.xlu0 %v4192_v43, %s4533_s25 }
0x119f   :  { %v4194_v48 = vpop.eup %4193 }
0x11a0   :  { %1451 = vrot.lane.b32.xlu1 %v4194_v48, %s4533_s25  ;;  %v4105_v48 = vld [vmem:[#allocation14] sm:$0xff]  }
0x11a1   :  { %3878 = vmatpush3.bf16.msra.mxu1 %v4105_v48 }
0x11a2   :  { %3879 = vmatprep.subr.bf16.mxu1 %v4545_v16 }
0x11a5   :  { %3880 = vmatpush3.bf16.msra.mxu1 %v4106_v44 }
0x11a6   :  { %3917 = vmatprep.subr.bf16.mxu1 %v4545_v16 }
0x1210   :  { %v1450_v46 = vpop.permute.xlu0 %1449 }
0x1211   :  { %v4978_v49 = vmul.f32 %v1450_v46, %v1411_v24 }
0x1212   :  { %v1452_v50 = vpop.permute.xlu1 %1451 }
0x1213   :  { %v4980_v51 = vmul.f32 %v1452_v50, %v1412_v29  ;;  %1469 = vrot.lane.b32.xlu0 %v4978_v49, %s4547_s9 }
0x1215   :  { %v1477_v53 = vpack.c.bf16 %v4980_v51, %v4978_v49  ;;  %1471 = vrot.lane.b32.xlu1 %v4980_v51, %s4547_s9 }
0x1217   :  { %1459 = vrot.lane.b32.xlu0 %v1443_v40, %s4549_s0 }
0x1219   :  { %1461 = vrot.lane.b32.xlu1 %v1444_v42, %s4549_s0 }
0x1285   :  { %v1470_v55 = vpop.permute.xlu0 %1469 }
0x1286   :  { %1475 = vst.msk [vmem:[#allocation4] sm:$0xff] %vm614_vm0, %v1470_v55 }
0x1287   :  { %v1472_v57 = vpop.permute.xlu1 %1471 }
0x1288   :  { %1476 = vst.msk [vmem:[#allocation4 + $0x8] sm:$0xff] %vm614_vm0, %v1472_v57 }
0x1289   :  { %v1460_v62 = vpop.permute.xlu0 %1459 }
0x128a   :  { %1465 = vst.msk [vmem:[#allocation5] sm:$0xff] %vm614_vm0, %v1460_v62 }
0x128b   :  { %v1462_v63 = vpop.permute.xlu1 %1461 }
0x128c   :  { %1466 = vst.msk [vmem:[#allocation5 + $0x8] sm:$0xff] %vm614_vm0, %v1462_v63 }
0x128d   :  { %v1486_v0 = vld [vmem:[#allocation4] sm:$0xff] }
0x128f   :  { %v1487_v2 = vld [vmem:[#allocation4 + $0x8] sm:$0xff] }
0x1290   :  { %v1488_v7 = vpack.c.bf16 %v1487_v2, %v1486_v0 }
0x1291   :  { %v1557_v5 = vld [vmem:[#allocation5] sm:$0xff] }
0x1292   :  { %3874 = vmatmul.mubr.msk.bf16.vlgmr.msra.gmra.mrb[28].mxu0 %vm614_vm0, %v1488_v7 }
0x1293   :  { %v1558_v58 = vld [vmem:[#allocation5 + $0x8] sm:$0xff] }
0x1365   :  { %v1542_v9 = vpop.f32.mrb[28].mxu0 }
0x1366   :  { %v1549_v10 = vadd.f32 %v1542_v9, %v1484_v8  ;;  %v3875_v11 = vpop.f32.mrb[29].mxu0 }
0x1367   :  { %v1545_v14 = vpop.f32.mrb[30].mxu0 }
0x1368   :  { %4195 = vtanh.f32 %v1549_v10  ;;  %v1550_v18 = vadd.f32 %v1545_v14, %v1485_v13  ;;  %v3876_v19 = vpop.f32.mrb[31].mxu0  ;;  %v1628_v10 = vunpack.c.l.bf16 %v4794_v4 }
0x136a   :  { %4197 = vtanh.f32 %v1550_v18  ;;  %v1629_v18 = vunpack.c.h.bf16 %v4794_v4 }
0x1372   :  { %v4196_v20 = vpop.eup %4195 }
0x1373   :  { %v1553_v21 = vmul.f32 %v4196_v20, %v4776_v32 }
0x1374   :  { %v4198_v22 = vpop.eup %4197 }
0x1375   :  { %v1555_v24 = vadd.f32 %v1553_v21, %v4778_v37  ;;  %v1554_v26 = vmul.f32 %v4198_v22, %v4776_v32 }
0x1377   :  { %1571 = vrot.lane.b32.xlu0 %v1555_v24, %s4533_s25  ;;  %v1556_v29 = vadd.f32 %v1554_v26, %v4778_v37 }
0x1379   :  { %1573 = vrot.lane.b32.xlu1 %v1556_v29, %s4533_s25 }
0x137b   :  { %1561 = vrot.lane.b32.xlu0 %v1557_v5, %s4547_s9 }
0x137d   :  { %1563 = vrot.lane.b32.xlu1 %v1558_v58, %s4547_s9 }
0x13e9   :  { %v1572_v30 = vpop.permute.xlu0 %1571 }
0x13ea   :  { %v1577_v31 = vmul.f32 %v1572_v30, %v1555_v24 }
0x13eb   :  { %v1574_v59 = vpop.permute.xlu1 %1573 }
0x13ec   :  { %v1578_v33 = vmul.f32 %v1574_v59, %v1556_v29  ;;  %1581 = vrot.lane.b32.xlu0 %v1577_v31, %s4547_s9 }
0x13ed   :  { %v1562_v34 = vpop.permute.xlu0 %1561 }
0x13ee   :  { %1583 = vrot.lane.b32.xlu1 %v1578_v33, %s4547_s9  ;;  %v1567_v36 = vmul.f32 %v1562_v34, %v1555_v24 }
0x13ef   :  { %v1564_v35 = vpop.permute.xlu1 %1563 }
0x13f0   :  { %v1568_v38 = vmul.f32 %v1564_v35, %v1556_v29  ;;  %v4107_v35 = vld [vmem:[#allocation12 + $0x40] sm:$0xff]  }
0x13f1   :  { %3885 = vmatprep.subr.bf16.mxu0 %v4107_v35 }
0x13f2   :  { %3886 = vmatpush3.bf16.msra.mxu0 %v4107_v35 }
0x145e   :  { %v1582_v47 = vpop.permute.xlu0 %1581 }
0x145f   :  { %v1587_v39 = vadd.f32 %v1582_v47, %v1567_v36  ;;  %v4108_v36 = vld [vmem:[#allocation12 + $0x48] sm:$0xff]   ;;  %v4109_v47 = vld [vmem:[#allocation12 + $0x50] sm:$0xff]  }
0x1460   :  { %v1584_v40 = vpop.permute.xlu1 %1583  ;;  %3887 = vmatprep.subr.bf16.mxu0 %v4108_v36 }
0x1461   :  { %4199 = vtanh.f32 %v1587_v39  ;;  %v1588_v41 = vadd.f32 %v1584_v40, %v1568_v38  ;;  %3888 = vmatpush3.bf16.msra.mxu0 %v4108_v36  ;;  %v4110_v38 = vld [vmem:[#allocation12 + $0x58] sm:$0xff]  }
0x1462   :  { %3889 = vmatprep.subr.bf16.mxu0 %v4109_v47 }
0x1463   :  { %4201 = vtanh.f32 %v1588_v41 }
0x1465   :  { %3890 = vmatpush3.bf16.msra.mxu0 %v4109_v47 }
0x1466   :  { %3891 = vmatprep.subr.bf16.mxu0 %v4110_v38 }
0x1469   :  { %3892 = vmatpush3.bf16.msra.mxu0 %v4110_v38 }
0x146b   :  { %v4200_v42 = vpop.eup %4199 }
0x146c   :  { %1593 = vrot.lane.b32.xlu0 %v4200_v42, %s4533_s25 }
0x146d   :  { %v4202_v43 = vpop.eup %4201 }
0x146e   :  { %1595 = vrot.lane.b32.xlu1 %v4202_v43, %s4533_s25 }
0x14de   :  { %v1594_v45 = vpop.permute.xlu0 %1593 }
0x14df   :  { %v5010_v46 = vmul.f32 %v1594_v45, %v1555_v24 }
0x14e0   :  { %v1596_v50 = vpop.permute.xlu1 %1595 }
0x14e1   :  { %v5013_v55 = vmul.f32 %v1596_v50, %v1556_v29  ;;  %1613 = vrot.lane.b32.xlu0 %v5010_v46, %s4547_s9  ;;  %v4112_v50 = vld [vmem:[#allocation12 + $0x68] sm:$0xff]  }
0x14e3   :  { %v1621_v57 = vpack.c.bf16 %v5013_v55, %v5010_v46  ;;  %1615 = vrot.lane.b32.xlu1 %v5013_v55, %s4547_s9 }
0x14e5   :  { %1603 = vrot.lane.b32.xlu0 %v1587_v39, %s4549_s0  ;;  %v4111_v39 = vld [vmem:[#allocation12 + $0x60] sm:$0xff]  }
0x14e6   :  { %3893 = vmatprep.subr.bf16.mxu0 %v4111_v39 }
0x14e7   :  { %1605 = vrot.lane.b32.xlu1 %v1588_v41, %s4549_s0  ;;  %3894 = vmatpush3.bf16.msra.mxu0 %v4111_v39 }
0x14e8   :  { %3895 = vmatprep.subr.bf16.mxu0 %v4112_v50 }
0x14eb   :  { %3896 = vmatpush3.bf16.msra.mxu0 %v4112_v50 }
0x1553   :  { %v1614_v62 = vpop.permute.xlu0 %1613 }
0x1554   :  { %1619 = vst.msk [vmem:[#allocation4] sm:$0xff] %vm614_vm0, %v1614_v62 }
0x1555   :  { %v1616_v63 = vpop.permute.xlu1 %1615 }
0x1556   :  { %1620 = vst.msk [vmem:[#allocation4 + $0x8] sm:$0xff] %vm614_vm0, %v1616_v63  ;;  %v4113_v63 = vld [vmem:[#allocation12 + $0x70] sm:$0xff]  }
0x1557   :  { %v1604_v0 = vpop.permute.xlu0 %1603  ;;  %3897 = vmatprep.subr.bf16.mxu0 %v4113_v63 }
0x1558   :  { %1609 = vst.msk [vmem:[#allocation5] sm:$0xff] %vm614_vm0, %v1604_v0  ;;  %3898 = vmatpush3.bf16.msra.mxu0 %v4113_v63  ;;  %v4114_v0 = vld [vmem:[#allocation12 + $0x78] sm:$0xff]  }
0x1559   :  { %v1606_v2 = vpop.permute.xlu1 %1605  ;;  %3899 = vmatprep.subr.bf16.mxu0 %v4114_v0 }
0x155a   :  { %1610 = vst.msk [vmem:[#allocation5 + $0x8] sm:$0xff] %vm614_vm0, %v1606_v2 }
0x155b   :  { %v1630_v7 = vld [vmem:[#allocation4] sm:$0xff] }
0x155c   :  { %3900 = vmatpush3.bf16.msra.mxu0 %v4114_v0 }
0x155d   :  { %v1631_v8 = vld [vmem:[#allocation4 + $0x8] sm:$0xff]  ;;  %3973 = vmatprep.subr.bf16.mxu0 %v4545_v16 }
0x155e   :  { %v1632_v9 = vpack.c.bf16 %v1631_v8, %v1630_v7  ;;  %v4115_v8 = vld [vmem:[#allocation14 + $0x10] sm:$0xff]  }
0x155f   :  { %v1701_v4 = vld [vmem:[#allocation5] sm:$0xff] }
0x1560   :  { %3882 = vmatmul.mubr.msk.bf16.vlgmr.msra.gmra.mrb[28].mxu1 %vm614_vm0, %v1632_v9  ;;  %v4116_v9 = vld [vmem:[#allocation14 + $0x18] sm:$0xff]  }
0x1561   :  { %3921 = vmatprep.mubr.msk.bf16.mxu1 %vm4546_vm1, %v4545_v16  ;;  %v1702_v30 = vld [vmem:[#allocation5 + $0x8] sm:$0xff]  ;;  %3918 = vmatpush3.bf16.msra.mxu1 %v4115_v8 }
0x1562   :  { %3919 = vmatprep.subr.bf16.mxu1 %v4545_v16 }
0x1565   :  { %3920 = vmatpush3.bf16.msra.mxu1 %v4116_v9 }
0x1566   :  { %3925 = vmatprep.subr.bf16.mxu1 %v4545_v16 }
0x1633   :  { %v1686_v11 = vpop.f32.mrb[28].mxu1 }
0x1634   :  { %v1693_v13 = vadd.f32 %v1686_v11, %v1628_v10  ;;  %v3883_v14 = vpop.f32.mrb[29].mxu1 }
0x1635   :  { %v1689_v19 = vpop.f32.mrb[30].mxu1 }
0x1636   :  { %4203 = vtanh.f32 %v1693_v13  ;;  %v1694_v20 = vadd.f32 %v1689_v19, %v1629_v18  ;;  %v3884_v21 = vpop.f32.mrb[31].mxu1 }
0x1638   :  { %4205 = vtanh.f32 %v1694_v20 }
0x1640   :  { %v4204_v22 = vpop.eup %4203 }
0x1641   :  { %v1697_v24 = vmul.f32 %v4204_v22, %v4776_v32 }
0x1642   :  { %v4206_v26 = vpop.eup %4205 }
0x1643   :  { %v1699_v29 = vadd.f32 %v1697_v24, %v4778_v37  ;;  %v1698_v5 = vmul.f32 %v4206_v26, %v4776_v32 }
0x1645   :  { %1715 = vrot.lane.b32.xlu0 %v1699_v29, %s4533_s25  ;;  %v1700_v58 = vadd.f32 %v1698_v5, %v4778_v37 }
0x1647   :  { %1717 = vrot.lane.b32.xlu1 %v1700_v58, %s4533_s25 }
0x1649   :  { %1705 = vrot.lane.b32.xlu0 %v1701_v4, %s4547_s9 }
0x164b   :  { %1707 = vrot.lane.b32.xlu1 %v1702_v30, %s4547_s9 }
0x16b7   :  { %v1716_v31 = vpop.permute.xlu0 %1715 }
0x16b8   :  { %v1721_v59 = vmul.f32 %v1716_v31, %v1699_v29 }
0x16b9   :  { %v1718_v33 = vpop.permute.xlu1 %1717 }
0x16ba   :  { %v1722_v34 = vmul.f32 %v1718_v33, %v1700_v58  ;;  %1725 = vrot.lane.b32.xlu0 %v1721_v59, %s4547_s9 }
0x16bb   :  { %v1706_v40 = vpop.permute.xlu0 %1705 }
0x16bc   :  { %1727 = vrot.lane.b32.xlu1 %v1722_v34, %s4547_s9  ;;  %v1711_v42 = vmul.f32 %v1706_v40, %v1699_v29 }
0x16bd   :  { %v1708_v41 = vpop.permute.xlu1 %1707 }
0x16be   :  { %v1712_v48 = vmul.f32 %v1708_v41, %v1700_v58 }
0x172c   :  { %v1726_v43 = vpop.permute.xlu0 %1725 }
0x172d   :  { %v1731_v44 = vadd.f32 %v1726_v43, %v1711_v42 }
0x172e   :  { %v1728_v45 = vpop.permute.xlu1 %1727 }
0x172f   :  { %4207 = vtanh.f32 %v1731_v44  ;;  %v1732_v62 = vadd.f32 %v1728_v45, %v1712_v48 }
0x1731   :  { %4209 = vtanh.f32 %v1732_v62 }
0x1739   :  { %v4208_v2 = vpop.eup %4207 }
0x173a   :  { %1737 = vrot.lane.b32.xlu0 %v4208_v2, %s4533_s25 }
0x173b   :  { %v4210_v7 = vpop.eup %4209 }
0x173c   :  { %1739 = vrot.lane.b32.xlu1 %v4210_v7, %s4533_s25 }
0x173e   :  { %759 = vrot.lane.b32.xlu0 %v757_v28, %s4547_s9 }
0x1740   :  { %903 = vrot.lane.b32.xlu1 %v901_v17, %s4547_s9 }
0x17ac   :  { %v1738_v10 = vpop.permute.xlu0 %1737 }
0x17ad   :  { %v5054_v11 = vmul.f32 %v1738_v10, %v1699_v29  ;;  %v5084_v29 = vld [vmem:[#allocation15 + $0x1] ss:$0 sm:$0xff] }
0x17ae   :  { %v1740_v13 = vpop.permute.xlu1 %1739 }
0x17af   :  { %v5057_v14 = vmul.f32 %v1740_v13, %v1700_v58  ;;  %1757 = vrot.lane.b32.xlu0 %v5054_v11, %s4547_s9 }
0x17b0   :  { %v760_v25 = vpop.permute.xlu0 %759 }
0x17b1   :  { %v1765_v27 = vpack.c.bf16 %v5057_v14, %v5054_v11  ;;  %762 = vst.msk [vmem:[#allocation2] sm:$0xff] %vm614_vm0, %v760_v25  ;;  %1759 = vrot.lane.b32.xlu1 %v5057_v14, %s4547_s9 }
0x17b2   :  { %v904_v28 = vpop.permute.xlu1 %903 }
0x17b3   :  { %906 = vst.msk [vmem:[#allocation2 + $0x8] sm:$0xff] %vm614_vm0, %v904_v28  ;;  %1747 = vrot.lane.b32.xlu0 %v1731_v44, %s4549_s0 }
0x17b5   :  { %1749 = vrot.lane.b32.xlu1 %v1732_v62, %s4549_s0 }
0x17b8   :  { %v1771_v12 = vld [vmem:[#allocation2] sm:$0xff] }
0x17b9   :  { %3901 = vmatprep.mubr.bf16.mxu0 %v1771_v12 }
0x17ba   :  { %v1772_v15 = vld [vmem:[#allocation2 + $0x8] sm:$0xff] }
0x17bb   :  { %3902 = vmatmul.mubr.bf16.vlgmr.msra.gmra.mrb[32].mxu0 %v1772_v15 }
0x1821   :  { %v1758_v17 = vpop.permute.xlu0 %1757 }
0x1822   :  { %1763 = vst.msk [vmem:[#allocation4] sm:$0xff] %vm614_vm0, %v1758_v17 }
0x1823   :  { %1965 = vst.msk [vmem:[#allocation4] sm:$0xff] %vm614_vm0, %v4545_v16  ;;  %v1760_v18 = vpop.permute.xlu1 %1759 }
0x1824   :  { %1764 = vst.msk [vmem:[#allocation4 + $0x8] sm:$0xff] %vm614_vm0, %v1760_v18 }
0x1825   :  { %1966 = vst.msk [vmem:[#allocation4 + $0x8] sm:$0xff] %vm614_vm0, %v4545_v16  ;;  %v1748_v19 = vpop.permute.xlu0 %1747 }
0x1826   :  { %1753 = vst.msk [vmem:[#allocation5] sm:$0xff] %vm614_vm0, %v1748_v19 }
0x1827   :  { %1967 = vst.msk [vmem:[#allocation5] sm:$0xff] %vm614_vm0, %v4545_v16  ;;  %v1750_v20 = vpop.permute.xlu1 %1749 }
0x1828   :  { %1754 = vst.msk [vmem:[#allocation5 + $0x8] sm:$0xff] %vm614_vm0, %v1750_v20 }
0x1829   :  { %1968 = vst.msk [vmem:[#allocation5 + $0x8] sm:$0xff] %vm614_vm0, %v4545_v16 }
0x182a   :  { %v1972_v21 = vld [vmem:[#allocation4] sm:$0xff] }
0x182c   :  { %v1973_v22 = vld [vmem:[#allocation4 + $0x8] sm:$0xff] }
0x182d   :  { %v1974_v24 = vpack.c.bf16 %v1973_v22, %v1972_v21  ;;  %v4117_v22 = vld [vmem:[#allocation14 + $0x10] sm:$0xff]  }
0x182e   :  { %v2044_v0 = vld [vmem:[#allocation5] sm:$0xff] }
0x182f   :  { %3922 = vmatmul.mubr.msk.bf16.vlgmr.msra.gmra.mrb[32].mxu1 %vm614_vm0, %v1974_v24  ;;  %v4118_v24 = vld [vmem:[#allocation14 + $0x18] sm:$0xff]  }
0x1830   :  { %3929 = vmatprep.mubr.msk.bf16.mxu1 %vm4546_vm1, %v4545_v16  ;;  %v2045_v2 = vld [vmem:[#allocation5 + $0x8] sm:$0xff]  ;;  %3926 = vmatpush3.bf16.msra.mxu1 %v4117_v22 }
0x1831   :  { %3927 = vmatprep.subr.bf16.mxu1 %v4545_v16 }
0x1834   :  { %3928 = vmatpush3.bf16.msra.mxu1 %v4118_v24 }
0x1835   :  { %3933 = vmatprep.subr.bf16.mxu1 %v4545_v16 }
0x188e   :  { %v3903_v26 = vpop.f32.mrb[32].mxu0 }
0x188f   :  { %v1886_v5 = vpop.f32.mrb[33].mxu0  ;;  %v1895_v4 = vadd.f32 %v3903_v26, %v5084_v29 }
0x1890   :  { %v3904_v58 = vpop.f32.mrb[34].mxu0  ;;  %v1887_v59 = vadd.f32 %v5084_v29, %v1886_v5 }
0x1891   :  { %v1898_v30 = vadd.f32 %v3904_v58, %v5084_v29  ;;  %v1889_v31 = vpop.f32.mrb[35].mxu0 }
0x1892   :  { %v1890_v33 = vadd.f32 %v5084_v29, %v1889_v31 }
0x1893   :  { %v5090_v34 = vpack.c.bf16 %v1898_v30, %v1895_v4 }
0x1894   :  { %v1949_v35 = vpack.c.bf16 %v1890_v33, %v1887_v59 }
0x1896   :  { %v1970_v36 = vunpack.c.l.bf16 %v1949_v35  ;;  %v1971_v40 = vunpack.c.h.bf16 %v1949_v35 }
0x1902   :  { %v2029_v47 = vpop.f32.mrb[32].mxu1 }
0x1903   :  { %v2036_v38 = vadd.f32 %v2029_v47, %v1970_v36  ;;  %v3923_v39 = vpop.f32.mrb[33].mxu1 }
0x1904   :  { %v2032_v41 = vpop.f32.mrb[34].mxu1  ;;  %v2115_v39 = vunpack.c.l.bf16 %v5090_v34 }
0x1905   :  { %4211 = vtanh.f32 %v2036_v38  ;;  %v2037_v42 = vadd.f32 %v2032_v41, %v1971_v40  ;;  %v3924_v43 = vpop.f32.mrb[35].mxu1 }
0x1906   :  { %v2116_v43 = vunpack.c.h.bf16 %v5090_v34 }
0x1907   :  { %4213 = vtanh.f32 %v2037_v42 }
0x190f   :  { %v4212_v48 = vpop.eup %4211 }
0x1910   :  { %v2040_v44 = vmul.f32 %v4212_v48, %v4776_v32 }
0x1911   :  { %v4214_v45 = vpop.eup %4213 }
0x1912   :  { %v2042_v50 = vadd.f32 %v2040_v44, %v4778_v37  ;;  %v2041_v62 = vmul.f32 %v4214_v45, %v4776_v32 }
0x1914   :  { %2058 = vrot.lane.b32.xlu0 %v2042_v50, %s4533_s25  ;;  %v2043_v63 = vadd.f32 %v2041_v62, %v4778_v37 }
0x1916   :  { %2060 = vrot.lane.b32.xlu1 %v2043_v63, %s4533_s25 }
0x1918   :  { %2048 = vrot.lane.b32.xlu0 %v2044_v0, %s4547_s9 }
0x191a   :  { %2050 = vrot.lane.b32.xlu1 %v2045_v2, %s4547_s9 }
0x1986   :  { %v2059_v7 = vpop.permute.xlu0 %2058 }
0x1987   :  { %v2064_v8 = vmul.f32 %v2059_v7, %v2042_v50 }
0x1988   :  { %v2061_v9 = vpop.permute.xlu1 %2060 }
0x1989   :  { %v2065_v10 = vmul.f32 %v2061_v9, %v2043_v63  ;;  %2068 = vrot.lane.b32.xlu0 %v2064_v8, %s4547_s9 }
0x198a   :  { %v2049_v13 = vpop.permute.xlu0 %2048 }
0x198b   :  { %2070 = vrot.lane.b32.xlu1 %v2065_v10, %s4547_s9  ;;  %v2054_v28 = vmul.f32 %v2049_v13, %v2042_v50 }
0x198c   :  { %v2051_v25 = vpop.permute.xlu1 %2050 }
0x198d   :  { %v2055_v15 = vmul.f32 %v2051_v25, %v2043_v63 }
0x19fb   :  { %v2069_v12 = vpop.permute.xlu0 %2068 }
0x19fc   :  { %v2074_v17 = vadd.f32 %v2069_v12, %v2054_v28 }
0x19fd   :  { %v2071_v18 = vpop.permute.xlu1 %2070 }
0x19fe   :  { %4215 = vtanh.f32 %v2074_v17  ;;  %v2075_v19 = vadd.f32 %v2071_v18, %v2055_v15 }
0x1a00   :  { %4217 = vtanh.f32 %v2075_v19 }
0x1a08   :  { %v4216_v20 = vpop.eup %4215 }
0x1a09   :  { %2080 = vrot.lane.b32.xlu0 %v4216_v20, %s4533_s25 }
0x1a0a   :  { %v4218_v21 = vpop.eup %4217 }
0x1a0b   :  { %2082 = vrot.lane.b32.xlu1 %v4218_v21, %s4533_s25 }
0x1a7b   :  { %v2081_v26 = vpop.permute.xlu0 %2080 }
0x1a7c   :  { %v5105_v5 = vmul.f32 %v2081_v26, %v2042_v50  ;;  %v4119_v26 = vld [vmem:[#allocation14 + $0x10] sm:$0xff]  }
0x1a7d   :  { %v2083_v58 = vpop.permute.xlu1 %2082 }
0x1a7e   :  { %v5108_v4 = vmul.f32 %v2083_v58, %v2043_v63  ;;  %2100 = vrot.lane.b32.xlu0 %v5105_v5, %s4547_s9  ;;  %v4120_v58 = vld [vmem:[#allocation14 + $0x18] sm:$0xff]  }
0x1a80   :  { %v2108_v30 = vpack.c.bf16 %v5108_v4, %v5105_v5  ;;  %2102 = vrot.lane.b32.xlu1 %v5108_v4, %s4547_s9 }
0x1a82   :  { %2090 = vrot.lane.b32.xlu0 %v2074_v17, %s4549_s0 }
0x1a84   :  { %2092 = vrot.lane.b32.xlu1 %v2075_v19, %s4549_s0 }
0x1af0   :  { %v2101_v31 = vpop.permute.xlu0 %2100 }
0x1af1   :  { %2106 = vst.msk [vmem:[#allocation4] sm:$0xff] %vm614_vm0, %v2101_v31 }
0x1af2   :  { %v2103_v59 = vpop.permute.xlu1 %2102 }
0x1af3   :  { %2107 = vst.msk [vmem:[#allocation4 + $0x8] sm:$0xff] %vm614_vm0, %v2103_v59 }
0x1af4   :  { %v2091_v33 = vpop.permute.xlu0 %2090 }
0x1af5   :  { %2096 = vst.msk [vmem:[#allocation5] sm:$0xff] %vm614_vm0, %v2091_v33 }
0x1af6   :  { %v2093_v35 = vpop.permute.xlu1 %2092 }
0x1af7   :  { %2097 = vst.msk [vmem:[#allocation5 + $0x8] sm:$0xff] %vm614_vm0, %v2093_v35 }
0x1af8   :  { %v2117_v36 = vld [vmem:[#allocation4] sm:$0xff] }
0x1afa   :  { %v2118_v47 = vld [vmem:[#allocation4 + $0x8] sm:$0xff] }
0x1afb   :  { %v2119_v38 = vpack.c.bf16 %v2118_v47, %v2117_v36 }
0x1afc   :  { %v2188_v34 = vld [vmem:[#allocation5] sm:$0xff] }
0x1afd   :  { %3930 = vmatmul.mubr.msk.bf16.vlgmr.msra.gmra.mrb[36].mxu1 %vm614_vm0, %v2119_v38 }
0x1afe   :  { %3937 = vmatprep.mubr.msk.bf16.mxu1 %vm4546_vm1, %v4545_v16  ;;  %v2189_v8 = vld [vmem:[#allocation5 + $0x8] sm:$0xff]  ;;  %3934 = vmatpush3.bf16.msra.mxu1 %v4119_v26 }
0x1aff   :  { %3935 = vmatprep.subr.bf16.mxu1 %v4545_v16 }
0x1b02   :  { %3936 = vmatpush3.bf16.msra.mxu1 %v4120_v58 }
0x1b03   :  { %3941 = vmatprep.subr.bf16.mxu1 %v4545_v16 }
0x1bd0   :  { %v2173_v40 = vpop.f32.mrb[36].mxu1 }
0x1bd1   :  { %v2180_v41 = vadd.f32 %v2173_v40, %v2115_v39  ;;  %v3931_v42 = vpop.f32.mrb[37].mxu1 }
0x1bd2   :  { %v2176_v48 = vpop.f32.mrb[38].mxu1 }
0x1bd3   :  { %4219 = vtanh.f32 %v2180_v41  ;;  %v2181_v44 = vadd.f32 %v2176_v48, %v2116_v43  ;;  %v3932_v45 = vpop.f32.mrb[39].mxu1 }
0x1bd5   :  { %4221 = vtanh.f32 %v2181_v44 }
0x1bdd   :  { %v4220_v50 = vpop.eup %4219 }
0x1bde   :  { %v2184_v62 = vmul.f32 %v4220_v50, %v4776_v32 }
0x1bdf   :  { %v4222_v63 = vpop.eup %4221 }
0x1be0   :  { %v2186_v0 = vadd.f32 %v2184_v62, %v4778_v37  ;;  %v2185_v2 = vmul.f32 %v4222_v63, %v4776_v32 }
0x1be2   :  { %2202 = vrot.lane.b32.xlu0 %v2186_v0, %s4533_s25  ;;  %v2187_v7 = vadd.f32 %v2185_v2, %v4778_v37 }
0x1be4   :  { %2204 = vrot.lane.b32.xlu1 %v2187_v7, %s4533_s25 }
0x1be6   :  { %2192 = vrot.lane.b32.xlu0 %v2188_v34, %s4547_s9 }
0x1be8   :  { %2194 = vrot.lane.b32.xlu1 %v2189_v8, %s4547_s9 }
0x1c54   :  { %v2203_v9 = vpop.permute.xlu0 %2202 }
0x1c55   :  { %v2208_v10 = vmul.f32 %v2203_v9, %v2186_v0 }
0x1c56   :  { %v2205_v13 = vpop.permute.xlu1 %2204 }
0x1c57   :  { %v2209_v25 = vmul.f32 %v2205_v13, %v2187_v7  ;;  %2212 = vrot.lane.b32.xlu0 %v2208_v10, %s4547_s9 }
0x1c58   :  { %v2193_v28 = vpop.permute.xlu0 %2192 }
0x1c59   :  { %2214 = vrot.lane.b32.xlu1 %v2209_v25, %s4547_s9  ;;  %v2198_v15 = vmul.f32 %v2193_v28, %v2186_v0 }
0x1c5a   :  { %v2195_v12 = vpop.permute.xlu1 %2194 }
0x1c5b   :  { %v2199_v18 = vmul.f32 %v2195_v12, %v2187_v7 }
0x1cc9   :  { %v2213_v17 = vpop.permute.xlu0 %2212 }
0x1cca   :  { %v2218_v19 = vadd.f32 %v2213_v17, %v2198_v15 }
0x1ccb   :  { %v2215_v20 = vpop.permute.xlu1 %2214 }
0x1ccc   :  { %4223 = vtanh.f32 %v2218_v19  ;;  %v2219_v21 = vadd.f32 %v2215_v20, %v2199_v18 }
0x1cce   :  { %4225 = vtanh.f32 %v2219_v21 }
0x1cd6   :  { %v4224_v22 = vpop.eup %4223 }
0x1cd7   :  { %2224 = vrot.lane.b32.xlu0 %v4224_v22, %s4533_s25 }
0x1cd8   :  { %v4226_v24 = vpop.eup %4225 }
0x1cd9   :  { %2226 = vrot.lane.b32.xlu1 %v4226_v24, %s4533_s25 }
0x1cdb   :  { %1047 = vrot.lane.b32.xlu0 %v1045_v6, %s4547_s9 }
0x1cdd   :  { %1191 = vrot.lane.b32.xlu1 %v1189_v61, %s4547_s9 }
0x1d49   :  { %v2225_v31 = vpop.permute.xlu0 %2224 }
0x1d4a   :  { %v5148_v59 = vmul.f32 %v2225_v31, %v2186_v0 }
0x1d4b   :  { %v2227_v33 = vpop.permute.xlu1 %2226 }
0x1d4c   :  { %v5151_v35 = vmul.f32 %v2227_v33, %v2187_v7  ;;  %2244 = vrot.lane.b32.xlu0 %v5148_v59, %s4547_s9 }
0x1d4d   :  { %v1048_v1 = vpop.permute.xlu0 %1047 }
0x1d4e   :  { %v2252_v3 = vpack.c.bf16 %v5151_v35, %v5148_v59  ;;  %1050 = vst.msk [vmem:[#allocation2 + $0x10] sm:$0xff] %vm614_vm0, %v1048_v1  ;;  %2246 = vrot.lane.b32.xlu1 %v5151_v35, %s4547_s9  ;;  %v4139_v59 = vld [vmem:[#allocation20] sm:$0xff]   ;;  %v4140_v35 = vld [vmem:[#allocation20 + $0x8] sm:$0xff]  }
0x1d4f   :  { %v1192_v6 = vpop.permute.xlu1 %1191 }
0x1d50   :  { %1194 = vst.msk [vmem:[#allocation2 + $0x18] sm:$0xff] %vm614_vm0, %v1192_v6  ;;  %2234 = vrot.lane.b32.xlu0 %v2218_v19, %s4549_s0 }
0x1d52   :  { %2236 = vrot.lane.b32.xlu1 %v2219_v21, %s4549_s0 }
0x1d55   :  { %v1773_v56 = vld [vmem:[#allocation2 + $0x10] sm:$0xff] }
0x1d56   :  { %3905 = vmatprep.mubr.bf16.mxu0 %v1773_v56 }
0x1d57   :  { %v1774_v60 = vld [vmem:[#allocation2 + $0x18] sm:$0xff] }
0x1d58   :  { %3906 = vmatmul.mubr.bf16.gmra.mrb[36].mxu0 %v1774_v60 }
0x1dbe   :  { %v2245_v61 = vpop.permute.xlu0 %2244 }
0x1dbf   :  { %2250 = vst.msk [vmem:[#allocation4] sm:$0xff] %vm614_vm0, %v2245_v61 }
0x1dc0   :  { %v2247_v36 = vpop.permute.xlu1 %2246 }
0x1dc1   :  { %2251 = vst.msk [vmem:[#allocation4 + $0x8] sm:$0xff] %vm614_vm0, %v2247_v36 }
0x1dc2   :  { %v2235_v47 = vpop.permute.xlu0 %2234 }
0x1dc3   :  { %2240 = vst.msk [vmem:[#allocation5] sm:$0xff] %vm614_vm0, %v2235_v47 }
0x1dc4   :  { %v2237_v38 = vpop.permute.xlu1 %2236 }
0x1dc5   :  { %2241 = vst.msk [vmem:[#allocation5 + $0x8] sm:$0xff] %vm614_vm0, %v2237_v38 }
0x1dc6   :  { %v2261_v39 = vld [vmem:[#allocation4] sm:$0xff] }
0x1dc8   :  { %v2262_v40 = vld [vmem:[#allocation4 + $0x8] sm:$0xff] }
0x1dc9   :  { %v2263_v41 = vpack.c.bf16 %v2262_v40, %v2261_v39  ;;  %v4121_v40 = vld [vmem:[#allocation14 + $0x10] sm:$0xff]  }
0x1dca   :  { %v2332_v21 = vld [vmem:[#allocation5] sm:$0xff] }
0x1dcb   :  { %3938 = vmatmul.mubr.msk.bf16.vlgmr.msra.gmra.mrb[40].mxu1 %vm614_vm0, %v2263_v41  ;;  %v4122_v41 = vld [vmem:[#allocation14 + $0x18] sm:$0xff]  }
0x1dcc   :  { %3945 = vmatprep.mubr.msk.bf16.mxu1 %vm4546_vm1, %v4545_v16  ;;  %v2333_v22 = vld [vmem:[#allocation5 + $0x8] sm:$0xff]  ;;  %3942 = vmatpush3.bf16.msra.mxu1 %v4121_v40 }
0x1dcd   :  { %3943 = vmatprep.subr.bf16.mxu1 %v4545_v16 }
0x1dd0   :  { %3944 = vmatpush3.bf16.msra.mxu1 %v4122_v41 }
0x1dd1   :  { %3949 = vmatprep.subr.bf16.mxu1 %v4545_v16 }
0x1e2b   :  { %v3907_v42 = vpop.f32.mrb[36].mxu0 }
0x1e2c   :  { %v1902_v43 = vpop.f32.mrb[37].mxu0  ;;  %v1911_v44 = vadd.f32 %v3907_v42, %v5084_v29 }
0x1e2d   :  { %v3908_v48 = vpop.f32.mrb[38].mxu0  ;;  %v1903_v62 = vadd.f32 %v5084_v29, %v1902_v43 }
0x1e2e   :  { %v1914_v45 = vadd.f32 %v3908_v48, %v5084_v29  ;;  %v1905_v50 = vpop.f32.mrb[39].mxu0 }
0x1e2f   :  { %v1906_v63 = vadd.f32 %v5084_v29, %v1905_v50 }
0x1e30   :  { %v5174_v0 = vpack.c.bf16 %v1914_v45, %v1911_v44 }
0x1e31   :  { %v1951_v2 = vpack.c.bf16 %v1906_v63, %v1903_v62 }
0x1e33   :  { %v2259_v7 = vunpack.c.l.bf16 %v1951_v2  ;;  %v2260_v10 = vunpack.c.h.bf16 %v1951_v2 }
0x1e9e   :  { %v2317_v34 = vpop.f32.mrb[40].mxu1 }
0x1e9f   :  { %v2324_v8 = vadd.f32 %v2317_v34, %v2259_v7  ;;  %v3939_v9 = vpop.f32.mrb[41].mxu1 }
0x1ea0   :  { %v2320_v13 = vpop.f32.mrb[42].mxu1  ;;  %v2403_v9 = vunpack.c.l.bf16 %v5174_v0 }
0x1ea1   :  { %4227 = vtanh.f32 %v2324_v8  ;;  %v2325_v25 = vadd.f32 %v2320_v13, %v2260_v10  ;;  %v3940_v28 = vpop.f32.mrb[43].mxu1 }
0x1ea2   :  { %v2404_v28 = vunpack.c.h.bf16 %v5174_v0 }
0x1ea3   :  { %4229 = vtanh.f32 %v2325_v25 }
0x1eab   :  { %v4228_v12 = vpop.eup %4227 }
0x1eac   :  { %v2328_v15 = vmul.f32 %v4228_v12, %v4776_v32 }
0x1ead   :  { %v4230_v17 = vpop.eup %4229 }
0x1eae   :  { %v2330_v18 = vadd.f32 %v2328_v15, %v4778_v37  ;;  %v2329_v19 = vmul.f32 %v4230_v17, %v4776_v32 }
0x1eb0   :  { %2346 = vrot.lane.b32.xlu0 %v2330_v18, %s4533_s25  ;;  %v2331_v20 = vadd.f32 %v2329_v19, %v4778_v37 }
0x1eb2   :  { %2348 = vrot.lane.b32.xlu1 %v2331_v20, %s4533_s25 }
0x1eb4   :  { %2336 = vrot.lane.b32.xlu0 %v2332_v21, %s4547_s9 }
0x1eb6   :  { %2338 = vrot.lane.b32.xlu1 %v2333_v22, %s4547_s9 }
0x1f22   :  { %v2347_v24 = vpop.permute.xlu0 %2346 }
0x1f23   :  { %v2352_v26 = vmul.f32 %v2347_v24, %v2330_v18 }
0x1f24   :  { %v2349_v58 = vpop.permute.xlu1 %2348 }
0x1f25   :  { %v2353_v31 = vmul.f32 %v2349_v58, %v2331_v20  ;;  %2356 = vrot.lane.b32.xlu0 %v2352_v26, %s4547_s9 }
0x1f26   :  { %v2337_v33 = vpop.permute.xlu0 %2336 }
0x1f27   :  { %2358 = vrot.lane.b32.xlu1 %v2353_v31, %s4547_s9  ;;  %v2342_v6 = vmul.f32 %v2337_v33, %v2330_v18 }
0x1f28   :  { %v2339_v1 = vpop.permute.xlu1 %2338 }
0x1f29   :  { %v2343_v60 = vmul.f32 %v2339_v1, %v2331_v20 }
0x1f97   :  { %v2357_v56 = vpop.permute.xlu0 %2356 }
0x1f98   :  { %v2362_v61 = vadd.f32 %v2357_v56, %v2342_v6 }
0x1f99   :  { %v2359_v36 = vpop.permute.xlu1 %2358 }
0x1f9a   :  { %4231 = vtanh.f32 %v2362_v61  ;;  %v2363_v47 = vadd.f32 %v2359_v36, %v2343_v60 }
0x1f9c   :  { %4233 = vtanh.f32 %v2363_v47 }
0x1fa4   :  { %v4232_v38 = vpop.eup %4231 }
0x1fa5   :  { %2368 = vrot.lane.b32.xlu0 %v4232_v38, %s4533_s25 }
0x1fa6   :  { %v4234_v39 = vpop.eup %4233 }
0x1fa7   :  { %2370 = vrot.lane.b32.xlu1 %v4234_v39, %s4533_s25 }
0x2017   :  { %v2369_v42 = vpop.permute.xlu0 %2368 }
0x2018   :  { %v5189_v43 = vmul.f32 %v2369_v42, %v2330_v18  ;;  %v4123_v42 = vld [vmem:[#allocation14 + $0x10] sm:$0xff]  }
0x2019   :  { %v2371_v48 = vpop.permute.xlu1 %2370 }
0x201a   :  { %v5192_v44 = vmul.f32 %v2371_v48, %v2331_v20  ;;  %2388 = vrot.lane.b32.xlu0 %v5189_v43, %s4547_s9  ;;  %v4124_v48 = vld [vmem:[#allocation14 + $0x18] sm:$0xff]  }
0x201c   :  { %v2396_v45 = vpack.c.bf16 %v5192_v44, %v5189_v43  ;;  %2390 = vrot.lane.b32.xlu1 %v5192_v44, %s4547_s9 }
0x201e   :  { %2378 = vrot.lane.b32.xlu0 %v2362_v61, %s4549_s0 }
0x2020   :  { %2380 = vrot.lane.b32.xlu1 %v2363_v47, %s4549_s0 }
0x208c   :  { %v2389_v50 = vpop.permute.xlu0 %2388 }
0x208d   :  { %2394 = vst.msk [vmem:[#allocation4] sm:$0xff] %vm614_vm0, %v2389_v50 }
0x208e   :  { %v2391_v62 = vpop.permute.xlu1 %2390 }
0x208f   :  { %2395 = vst.msk [vmem:[#allocation4 + $0x8] sm:$0xff] %vm614_vm0, %v2391_v62 }
0x2090   :  { %v2379_v63 = vpop.permute.xlu0 %2378 }
0x2091   :  { %2384 = vst.msk [vmem:[#allocation5] sm:$0xff] %vm614_vm0, %v2379_v63 }
0x2092   :  { %v2381_v2 = vpop.permute.xlu1 %2380 }
0x2093   :  { %2385 = vst.msk [vmem:[#allocation5 + $0x8] sm:$0xff] %vm614_vm0, %v2381_v2 }
0x2094   :  { %v2405_v7 = vld [vmem:[#allocation4] sm:$0xff] }
0x2096   :  { %v2406_v34 = vld [vmem:[#allocation4 + $0x8] sm:$0xff] }
0x2097   :  { %v2407_v8 = vpack.c.bf16 %v2406_v34, %v2405_v7 }
0x2098   :  { %v2476_v0 = vld [vmem:[#allocation5] sm:$0xff] }
0x2099   :  { %3946 = vmatmul.mubr.msk.bf16.vlgmr.msra.gmra.mrb[44].mxu1 %vm614_vm0, %v2407_v8 }
0x209a   :  { %3953 = vmatprep.mubr.msk.bf16.mxu1 %vm4546_vm1, %v4545_v16  ;;  %v2477_v26 = vld [vmem:[#allocation5 + $0x8] sm:$0xff]  ;;  %3950 = vmatpush3.bf16.msra.mxu1 %v4123_v42 }
0x209b   :  { %3951 = vmatprep.subr.bf16.mxu1 %v4545_v16 }
0x209e   :  { %3952 = vmatpush3.bf16.msra.mxu1 %v4124_v48 }
0x209f   :  { %3957 = vmatprep.subr.bf16.mxu1 %v4545_v16 }
0x216c   :  { %v2461_v10 = vpop.f32.mrb[44].mxu1 }
0x216d   :  { %v2468_v13 = vadd.f32 %v2461_v10, %v2403_v9  ;;  %v3947_v25 = vpop.f32.mrb[45].mxu1 }
0x216e   :  { %v2464_v12 = vpop.f32.mrb[46].mxu1 }
0x216f   :  { %4235 = vtanh.f32 %v2468_v13  ;;  %v2469_v15 = vadd.f32 %v2464_v12, %v2404_v28  ;;  %v3948_v17 = vpop.f32.mrb[47].mxu1 }
0x2171   :  { %4237 = vtanh.f32 %v2469_v15 }
0x2179   :  { %v4236_v18 = vpop.eup %4235 }
0x217a   :  { %v2472_v19 = vmul.f32 %v4236_v18, %v4776_v32 }
0x217b   :  { %v4238_v20 = vpop.eup %4237 }
0x217c   :  { %v2474_v21 = vadd.f32 %v2472_v19, %v4778_v37  ;;  %v2473_v22 = vmul.f32 %v4238_v20, %v4776_v32 }
0x217e   :  { %2490 = vrot.lane.b32.xlu0 %v2474_v21, %s4533_s25  ;;  %v2475_v24 = vadd.f32 %v2473_v22, %v4778_v37 }
0x2180   :  { %2492 = vrot.lane.b32.xlu1 %v2475_v24, %s4533_s25 }
0x2182   :  { %2480 = vrot.lane.b32.xlu0 %v2476_v0, %s4547_s9 }
0x2184   :  { %2482 = vrot.lane.b32.xlu1 %v2477_v26, %s4547_s9 }
0x21f0   :  { %v2491_v58 = vpop.permute.xlu0 %2490 }
0x21f1   :  { %v2496_v31 = vmul.f32 %v2491_v58, %v2474_v21 }
0x21f2   :  { %v2493_v33 = vpop.permute.xlu1 %2492 }
0x21f3   :  { %v2497_v1 = vmul.f32 %v2493_v33, %v2475_v24  ;;  %2500 = vrot.lane.b32.xlu0 %v2496_v31, %s4547_s9 }
0x21f4   :  { %v2481_v6 = vpop.permute.xlu0 %2480 }
0x21f5   :  { %2502 = vrot.lane.b32.xlu1 %v2497_v1, %s4547_s9  ;;  %v2486_v60 = vmul.f32 %v2481_v6, %v2474_v21 }
0x21f6   :  { %v2483_v56 = vpop.permute.xlu1 %2482 }
0x21f7   :  { %v2487_v36 = vmul.f32 %v2483_v56, %v2475_v24 }
0x2265   :  { %v2501_v61 = vpop.permute.xlu0 %2500 }
0x2266   :  { %v2506_v47 = vadd.f32 %v2501_v61, %v2486_v60 }
0x2267   :  { %v2503_v38 = vpop.permute.xlu1 %2502 }
0x2268   :  { %4239 = vtanh.f32 %v2506_v47  ;;  %v2507_v39 = vadd.f32 %v2503_v38, %v2487_v36 }
0x226a   :  { %4241 = vtanh.f32 %v2507_v39 }
0x2272   :  { %v4240_v40 = vpop.eup %4239 }
0x2273   :  { %2512 = vrot.lane.b32.xlu0 %v4240_v40, %s4533_s25 }
0x2274   :  { %v4242_v41 = vpop.eup %4241 }
0x2275   :  { %2514 = vrot.lane.b32.xlu1 %v4242_v41, %s4533_s25 }
0x2277   :  { %1335 = vrot.lane.b32.xlu0 %v1333_v54, %s4547_s9 }
0x2279   :  { %1479 = vrot.lane.b32.xlu1 %v1477_v53, %s4547_s9 }
0x22e5   :  { %v2513_v50 = vpop.permute.xlu0 %2512 }
0x22e6   :  { %v5232_v62 = vmul.f32 %v2513_v50, %v2474_v21 }
0x22e7   :  { %v2515_v63 = vpop.permute.xlu1 %2514 }
0x22e8   :  { %v5235_v2 = vmul.f32 %v2515_v63, %v2475_v24  ;;  %2532 = vrot.lane.b32.xlu0 %v5232_v62, %s4547_s9 }
0x22e9   :  { %v1336_v52 = vpop.permute.xlu0 %1335 }
0x22ea   :  { %v2540_v23 = vpack.c.bf16 %v5235_v2, %v5232_v62  ;;  %1338 = vst.msk [vmem:[#allocation2 + $0x20] sm:$0xff] %vm614_vm0, %v1336_v52  ;;  %2534 = vrot.lane.b32.xlu1 %v5235_v2, %s4547_s9  ;;  %v4141_v62 = vld [vmem:[#allocation20 + $0x10] sm:$0xff]  }
0x22eb   :  { %v1480_v54 = vpop.permute.xlu1 %1479 }
0x22ec   :  { %1482 = vst.msk [vmem:[#allocation2 + $0x28] sm:$0xff] %vm614_vm0, %v1480_v54  ;;  %2522 = vrot.lane.b32.xlu0 %v2506_v47, %s4549_s0 }
0x22ee   :  { %2524 = vrot.lane.b32.xlu1 %v2507_v39, %s4549_s0 }
0x22f1   :  { %v1775_v49 = vld [vmem:[#allocation2 + $0x20] sm:$0xff] }
0x22f2   :  { %3909 = vmatprep.mubr.bf16.mxu0 %v1775_v49 }
0x22f3   :  { %v1776_v51 = vld [vmem:[#allocation2 + $0x28] sm:$0xff] }
0x22f4   :  { %3910 = vmatmul.mubr.bf16.gmra.mrb[40].mxu0 %v1776_v51 }
0x235a   :  { %v2533_v53 = vpop.permute.xlu0 %2532 }
0x235b   :  { %2538 = vst.msk [vmem:[#allocation4] sm:$0xff] %vm614_vm0, %v2533_v53 }
0x235c   :  { %v2535_v7 = vpop.permute.xlu1 %2534 }
0x235d   :  { %2539 = vst.msk [vmem:[#allocation4 + $0x8] sm:$0xff] %vm614_vm0, %v2535_v7 }
0x235e   :  { %v2523_v34 = vpop.permute.xlu0 %2522 }
0x235f   :  { %2528 = vst.msk [vmem:[#allocation5] sm:$0xff] %vm614_vm0, %v2523_v34 }
0x2360   :  { %v2525_v8 = vpop.permute.xlu1 %2524 }
0x2361   :  { %2529 = vst.msk [vmem:[#allocation5 + $0x8] sm:$0xff] %vm614_vm0, %v2525_v8 }
0x2362   :  { %v2549_v9 = vld [vmem:[#allocation4] sm:$0xff] }
0x2364   :  { %v2550_v10 = vld [vmem:[#allocation4 + $0x8] sm:$0xff] }
0x2365   :  { %v2551_v13 = vpack.c.bf16 %v2550_v10, %v2549_v9  ;;  %v4125_v10 = vld [vmem:[#allocation14 + $0x10] sm:$0xff]  }
0x2366   :  { %v2620_v39 = vld [vmem:[#allocation5] sm:$0xff] }
0x2367   :  { %3954 = vmatmul.mubr.msk.bf16.vlgmr.msra.gmra.mrb[48].mxu1 %vm614_vm0, %v2551_v13  ;;  %v4126_v13 = vld [vmem:[#allocation14 + $0x18] sm:$0xff]  }
0x2368   :  { %3961 = vmatprep.mubr.msk.bf16.mxu1 %vm4546_vm1, %v4545_v16  ;;  %v2621_v40 = vld [vmem:[#allocation5 + $0x8] sm:$0xff]  ;;  %3958 = vmatpush3.bf16.msra.mxu1 %v4125_v10 }
0x2369   :  { %3959 = vmatprep.subr.bf16.mxu1 %v4545_v16 }
0x236c   :  { %3960 = vmatpush3.bf16.msra.mxu1 %v4126_v13 }
0x236d   :  { %3965 = vmatprep.subr.bf16.mxu1 %v4545_v16 }
0x23c7   :  { %v3911_v25 = vpop.f32.mrb[40].mxu0 }
0x23c8   :  { %v1918_v28 = vpop.f32.mrb[41].mxu0  ;;  %v1927_v15 = vadd.f32 %v3911_v25, %v5084_v29 }
0x23c9   :  { %v3912_v12 = vpop.f32.mrb[42].mxu0  ;;  %v1919_v19 = vadd.f32 %v5084_v29, %v1918_v28 }
0x23ca   :  { %v1930_v17 = vadd.f32 %v3912_v12, %v5084_v29  ;;  %v1921_v18 = vpop.f32.mrb[43].mxu0 }
0x23cb   :  { %v1922_v20 = vadd.f32 %v5084_v29, %v1921_v18 }
0x23cc   :  { %v5258_v21 = vpack.c.bf16 %v1930_v17, %v1927_v15 }
0x23cd   :  { %v1953_v22 = vpack.c.bf16 %v1922_v20, %v1919_v19 }
0x23cf   :  { %v2547_v24 = vunpack.c.l.bf16 %v1953_v22  ;;  %v2548_v31 = vunpack.c.h.bf16 %v1953_v22 }
0x243a   :  { %v2605_v0 = vpop.f32.mrb[48].mxu1 }
0x243b   :  { %v2612_v26 = vadd.f32 %v2605_v0, %v2547_v24  ;;  %v3955_v58 = vpop.f32.mrb[49].mxu1 }
0x243c   :  { %v2608_v33 = vpop.f32.mrb[50].mxu1  ;;  %v2691_v58 = vunpack.c.l.bf16 %v5258_v21 }
0x243d   :  { %4243 = vtanh.f32 %v2612_v26  ;;  %v2613_v1 = vadd.f32 %v2608_v33, %v2548_v31  ;;  %v3956_v6 = vpop.f32.mrb[51].mxu1 }
0x243e   :  { %v2692_v6 = vunpack.c.h.bf16 %v5258_v21 }
0x243f   :  { %4245 = vtanh.f32 %v2613_v1 }
0x2447   :  { %v4244_v56 = vpop.eup %4243 }
0x2448   :  { %v2616_v60 = vmul.f32 %v4244_v56, %v4776_v32 }
0x2449   :  { %v4246_v61 = vpop.eup %4245 }
0x244a   :  { %v2618_v36 = vadd.f32 %v2616_v60, %v4778_v37  ;;  %v2617_v47 = vmul.f32 %v4246_v61, %v4776_v32 }
0x244c   :  { %2634 = vrot.lane.b32.xlu0 %v2618_v36, %s4533_s25  ;;  %v2619_v38 = vadd.f32 %v2617_v47, %v4778_v37 }
0x244e   :  { %2636 = vrot.lane.b32.xlu1 %v2619_v38, %s4533_s25 }
0x2450   :  { %2624 = vrot.lane.b32.xlu0 %v2620_v39, %s4547_s9 }
0x2452   :  { %2626 = vrot.lane.b32.xlu1 %v2621_v40, %s4547_s9 }
0x24be   :  { %v2635_v41 = vpop.permute.xlu0 %2634 }
0x24bf   :  { %v2640_v42 = vmul.f32 %v2635_v41, %v2618_v36 }
0x24c0   :  { %v2637_v48 = vpop.permute.xlu1 %2636 }
0x24c1   :  { %v2641_v50 = vmul.f32 %v2637_v48, %v2619_v38  ;;  %2644 = vrot.lane.b32.xlu0 %v2640_v42, %s4547_s9 }
0x24c2   :  { %v2625_v63 = vpop.permute.xlu0 %2624 }
0x24c3   :  { %2646 = vrot.lane.b32.xlu1 %v2641_v50, %s4547_s9  ;;  %v2630_v54 = vmul.f32 %v2625_v63, %v2618_v36 }
0x24c4   :  { %v2627_v52 = vpop.permute.xlu1 %2626 }
0x24c5   :  { %v2631_v51 = vmul.f32 %v2627_v52, %v2619_v38 }
0x2533   :  { %v2645_v49 = vpop.permute.xlu0 %2644 }
0x2534   :  { %v2650_v53 = vadd.f32 %v2645_v49, %v2630_v54 }
0x2535   :  { %v2647_v7 = vpop.permute.xlu1 %2646 }
0x2536   :  { %4247 = vtanh.f32 %v2650_v53  ;;  %v2651_v34 = vadd.f32 %v2647_v7, %v2631_v51 }
0x2538   :  { %4249 = vtanh.f32 %v2651_v34 }
0x2540   :  { %v4248_v8 = vpop.eup %4247 }
0x2541   :  { %2656 = vrot.lane.b32.xlu0 %v4248_v8, %s4533_s25 }
0x2542   :  { %v4250_v9 = vpop.eup %4249 }
0x2543   :  { %2658 = vrot.lane.b32.xlu1 %v4250_v9, %s4533_s25 }
0x25b3   :  { %v2657_v25 = vpop.permute.xlu0 %2656 }
0x25b4   :  { %v5273_v28 = vmul.f32 %v2657_v25, %v2618_v36  ;;  %v4127_v25 = vld [vmem:[#allocation14 + $0x10] sm:$0xff]  }
0x25b5   :  { %v2659_v12 = vpop.permute.xlu1 %2658 }
0x25b6   :  { %v5276_v15 = vmul.f32 %v2659_v12, %v2619_v38  ;;  %2676 = vrot.lane.b32.xlu0 %v5273_v28, %s4547_s9  ;;  %v4128_v12 = vld [vmem:[#allocation14 + $0x18] sm:$0xff]  }
0x25b8   :  { %v2684_v17 = vpack.c.bf16 %v5276_v15, %v5273_v28  ;;  %2678 = vrot.lane.b32.xlu1 %v5276_v15, %s4547_s9  ;;  %v4142_v28 = vld [vmem:[#allocation20 + $0x18] sm:$0xff]  }
0x25ba   :  { %2666 = vrot.lane.b32.xlu0 %v2650_v53, %s4549_s0 }
0x25bc   :  { %2668 = vrot.lane.b32.xlu1 %v2651_v34, %s4549_s0 }
0x2628   :  { %v2677_v18 = vpop.permute.xlu0 %2676 }
0x2629   :  { %2682 = vst.msk [vmem:[#allocation4] sm:$0xff] %vm614_vm0, %v2677_v18 }
0x262a   :  { %v2679_v19 = vpop.permute.xlu1 %2678 }
0x262b   :  { %2683 = vst.msk [vmem:[#allocation4 + $0x8] sm:$0xff] %vm614_vm0, %v2679_v19 }
0x262c   :  { %v2667_v20 = vpop.permute.xlu0 %2666 }
0x262d   :  { %2672 = vst.msk [vmem:[#allocation5] sm:$0xff] %vm614_vm0, %v2667_v20 }
0x262e   :  { %v2669_v22 = vpop.permute.xlu1 %2668 }
0x262f   :  { %2673 = vst.msk [vmem:[#allocation5 + $0x8] sm:$0xff] %vm614_vm0, %v2669_v22 }
0x2630   :  { %v2693_v24 = vld [vmem:[#allocation4] sm:$0xff] }
0x2632   :  { %v2694_v0 = vld [vmem:[#allocation4 + $0x8] sm:$0xff] }
0x2633   :  { %v2695_v26 = vpack.c.bf16 %v2694_v0, %v2693_v24 }
0x2634   :  { %v2764_v21 = vld [vmem:[#allocation5] sm:$0xff] }
0x2635   :  { %3962 = vmatmul.mubr.msk.bf16.vlgmr.msra.gmra.mrb[52].mxu1 %vm614_vm0, %v2695_v26 }
0x2636   :  { %3969 = vmatprep.mubr.msk.bf16.mxu1 %vm4546_vm1, %v4545_v16  ;;  %v2765_v42 = vld [vmem:[#allocation5 + $0x8] sm:$0xff]  ;;  %3966 = vmatpush3.bf16.msra.mxu1 %v4127_v25 }
0x2637   :  { %3967 = vmatprep.subr.bf16.mxu1 %v4545_v16 }
0x263a   :  { %3968 = vmatpush3.bf16.msra.mxu1 %v4128_v12 }
0x2708   :  { %v2749_v31 = vpop.f32.mrb[52].mxu1 }
0x2709   :  { %v2756_v33 = vadd.f32 %v2749_v31, %v2691_v58  ;;  %v3963_v1 = vpop.f32.mrb[53].mxu1 }
0x270a   :  { %v2752_v56 = vpop.f32.mrb[54].mxu1 }
0x270b   :  { %4251 = vtanh.f32 %v2756_v33  ;;  %v2757_v60 = vadd.f32 %v2752_v56, %v2692_v6  ;;  %v3964_v61 = vpop.f32.mrb[55].mxu1 }
0x270d   :  { %4253 = vtanh.f32 %v2757_v60 }
0x2715   :  { %v4252_v36 = vpop.eup %4251 }
0x2716   :  { %v2760_v47 = vmul.f32 %v4252_v36, %v4776_v32 }
0x2717   :  { %v4254_v38 = vpop.eup %4253 }
0x2718   :  { %v2762_v39 = vadd.f32 %v2760_v47, %v4778_v37  ;;  %v2761_v40 = vmul.f32 %v4254_v38, %v4776_v32 }
0x271a   :  { %2778 = vrot.lane.b32.xlu0 %v2762_v39, %s4533_s25  ;;  %v2763_v41 = vadd.f32 %v2761_v40, %v4778_v37 }
0x271c   :  { %2780 = vrot.lane.b32.xlu1 %v2763_v41, %s4533_s25 }
0x271e   :  { %2768 = vrot.lane.b32.xlu0 %v2764_v21, %s4547_s9 }
0x2720   :  { %2770 = vrot.lane.b32.xlu1 %v2765_v42, %s4547_s9 }
0x278c   :  { %v2779_v48 = vpop.permute.xlu0 %2778 }
0x278d   :  { %v2784_v50 = vmul.f32 %v2779_v48, %v2762_v39 }
0x278e   :  { %v2781_v63 = vpop.permute.xlu1 %2780 }
0x278f   :  { %v2785_v52 = vmul.f32 %v2781_v63, %v2763_v41  ;;  %2788 = vrot.lane.b32.xlu0 %v2784_v50, %s4547_s9 }
0x2790   :  { %v2769_v54 = vpop.permute.xlu0 %2768 }
0x2791   :  { %2790 = vrot.lane.b32.xlu1 %v2785_v52, %s4547_s9  ;;  %v2774_v51 = vmul.f32 %v2769_v54, %v2762_v39 }
0x2792   :  { %v2771_v49 = vpop.permute.xlu1 %2770 }
0x2793   :  { %v2775_v7 = vmul.f32 %v2771_v49, %v2763_v41 }
0x2801   :  { %v2789_v53 = vpop.permute.xlu0 %2788 }
0x2802   :  { %v2794_v34 = vadd.f32 %v2789_v53, %v2774_v51 }
0x2803   :  { %v2791_v8 = vpop.permute.xlu1 %2790 }
0x2804   :  { %4255 = vtanh.f32 %v2794_v34  ;;  %v2795_v9 = vadd.f32 %v2791_v8, %v2775_v7 }
0x2806   :  { %4257 = vtanh.f32 %v2795_v9 }
0x280e   :  { %v4256_v10 = vpop.eup %4255 }
0x280f   :  { %2800 = vrot.lane.b32.xlu0 %v4256_v10, %s4533_s25 }
0x2810   :  { %v4258_v13 = vpop.eup %4257 }
0x2811   :  { %2802 = vrot.lane.b32.xlu1 %v4258_v13, %s4533_s25 }
0x2813   :  { %1623 = vrot.lane.b32.xlu0 %v1621_v57, %s4547_s9 }
0x2815   :  { %1767 = vrot.lane.b32.xlu1 %v1765_v27, %s4547_s9 }
0x2881   :  { %v2801_v18 = vpop.permute.xlu0 %2800 }
0x2882   :  { %v5316_v19 = vmul.f32 %v2801_v18, %v2762_v39 }
0x2883   :  { %v2803_v20 = vpop.permute.xlu1 %2802 }
0x2884   :  { %v5318_v22 = vmul.f32 %v2803_v20, %v2763_v41  ;;  %2820 = vrot.lane.b32.xlu0 %v5316_v19, %s4547_s9 }
0x2885   :  { %v1624_v46 = vpop.permute.xlu0 %1623 }
0x2886   :  { %v2828_v55 = vpack.c.bf16 %v5318_v22, %v5316_v19  ;;  %1626 = vst.msk [vmem:[#allocation2 + $0x30] sm:$0xff] %vm614_vm0, %v1624_v46  ;;  %2822 = vrot.lane.b32.xlu1 %v5318_v22, %s4547_s9 }
0x2887   :  { %v1768_v57 = vpop.permute.xlu1 %1767 }
0x2888   :  { %1770 = vst.msk [vmem:[#allocation2 + $0x38] sm:$0xff] %vm614_vm0, %v1768_v57  ;;  %2810 = vrot.lane.b32.xlu0 %v2794_v34, %s4549_s0 }
0x288a   :  { %2812 = vrot.lane.b32.xlu1 %v2795_v9, %s4549_s0 }
0x288d   :  { %v1777_v11 = vld [vmem:[#allocation2 + $0x30] sm:$0xff] }
0x288e   :  { %3913 = vmatprep.mubr.bf16.mxu0 %v1777_v11 }
0x288f   :  { %v1778_v14 = vld [vmem:[#allocation2 + $0x38] sm:$0xff] }
0x2890   :  { %3914 = vmatmul.mubr.bf16.gmra.mrb[44].mxu0 %v1778_v14 }
0x2891   :  { %3977 = vmatprep.mubr.msk.bf16.mxu0 %vm4546_vm1, %v4545_v16 }
0x28f6   :  { %v2821_v27 = vpop.permute.xlu0 %2820 }
0x28f7   :  { %2826 = vst.msk [vmem:[#allocation4] sm:$0xff] %vm614_vm0, %v2821_v27 }
0x28f8   :  { %v2823_v24 = vpop.permute.xlu1 %2822 }
0x28f9   :  { %2827 = vst.msk [vmem:[#allocation4 + $0x8] sm:$0xff] %vm614_vm0, %v2823_v24 }
0x28fa   :  { %v2811_v0 = vpop.permute.xlu0 %2810 }
0x28fb   :  { %2816 = vst.msk [vmem:[#allocation5] sm:$0xff] %vm614_vm0, %v2811_v0  ;;  %v4129_v0 = vld [vmem:[#allocation14 + $0x10] sm:$0xff]  }
0x28fc   :  { %v2813_v26 = vpop.permute.xlu1 %2812  ;;  %3974 = vmatpush3.bf16.msra.mxu0 %v4129_v0 }
0x28fd   :  { %2817 = vst.msk [vmem:[#allocation5 + $0x8] sm:$0xff] %vm614_vm0, %v2813_v26  ;;  %v4130_v26 = vld [vmem:[#allocation14 + $0x18] sm:$0xff]   ;;  %3975 = vmatprep.subr.bf16.mxu0 %v4545_v16 }
0x28fe   :  { %v2837_v58 = vld [vmem:[#allocation4] sm:$0xff] }
0x2900   :  { %v2838_v31 = vld [vmem:[#allocation4 + $0x8] sm:$0xff]  ;;  %3976 = vmatpush3.bf16.msra.mxu0 %v4130_v26 }
0x2901   :  { %v2839_v33 = vpack.c.bf16 %v2838_v31, %v2837_v58  ;;  %4013 = vmatprep.subr.bf16.mxu0 %v4139_v59 }
0x2902   :  { %v2908_v8 = vld [vmem:[#allocation5] sm:$0xff] }
0x2903   :  { %3970 = vmatmul.mubr.msk.bf16.vlgmr.msra.gmra.mrb[56].mxu1 %vm614_vm0, %v2839_v33 }
0x2904   :  { %v2909_v9 = vld [vmem:[#allocation5 + $0x8] sm:$0xff] }
0x2963   :  { %v3915_v1 = vpop.f32.mrb[44].mxu0 }
0x2964   :  { %v1934_v6 = vpop.f32.mrb[45].mxu0  ;;  %v1943_v60 = vadd.f32 %v3915_v1, %v5084_v29 }
0x2965   :  { %v3916_v56 = vpop.f32.mrb[46].mxu0  ;;  %v1935_v47 = vadd.f32 %v5084_v29, %v1934_v6 }
0x2966   :  { %v1946_v61 = vadd.f32 %v3916_v56, %v5084_v29  ;;  %v1937_v36 = vpop.f32.mrb[47].mxu0 }
0x2967   :  { %v1938_v38 = vadd.f32 %v5084_v29, %v1937_v36 }
0x2968   :  { %v5341_v39 = vpack.c.bf16 %v1946_v61, %v1943_v60 }
0x2969   :  { %v1955_v40 = vpack.c.bf16 %v1938_v38, %v1935_v47 }
0x296b   :  { %v2835_v41 = vunpack.c.l.bf16 %v1955_v40  ;;  %v2836_v50 = vunpack.c.h.bf16 %v1955_v40 }
0x29d6   :  { %v2893_v21 = vpop.f32.mrb[56].mxu1 }
0x29d7   :  { %v2900_v42 = vadd.f32 %v2893_v21, %v2835_v41  ;;  %v3971_v48 = vpop.f32.mrb[57].mxu1  ;;  %v2979_v21 = vunpack.c.l.bf16 %v5341_v39 }
0x29d8   :  { %v2896_v63 = vpop.f32.mrb[58].mxu1 }
0x29d9   :  { %4259 = vtanh.f32 %v2900_v42  ;;  %v2901_v52 = vadd.f32 %v2896_v63, %v2836_v50  ;;  %v3972_v54 = vpop.f32.mrb[59].mxu1  ;;  %v2980_v63 = vunpack.c.h.bf16 %v5341_v39 }
0x29db   :  { %4261 = vtanh.f32 %v2901_v52 }
0x29e3   :  { %v4260_v49 = vpop.eup %4259 }
0x29e4   :  { %v2904_v51 = vmul.f32 %v4260_v49, %v4776_v32 }
0x29e5   :  { %v4262_v53 = vpop.eup %4261 }
0x29e6   :  { %v2906_v7 = vadd.f32 %v2904_v51, %v4778_v37  ;;  %v2905_v29 = vmul.f32 %v4262_v53, %v4776_v32 }
0x29e8   :  { %2922 = vrot.lane.b32.xlu0 %v2906_v7, %s4533_s25  ;;  %v2907_v34 = vadd.f32 %v2905_v29, %v4778_v37 }
0x29ea   :  { %2924 = vrot.lane.b32.xlu1 %v2907_v34, %s4533_s25 }
0x29ec   :  { %2912 = vrot.lane.b32.xlu0 %v2908_v8, %s4547_s9 }
0x29ee   :  { %2914 = vrot.lane.b32.xlu1 %v2909_v9, %s4547_s9 }
0x2a5a   :  { %v2923_v10 = vpop.permute.xlu0 %2922 }
0x2a5b   :  { %v2928_v13 = vmul.f32 %v2923_v10, %v2906_v7 }
0x2a5c   :  { %v2925_v25 = vpop.permute.xlu1 %2924 }
0x2a5d   :  { %v2929_v12 = vmul.f32 %v2925_v25, %v2907_v34  ;;  %2932 = vrot.lane.b32.xlu0 %v2928_v13, %s4547_s9 }
0x2a5e   :  { %v2913_v18 = vpop.permute.xlu0 %2912 }
0x2a5f   :  { %2934 = vrot.lane.b32.xlu1 %v2929_v12, %s4547_s9  ;;  %v2918_v46 = vmul.f32 %v2913_v18, %v2906_v7  ;;  %v4133_v18 = vld [vmem:[#allocation17 + $0x10] sm:$0xff]  }
0x2a60   :  { %v2915_v20 = vpop.permute.xlu1 %2914 }
0x2a61   :  { %v2919_v11 = vmul.f32 %v2915_v20, %v2907_v34  ;;  %v4134_v20 = vld [vmem:[#allocation17 + $0x18] sm:$0xff]  }
0x2acf   :  { %v2933_v57 = vpop.permute.xlu0 %2932 }
0x2ad0   :  { %v2938_v14 = vadd.f32 %v2933_v57, %v2918_v46  ;;  %v4135_v46 = vld [vmem:[#allocation17 + $0x20] sm:$0xff]  }
0x2ad1   :  { %v2935_v27 = vpop.permute.xlu1 %2934 }
0x2ad2   :  { %4263 = vtanh.f32 %v2938_v14  ;;  %v2939_v24 = vadd.f32 %v2935_v27, %v2919_v11 }
0x2ad4   :  { %4265 = vtanh.f32 %v2939_v24 }
0x2adc   :  { %v4264_v58 = vpop.eup %4263 }
0x2add   :  { %2944 = vrot.lane.b32.xlu0 %v4264_v58, %s4533_s25  ;;  %v4136_v58 = vld [vmem:[#allocation17 + $0x28] sm:$0xff]  }
0x2ade   :  { %v4266_v31 = vpop.eup %4265 }
0x2adf   :  { %2946 = vrot.lane.b32.xlu1 %v4266_v31, %s4533_s25 }
0x2b4f   :  { %v2945_v33 = vpop.permute.xlu0 %2944 }
0x2b50   :  { %v5356_v1 = vmul.f32 %v2945_v33, %v2906_v7  ;;  %v4137_v33 = vld [vmem:[#allocation17 + $0x30] sm:$0xff]  }
0x2b51   :  { %v2947_v6 = vpop.permute.xlu1 %2946 }
0x2b52   :  { %v5358_v56 = vmul.f32 %v2947_v6, %v2907_v34  ;;  %2964 = vrot.lane.b32.xlu0 %v5356_v1, %s4547_s9  ;;  %v4138_v6 = vld [vmem:[#allocation17 + $0x38] sm:$0xff]  }
0x2b54   :  { %v2972_v60 = vpack.c.bf16 %v5358_v56, %v5356_v1  ;;  %2966 = vrot.lane.b32.xlu1 %v5358_v56, %s4547_s9 }
0x2b56   :  { %2954 = vrot.lane.b32.xlu0 %v2938_v14, %s4549_s0 }
0x2b58   :  { %2956 = vrot.lane.b32.xlu1 %v2939_v24, %s4549_s0 }
0x2bc4   :  { %v2965_v16 = vpop.permute.xlu0 %2964 }
0x2bc5   :  { %2970 = vst.msk [vmem:[#allocation4] sm:$0xff] %vm614_vm0, %v2965_v16 }
0x2bc6   :  { %v2967_v61 = vpop.permute.xlu1 %2966 }
0x2bc7   :  { %2971 = vst.msk [vmem:[#allocation4 + $0x8] sm:$0xff] %vm614_vm0, %v2967_v61 }
0x2bc8   :  { %v2955_v36 = vpop.permute.xlu0 %2954 }
0x2bc9   :  { %2960 = vst.msk [vmem:[#allocation5] sm:$0xff] %vm614_vm0, %v2955_v36 }
0x2bca   :  { %v2957_v47 = vpop.permute.xlu1 %2956 }
0x2bcb   :  { %2961 = vst.msk [vmem:[#allocation5 + $0x8] sm:$0xff] %vm614_vm0, %v2957_v47 }
0x2bcc   :  { %v2981_v38 = vld [vmem:[#allocation4] sm:$0xff] }
0x2bce   :  { %v2982_v40 = vld [vmem:[#allocation4 + $0x8] sm:$0xff] }
0x2bcf   :  { %v2983_v41 = vpack.c.bf16 %v2982_v40, %v2981_v38 }
0x2bd0   :  { %v3052_v39 = vld [vmem:[#allocation5] sm:$0xff] }
0x2bd1   :  { %3978 = vmatmul.mubr.msk.bf16.vlgmr.msra.gmra.mrb[48].mxu0 %vm614_vm0, %v2983_v41 }
0x2bd2   :  { %v3053_v9 = vld [vmem:[#allocation5 + $0x8] sm:$0xff]  ;;  %4014 = vmatpush3.bf16.msra.mxu0 %v4139_v59 }
0x2bd3   :  { %4015 = vmatprep.subr.bf16.mxu0 %v4140_v35 }
0x2bd6   :  { %4016 = vmatpush3.bf16.msra.mxu0 %v4140_v35 }
0x2bd7   :  { %4017 = vmatprep.subr.bf16.mxu0 %v4141_v62 }
0x2bda   :  { %4018 = vmatpush3.bf16.msra.mxu0 %v4141_v62 }
0x2bdb   :  { %4019 = vmatprep.subr.bf16.mxu0 %v4142_v28 }
0x2bde   :  { %4020 = vmatpush3.bf16.msra.mxu0 %v4142_v28 }
0x2ca4   :  { %v3037_v42 = vpop.f32.mrb[48].mxu0 }
0x2ca5   :  { %v3044_v48 = vadd.f32 %v3037_v42, %v2979_v21  ;;  %v3979_v50 = vpop.f32.mrb[49].mxu0  ;;  %v4145_v21 = vld [vmem:[#allocation20 + $0x30] sm:$0xff]   ;;  %v4146_v42 = vld [vmem:[#allocation20 + $0x38] sm:$0xff]  }
0x2ca6   :  { %v3040_v52 = vpop.f32.mrb[50].mxu0 }
0x2ca7   :  { %4267 = vtanh.f32 %v3044_v48  ;;  %v3045_v54 = vadd.f32 %v3040_v52, %v2980_v63  ;;  %v3980_v49 = vpop.f32.mrb[51].mxu0 }
0x2ca8   :  { %v3611_v49 = vld [vmem:[#allocation18] ss:$0 sm:$0xff] }
0x2ca9   :  { %4269 = vtanh.f32 %v3045_v54 }
0x2cb1   :  { %v4268_v51 = vpop.eup %4267 }
0x2cb2   :  { %v3048_v53 = vmul.f32 %v4268_v51, %v4776_v32 }
0x2cb3   :  { %v4270_v7 = vpop.eup %4269 }
0x2cb4   :  { %v3050_v29 = vadd.f32 %v3048_v53, %v4778_v37  ;;  %v3049_v34 = vmul.f32 %v4270_v7, %v4776_v32  ;;  %v4131_v32 = vld [vmem:[#allocation17] sm:$0xff]  }
0x2cb5   :  { %3981 = vmatprep.subr.bf16.mxu1 %v4131_v32 }
0x2cb6   :  { %3066 = vrot.lane.b32.xlu0 %v3050_v29, %s4533_s25  ;;  %v5380_v8 = vadd.f32 %v3049_v34, %v4778_v37  ;;  %v4132_v37 = vld [vmem:[#allocation17 + $0x8] sm:$0xff]   ;;  %3982 = vmatpush3.bf16.msra.mxu1 %v4131_v32 }
0x2cb7   :  { %3983 = vmatprep.subr.bf16.mxu1 %v4132_v37 }
0x2cb8   :  { %3068 = vrot.lane.b32.xlu1 %v5380_v8, %s4533_s25 }
0x2cba   :  { %3056 = vrot.lane.b32.xlu0 %v3052_v39, %s4547_s9  ;;  %3984 = vmatpush3.bf16.msra.mxu1 %v4132_v37 }
0x2cbb   :  { %3985 = vmatprep.subr.bf16.mxu1 %v4133_v18 }
0x2cbc   :  { %3058 = vrot.lane.b32.xlu1 %v3053_v9, %s4547_s9 }
0x2cbe   :  { %3986 = vmatpush3.bf16.msra.mxu1 %v4133_v18 }
0x2cbf   :  { %3987 = vmatprep.subr.bf16.mxu1 %v4134_v20 }
0x2cc2   :  { %3988 = vmatpush3.bf16.msra.mxu1 %v4134_v20 }
0x2cc3   :  { %3989 = vmatprep.subr.bf16.mxu1 %v4135_v46 }
0x2cc6   :  { %3990 = vmatpush3.bf16.msra.mxu1 %v4135_v46 }
0x2cc7   :  { %3991 = vmatprep.subr.bf16.mxu1 %v4136_v58 }
0x2cca   :  { %3992 = vmatpush3.bf16.msra.mxu1 %v4136_v58 }
0x2ccb   :  { %3993 = vmatprep.subr.bf16.mxu1 %v4137_v33 }
0x2cce   :  { %3994 = vmatpush3.bf16.msra.mxu1 %v4137_v33 }
0x2ccf   :  { %3995 = vmatprep.subr.bf16.mxu1 %v4138_v6 }
0x2cd2   :  { %3996 = vmatpush3.bf16.msra.mxu1 %v4138_v6 }
0x2d28   :  { %v3067_v10 = vpop.permute.xlu0 %3066 }
0x2d29   :  { %v3072_v13 = vmul.f32 %v3067_v10, %v3050_v29 }
0x2d2a   :  { %v3069_v25 = vpop.permute.xlu1 %3068 }
0x2d2b   :  { %v3073_v12 = vmul.f32 %v3069_v25, %v5380_v8  ;;  %3076 = vrot.lane.b32.xlu0 %v3072_v13, %s4547_s9 }
0x2d2c   :  { %v3057_v57 = vpop.permute.xlu0 %3056 }
0x2d2d   :  { %3078 = vrot.lane.b32.xlu1 %v3073_v12, %s4547_s9  ;;  %v3062_v14 = vmul.f32 %v3057_v57, %v3050_v29 }
0x2d2e   :  { %v3059_v11 = vpop.permute.xlu1 %3058 }
0x2d2f   :  { %v3063_v24 = vmul.f32 %v3059_v11, %v5380_v8 }
0x2d9d   :  { %v3077_v27 = vpop.permute.xlu0 %3076 }
0x2d9e   :  { %v3082_v0 = vadd.f32 %v3077_v27, %v3062_v14 }
0x2d9f   :  { %v3079_v26 = vpop.permute.xlu1 %3078 }
0x2da0   :  { %4271 = vtanh.f32 %v3082_v0  ;;  %v3083_v31 = vadd.f32 %v3079_v26, %v3063_v24 }
0x2da2   :  { %4273 = vtanh.f32 %v3083_v31 }
0x2daa   :  { %v4272_v16 = vpop.eup %4271 }
0x2dab   :  { %3088 = vrot.lane.b32.xlu0 %v4272_v16, %s4533_s25 }
0x2dac   :  { %v4274_v61 = vpop.eup %4273 }
0x2dad   :  { %3090 = vrot.lane.b32.xlu1 %v4274_v61, %s4533_s25  ;;  %s4550_s25 = smov [#allocation23]  }
0x2dae   :  { %s3511_s18 = sshll.u32 %s4550_s25, 4  ;;  %s3512_s18 = int_to_ptr.vmem [resolvable:$true] %s3511_s18 }
0x2daf   :  { %2110 = vrot.lane.b32.xlu0 %v2108_v30, %s4547_s9  ;;  %s4495_s4 = scalar_lea.vmem %s3512_s18, 2048  ;;  %p4500_p11 = scmp.lt.s32.totalorder %s3512_s18, %s3512_s18 }
0x2db0   :  { %p4496_p10 = scmp.ne.s32.totalorder %s3512_s18, %s4495_s4  ;;  %p4501_p12 = scmp.lt.s32.totalorder %s4495_s4, %s4495_s4 }
0x2db1   :  { %2254 = vrot.lane.b32.xlu1 %v2252_v3, %s4547_s9 }
0x2db2   :  { %p4502_p13 = por %p4501_p12, %p4500_p11 }
0x2db3   :  { %2398 = vrot.lane.b32.xlu0 %v2396_v45, %s4547_s9 }
0x2db4   :  { %p4503_p0 = pnand %p4502_p13, %p4496_p10 }
0x2db5   :  { %2542 = vrot.lane.b32.xlu1 %v2540_v23, %s4547_s9 }
0x2db7   :  { %2686 = vrot.lane.b32.xlu0 %v2684_v17, %s4547_s9 }
0x2db9   :  { %2830 = vrot.lane.b32.xlu1 %v2828_v55, %s4547_s9  ;;  %v4143_v55 = vld [vmem:[#allocation20 + $0x20] sm:$0xff]  }
0x2dba   :  { %4021 = vmatprep.subr.bf16.mxu0 %v4143_v55 }
0x2dbb   :  { %2974 = vrot.lane.b32.xlu0 %v2972_v60, %s4547_s9  ;;  %v4144_v60 = vld [vmem:[#allocation20 + $0x28] sm:$0xff]   ;;  %4022 = vmatpush3.bf16.msra.mxu0 %v4143_v55 }
0x2dbc   :  { %4023 = vmatprep.subr.bf16.mxu0 %v4144_v60 }
0x2dbf   :  { %3098 = vrot.lane.b32.xlu0 %v3082_v0, %s4549_s0  ;;  %4024 = vmatpush3.bf16.msra.mxu0 %v4144_v60 }
0x2dc0   :  { %4025 = vmatprep.subr.bf16.mxu0 %v4145_v21 }
0x2dc3   :  { %4026 = vmatpush3.bf16.msra.mxu0 %v4145_v21  ;;  %v3620_v21 = vld [vmem:[#allocation21] ss:$0 sm:$0xff] }
0x2dc4   :  { %4027 = vmatprep.subr.bf16.mxu0 %v4146_v42 }
0x2dc7   :  { %4028 = vmatpush3.bf16.msra.mxu0 %v4146_v42 }
0x2e1d   :  { %v3089_v5 = vpop.permute.xlu0 %3088 }
0x2e1e   :  { %v3094_v4 = vmul.f32 %v3089_v5, %v3050_v29 }
0x2e1f   :  { %v3091_v30 = vpop.permute.xlu1 %3090 }
0x2e20   :  { %v3095_v3 = vmul.f32 %v3091_v30, %v5380_v8  ;;  %3108 = vrot.lane.b32.xlu0 %v3094_v4, %s4547_s9 }
0x2e21   :  { %v2111_v43 = vpop.permute.xlu0 %2110 }
0x2e22   :  { %v3116_v44 = vpack.c.bf16 %v3095_v3, %v3094_v4  ;;  %2113 = vst.msk [vmem:[#allocation2] sm:$0xff] %vm614_vm0, %v2111_v43 }
0x2e23   :  { %v2255_v45 = vpop.permute.xlu1 %2254 }
0x2e24   :  { %2257 = vst.msk [vmem:[#allocation2 + $0x8] sm:$0xff] %vm614_vm0, %v2255_v45  ;;  %3118 = vrot.lane.b32.xlu1 %v3116_v44, %s4547_s9 }
0x2e25   :  { %v2399_v2 = vpop.permute.xlu0 %2398 }
0x2e26   :  { %2401 = vst.msk [vmem:[#allocation2 + $0x10] sm:$0xff] %vm614_vm0, %v2399_v2 }
0x2e27   :  { %v2543_v23 = vpop.permute.xlu1 %2542 }
0x2e28   :  { %2545 = vst.msk [vmem:[#allocation2 + $0x18] sm:$0xff] %vm614_vm0, %v2543_v23  ;;  %3100 = vrot.lane.b32.xlu1 %v3083_v31, %s4549_s0 }
0x2e29   :  { %v2687_v15 = vpop.permute.xlu0 %2686  ;;  %v3122_v17 = vld [vmem:[#allocation2] sm:$0xff] }
0x2e2a   :  { %2689 = vst.msk [vmem:[#allocation2 + $0x20] sm:$0xff] %vm614_vm0, %v2687_v15  ;;  %3997 = vmatprep.mubr.bf16.mxu1 %v3122_v17 }
0x2e2b   :  { %v2831_v19 = vpop.permute.xlu1 %2830  ;;  %v3123_v22 = vld [vmem:[#allocation2 + $0x8] sm:$0xff] }
0x2e2c   :  { %2833 = vst.msk [vmem:[#allocation2 + $0x28] sm:$0xff] %vm614_vm0, %v2831_v19  ;;  %3110 = vrot.lane.b32.xlu1 %v3095_v3, %s4547_s9  ;;  %3998 = vmatmul.mubr.bf16.vlgmr.msra.gmra.mrb[60].mxu1 %v3123_v22 }
0x2e2d   :  { %v2975_v1 = vpop.permute.xlu0 %2974  ;;  %v3124_v56 = vld [vmem:[#allocation2 + $0x10] sm:$0xff] }
0x2e2e   :  { %2977 = vst.msk [vmem:[#allocation2 + $0x30] sm:$0xff] %vm614_vm0, %v2975_v1  ;;  %4001 = vmatprep.mubr.bf16.mxu1 %v3124_v56 }
0x2e2f   :  { %v3125_v47 = vld [vmem:[#allocation2 + $0x18] sm:$0xff] }
0x2e31   :  { %v3099_v36 = vpop.permute.xlu0 %3098  ;;  %v3126_v38 = vld [vmem:[#allocation2 + $0x20] sm:$0xff] }
0x2e32   :  { %3104 = vst.msk [vmem:[#allocation5] sm:$0xff] %vm614_vm0, %v3099_v36 }
0x2e33   :  { %v3127_v40 = vld [vmem:[#allocation2 + $0x28] sm:$0xff] }
0x2e34   :  { %4002 = vmatmul.mubr.bf16.gmra.mrb[64].mxu1 %v3125_v47 }
0x2e35   :  { %4005 = vmatprep.mubr.bf16.mxu1 %v3126_v38  ;;  %v3128_v41 = vld [vmem:[#allocation2 + $0x30] sm:$0xff] }
0x2e3c   :  { %4006 = vmatmul.mubr.bf16.gmra.mrb[68].mxu1 %v3127_v40 }
0x2e3d   :  { %4009 = vmatprep.mubr.bf16.mxu1 %v3128_v41 }
0x2e92   :  { %v3109_v48 = vpop.permute.xlu0 %3108 }
0x2e93   :  { %3114 = vst.msk [vmem:[#allocation4] sm:$0xff] %vm614_vm0, %v3109_v48 }
0x2e96   :  { %v3119_v50 = vpop.permute.xlu1 %3118 }
0x2e97   :  { %3121 = vst.msk [vmem:[#allocation2 + $0x38] sm:$0xff] %vm614_vm0, %v3119_v50 }
0x2e9a   :  { %v3101_v63 = vpop.permute.xlu1 %3100 }
0x2e9b   :  { %3105 = vst.msk [vmem:[#allocation5 + $0x8] sm:$0xff] %vm614_vm0, %v3101_v63 }
0x2e9e   :  { %v3111_v52 = vpop.permute.xlu1 %3110  ;;  %v3129_v54 = vld [vmem:[#allocation2 + $0x38] sm:$0xff] }
0x2e9f   :  { %3115 = vst.msk [vmem:[#allocation4 + $0x8] sm:$0xff] %vm614_vm0, %v3111_v52  ;;  %4010 = vmatmul.mubr.bf16.gmra.mrb[72].mxu1 %v3129_v54 }
0x2eff   :  { %v3999_v51 = vpop.f32.mrb[60].mxu1 }
0x2f00   :  { %v3244_v53 = vadd.f32 %v3999_v51, %v3611_v49  ;;  %v3235_v7 = vpop.f32.mrb[61].mxu1 }
0x2f01   :  { %v3236_v29 = vadd.f32 %v3611_v49, %v3235_v7  ;;  %v4000_v34 = vpop.f32.mrb[62].mxu1 }
0x2f02   :  { %v3247_v8 = vadd.f32 %v4000_v34, %v3611_v49  ;;  %v3238_v39 = vpop.f32.mrb[63].mxu1  ;;  %v3300_v10 = vmax.f32 %v3244_v53, 0.0 }
0x2f03   :  { %v3239_v9 = vadd.f32 %v3611_v49, %v3238_v39  ;;  %v3298_v25 = vmax.f32 %v3236_v29, 0.0 }
0x2f04   :  { %v3301_v13 = vmax.f32 %v3247_v8, 0.0 }
0x2f05   :  { %v3299_v12 = vmax.f32 %v3239_v9, 0.0 }
0x2f06   :  { %v3315_v32 = vpack.c.bf16 %v3301_v13, %v3300_v10 }
0x2f07   :  { %v3314_v37 = vpack.c.bf16 %v3299_v12, %v3298_v25  ;;  %v4003_v18 = vpop.f32.mrb[64].mxu1 }
0x2f08   :  { %v3260_v20 = vadd.f32 %v4003_v18, %v3611_v49  ;;  %v3251_v46 = vpop.f32.mrb[65].mxu1 }
0x2f09   :  { %v3252_v57 = vadd.f32 %v3611_v49, %v3251_v46  ;;  %v4004_v11 = vpop.f32.mrb[66].mxu1  ;;  %4029 = vmatprep.mubr.bf16.mxu0 %v3314_v37 }
0x2f0a   :  { %v3263_v14 = vadd.f32 %v4004_v11, %v3611_v49  ;;  %v3254_v27 = vpop.f32.mrb[67].mxu1  ;;  %4030 = vmatmul.mubr.bf16.vlgmr.msra.gmra.mrb[52].mxu0 %v3315_v32  ;;  %v3304_v0 = vmax.f32 %v3260_v20, 0.0 }
0x2f0b   :  { %v3255_v24 = vadd.f32 %v3611_v49, %v3254_v27  ;;  %v3302_v58 = vmax.f32 %v3252_v57, 0.0 }
0x2f0c   :  { %v3305_v26 = vmax.f32 %v3263_v14, 0.0 }
0x2f0d   :  { %v3303_v31 = vmax.f32 %v3255_v24, 0.0 }
0x2f0e   :  { %v3317_v33 = vpack.c.bf16 %v3305_v26, %v3304_v0 }
0x2f0f   :  { %v3316_v6 = vpack.c.bf16 %v3303_v31, %v3302_v58  ;;  %v4007_v16 = vpop.f32.mrb[68].mxu1 }
0x2f10   :  { %v3276_v61 = vadd.f32 %v4007_v16, %v3611_v49  ;;  %v3267_v5 = vpop.f32.mrb[69].mxu1 }
0x2f11   :  { %v3268_v4 = vadd.f32 %v3611_v49, %v3267_v5  ;;  %v4008_v30 = vpop.f32.mrb[70].mxu1  ;;  %4033 = vmatprep.mubr.bf16.mxu0 %v3316_v6 }
0x2f12   :  { %v3279_v59 = vadd.f32 %v4008_v30, %v3611_v49  ;;  %v3270_v35 = vpop.f32.mrb[71].mxu1  ;;  %4034 = vmatmul.mubr.bf16.gmra.mrb[56].mxu0 %v3317_v33  ;;  %v3308_v43 = vmax.f32 %v3276_v61, 0.0 }
0x2f13   :  { %v3271_v3 = vadd.f32 %v3611_v49, %v3270_v35  ;;  %v3306_v45 = vmax.f32 %v3268_v4, 0.0 }
0x2f14   :  { %v3309_v44 = vmax.f32 %v3279_v59, 0.0 }
0x2f15   :  { %v3307_v62 = vmax.f32 %v3271_v3, 0.0 }
0x2f16   :  { %v3319_v2 = vpack.c.bf16 %v3309_v44, %v3308_v43 }
0x2f17   :  { %v3318_v23 = vpack.c.bf16 %v3307_v62, %v3306_v45 }
0x2f19   :  { %4037 = vmatprep.mubr.bf16.mxu0 %v3318_v23 }
0x2f1a   :  { %4038 = vmatmul.mubr.bf16.gmra.mrb[60].mxu0 %v3319_v2 }
0x2f72   :  { %v4011_v28 = vpop.f32.mrb[72].mxu1 }
0x2f73   :  { %v3292_v15 = vadd.f32 %v4011_v28, %v3611_v49  ;;  %v3283_v17 = vpop.f32.mrb[73].mxu1 }
0x2f74   :  { %v3284_v19 = vadd.f32 %v3611_v49, %v3283_v17  ;;  %v4012_v22 = vpop.f32.mrb[74].mxu1 }
0x2f75   :  { %v3295_v55 = vadd.f32 %v4012_v22, %v3611_v49  ;;  %v3286_v1 = vpop.f32.mrb[75].mxu1  ;;  %v3312_v60 = vmax.f32 %v3292_v15, 0.0 }
0x2f76   :  { %v3287_v56 = vadd.f32 %v3611_v49, %v3286_v1  ;;  %v3310_v47 = vmax.f32 %v3284_v19, 0.0 }
0x2f77   :  { %v3313_v36 = vmax.f32 %v3295_v55, 0.0 }
0x2f78   :  { %v3311_v38 = vmax.f32 %v3287_v56, 0.0 }
0x2f79   :  { %v3321_v40 = vpack.c.bf16 %v3313_v36, %v3312_v60 }
0x2f7a   :  { %v3320_v41 = vpack.c.bf16 %v3311_v38, %v3310_v47 }
0x2f7c   :  { %4041 = vmatprep.mubr.bf16.mxu0 %v3320_v41 }
0x2f7d   :  { %4042 = vmatmul.mubr.bf16.gmra.mrb[64].mxu0 %v3321_v40 }
0x2fdd   :  { %v4031_v42 = vpop.f32.mrb[52].mxu0 }
0x2fde   :  { %v3436_v48 = vadd.f32 %v4031_v42, %v3620_v21  ;;  %v3427_v50 = vpop.f32.mrb[53].mxu0 }
0x2fdf   :  { %v3428_v63 = vadd.f32 %v3620_v21, %v3427_v50  ;;  %v4032_v52 = vpop.f32.mrb[54].mxu0 }
0x2fe0   :  { %3492 = vst [vmem:[#allocation23 + $0x10] sm:$0xff] %v3436_v48  ;;  %v3439_v54 = vadd.f32 %v4032_v52, %v3620_v21  ;;  %v3430_v51 = vpop.f32.mrb[55].mxu0 }
0x2fe1   :  { %3490 = vst [vmem:[#allocation23] sm:$0xff] %v3428_v63  ;;  %v3431_v53 = vadd.f32 %v3620_v21, %v3430_v51 }
0x2fe2   :  { %3493 = vst [vmem:[#allocation23 + $0x18] sm:$0xff] %v3439_v54 }
0x2fe3   :  { %3491 = vst [vmem:[#allocation23 + $0x8] sm:$0xff] %v3431_v53 }
0x2fe5   :  { %v4035_v49 = vpop.f32.mrb[56].mxu0 }
0x2fe6   :  { %v3452_v7 = vadd.f32 %v4035_v49, %v3620_v21  ;;  %v3443_v29 = vpop.f32.mrb[57].mxu0 }
0x2fe7   :  { %v3444_v34 = vadd.f32 %v3620_v21, %v3443_v29  ;;  %v4036_v8 = vpop.f32.mrb[58].mxu0 }
0x2fe8   :  { %3496 = vst [vmem:[#allocation23 + $0x30] sm:$0xff] %v3452_v7  ;;  %v3455_v39 = vadd.f32 %v4036_v8, %v3620_v21  ;;  %v3446_v9 = vpop.f32.mrb[59].mxu0 }
0x2fe9   :  { %3494 = vst [vmem:[#allocation23 + $0x20] sm:$0xff] %v3444_v34  ;;  %v3447_v10 = vadd.f32 %v3620_v21, %v3446_v9 }
0x2fea   :  { %3497 = vst [vmem:[#allocation23 + $0x38] sm:$0xff] %v3455_v39 }
0x2feb   :  { %3495 = vst [vmem:[#allocation23 + $0x28] sm:$0xff] %v3447_v10 }
0x2fed   :  { %v4039_v13 = vpop.f32.mrb[60].mxu0 }
0x2fee   :  { %v3468_v25 = vadd.f32 %v4039_v13, %v3620_v21  ;;  %v3459_v12 = vpop.f32.mrb[61].mxu0 }
0x2fef   :  { %v3460_v32 = vadd.f32 %v3620_v21, %v3459_v12  ;;  %v4040_v37 = vpop.f32.mrb[62].mxu0 }
0x2ff0   :  { %3500 = vst [vmem:[#allocation23 + $0x50] sm:$0xff] %v3468_v25  ;;  %v3471_v18 = vadd.f32 %v4040_v37, %v3620_v21  ;;  %v3462_v20 = vpop.f32.mrb[63].mxu0 }
0x2ff1   :  { %3498 = vst [vmem:[#allocation23 + $0x40] sm:$0xff] %v3460_v32  ;;  %v3463_v46 = vadd.f32 %v3620_v21, %v3462_v20 }
0x2ff2   :  { %3501 = vst [vmem:[#allocation23 + $0x58] sm:$0xff] %v3471_v18 }
0x2ff3   :  { %3499 = vst [vmem:[#allocation23 + $0x48] sm:$0xff] %v3463_v46 }
0x3050   :  { %v4043_v57 = vpop.f32.mrb[64].mxu0 }
0x3051   :  { %v3484_v11 = vadd.f32 %v4043_v57, %v3620_v21  ;;  %v3475_v14 = vpop.f32.mrb[65].mxu0 }
0x3052   :  { %v3476_v27 = vadd.f32 %v3620_v21, %v3475_v14  ;;  %v4044_v24 = vpop.f32.mrb[66].mxu0 }
0x3053   :  { %3504 = vst [vmem:[#allocation23 + $0x70] sm:$0xff] %v3484_v11  ;;  %v3487_v0 = vadd.f32 %v4044_v24, %v3620_v21  ;;  %v3478_v26 = vpop.f32.mrb[67].mxu0 }
0x3054   :  { %3502 = vst [vmem:[#allocation23 + $0x60] sm:$0xff] %v3476_v27  ;;  %v3479_v58 = vadd.f32 %v3620_v21, %v3478_v26 }
0x3055   :  { %3505 = vst [vmem:[#allocation23 + $0x78] sm:$0xff] %v3487_v0 }
0x3056   :  { %3503 = vst [vmem:[#allocation23 + $0x68] sm:$0xff] %v3479_v58 }
0x3057   :  { %4506 = shalt.err (!%p4503_p0)
}
0x3058   :  { %s4507_s30 = scalar_lea.hbm %s5460_s10, 2048 }
0x3059   :  { %p4508_p1 = scmp.ne.s32.totalorder %s5460_s10, %s4507_s30  ;;  %p4511_p2 = scmp.lt.u32.totalorder %s4507_s30, %s5460_s10 }
0x305b   :  { %p4513_p3 = pnand %p4511_p2, %p4508_p1 }
0x305d   :  { %4516 = shalt.err (!%p4513_p3)
}
0x305e   :  { %s4551_s13 = smov 128   ;;  %s4552_s17 = smov 8  }
0x305f   :  { %3517 = dma.vmem_to_hbm [thread:$0]  %s3512_s18, 2048, %s5460_s10, [#allocation8], %s4551_s13, %s4551_s13, %s4552_s17  }
0x3060   :  { %4529 = dma.done.wait [#allocation8], 2048  }
0x3061   :  { %4530 = vsyncadd [#allocation8], 4294965248 }
0x3062   :  { %3521 = vsyncpa [#allocation7], 1 }
0x3063   :  { %3522 = vsyncpa [#allocation10], 1 }
0x3064   :  { %3523 = vsyncpa [#allocation13], 1 }
0x3065   :  { %3524 = vsyncpa [#allocation16], 1 }
0x3066   :  { %3525 = vsyncpa [#allocation19], 1 }
0x3067   :  { %3526 = vsyncpa [#allocation22], 1 }
0x3068   :  { %3527 = vsyncpa [#allocation8], 1 }

</bundles_post_ra>
